<compile_context>
chip_gen: v6e
topology: v6e:2x2x1
jax: 0.10.0
libtpu: 0.0.40
codegen_flags: <defaults>
</compile_context>

<pallas_src>
import functools

import jax
import jax.numpy as jnp
from jax.experimental import pallas as pl
from jax.experimental.pallas import tpu as pltpu

MAX_VQA_LENGTH = 20  # kept for parity with the reference module (unused at runtime)

_LANE = 128  # lane-density target for the answer (output) dimension
_SQRT_2_OVER_PI = 0.7978845608028654


def _round_up(x, m):
    return ((x + m - 1) // m) * m


def _gelu(x):
    # tanh-form GeLU (jnp.tanh lowers to the EUP).  The reference module uses
    # the erf form; max abs deviation of the tanh form is ~1e-3, below the
    # bf16 matmul noise on this path.
    return 0.5 * x * (1.0 + jnp.tanh(_SQRT_2_OVER_PI * (x + 0.044715 * x * x * x)))


def _vqa_kernel(feat_ref, pos_ref, wvf_ref, wvp_ref, bv_ref,
                w1_ref, lnp_ref, w2_ref, b2_ref, out_ref, *, n_obj):
    tb = out_ref.shape[0]
    o_pad = feat_ref.shape[0] // tb
    hid = wvf_ref.shape[1]

    # ---- stand-in visual encoder: split Linear(feat|pos) -> GeLU -> mean-pool ----
    h = (jnp.dot(feat_ref[...], wvf_ref[...], preferred_element_type=jnp.float32)
         + jnp.dot(pos_ref[...], wvp_ref[...], preferred_element_type=jnp.float32)
         + bv_ref[...])                                   # (tb*o_pad, hid) f32
    h = _gelu(h)
    hsum = jnp.sum(h.reshape(tb, o_pad, hid), axis=1)     # sublane reduce, (tb, hid)
    if o_pad != n_obj:
        # zero-padded object rows each contribute exactly gelu(bv); subtract them
        hsum = hsum - float(o_pad - n_obj) * _gelu(bv_ref[...])
    x = hsum * (1.0 / n_obj)                              # mean over the real objects

    # ---- logit_fc: Linear -> GeLU -> BertLayerNorm(eps=1e-12) -> Linear ----
    lnp = lnp_ref[...]                                    # rows: b1, gamma, beta
    b1, gamma, beta = lnp[0:1, :], lnp[1:2, :], lnp[2:3, :]

    h1 = jnp.dot(x.astype(w1_ref.dtype), w1_ref[...],
                 preferred_element_type=jnp.float32) + b1  # (tb, 2*hid) f32
    h1 = _gelu(h1)
    mu = jnp.mean(h1, axis=-1, keepdims=True)
    var = jnp.mean(h1 * h1, axis=-1, keepdims=True) - mu * mu   # one-pass variance
    var = jnp.maximum(var, 0.0)
    ln = (h1 - mu) * jax.lax.rsqrt(var + 1e-12) * gamma + beta

    # resident lane-padded w2: one matmul writes the whole output row-slab
    out_ref[...] = (jnp.dot(ln.astype(w2_ref.dtype), w2_ref[...],
                            preferred_element_type=jnp.float32)
                    + b2_ref[...]).astype(out_ref.dtype)


def init_params(key, feat_dim, hid_dim, num_answers):
    """Deterministic BERT-style init (normal*0.02 weights, zero biases), f32."""
    ks = jax.random.split(key, 5)
    std = 0.02
    return {
        "wv_feat": jax.random.normal(ks[0], (feat_dim, hid_dim), jnp.float32) * std,
        "wv_pos":  jax.random.normal(ks[1], (4, hid_dim), jnp.float32) * std,
        # non-zero stand-in encoder bias so the object-padding correction is exercised
        "bv":      jax.random.normal(ks[2], (1, hid_dim), jnp.float32) * std,
        "w1":      jax.random.normal(ks[3], (hid_dim, 2 * hid_dim), jnp.float32) * std,
        "b1":      jnp.zeros((1, 2 * hid_dim), jnp.float32),
        "gamma":   jnp.ones((1, 2 * hid_dim), jnp.float32),
        "beta":    jnp.zeros((1, 2 * hid_dim), jnp.float32),
        "w2":      jax.random.normal(ks[4], (2 * hid_dim, num_answers), jnp.float32) * std,
        "b2":      jnp.zeros((1, num_answers), jnp.float32),
    }


def prepare_params(params):
    """One-time (off the per-call path): bf16 weights, folded LN params,
    lane-padded answer dimension."""
    num_answers = params["w2"].shape[-1]
    na_pad = _round_up(num_answers, _LANE)
    pad = na_pad - num_answers
    kp = {
        "wv_feat": params["wv_feat"].astype(jnp.bfloat16),
        "wv_pos":  params["wv_pos"].astype(jnp.bfloat16),
        "bv":      params["bv"].astype(jnp.float32),
        "w1":      params["w1"].astype(jnp.bfloat16),
        "lnp":     jnp.concatenate([params["b1"], params["gamma"], params["beta"]],
                                   axis=0).astype(jnp.float32),
        "w2":      jnp.pad(params["w2"], ((0, 0), (0, pad))).astype(jnp.bfloat16),
        "b2":      jnp.pad(params["b2"], ((0, 0), (0, pad))).astype(jnp.float32),
    }
    return kp, num_answers


def _device_kind():
    try:
        return jax.devices()[0].device_kind.lower()
    except Exception:
        return ""


def _vmem_bytes(block_b, o_pad, f, hid, na_pad, weight_bufs):
    bf2, f4 = 2, 4
    streamed = 2 * (block_b * o_pad * f * bf2         # feat tile, double buffered
                    + block_b * o_pad * 4 * bf2       # pos tile
                    + block_b * na_pad * f4)          # output tile
    weights = weight_bufs * (
        (f * hid + 4 * hid + hid * 2 * hid + 2 * hid * na_pad) * bf2
        + (hid + 3 * 2 * hid + na_pad) * f4)
    live = block_b * o_pad * hid * f4 + 2 * block_b * 2 * hid * f4  # h and h1/ln
    return streamed + weights + live


def _choose_block_b(b, o_pad, f, hid, na_pad, kind):
    """Generation-aware batch tile: fill the MXU M dimension, stay inside VMEM,
    and keep >= 2 batch tiles on v7x so both TensorCores get work."""
    m_cap = 128 if "v5" in kind else 256
    two_tc = "v7" in kind
    budget = (100 << 20) if ("v5" in kind or "v6" in kind) else (40 << 20)

    cands = [d for d in range(min(b, m_cap), 0, -1)
             if b % d == 0 and (d % 8 == 0 or d == b)]
    for d in cands:
        if _vmem_bytes(d, o_pad, f, hid, na_pad, weight_bufs=2) > budget:
            continue
        if two_tc and d == b and b >= 16:
            continue
        return d
    return cands[-1] if cands else b


def vqa_forward(feat, pos, kparams, num_answers, *, block_b=None):
    """feat: (b, o, f) float, pos: (b, o, 4) float -> logits (b, num_answers) f32."""
    b, o, f = feat.shape
    assert pos.shape == (b, o, 4)
    hid = kparams["wv_feat"].shape[1]
    na_pad = kparams["w2"].shape[-1]
    o_pad = _round_up(o, 8)
    kind = _device_kind()

    if block_b is None:
        block_b = _choose_block_b(b, o_pad, f, hid, na_pad, kind)
    assert b % block_b == 0, "batch must be divisible by block_b"
    assert block_b % 8 == 0 or block_b == b, "block_b must be a multiple of 8 (or == b)"
    nb = b // block_b

    # pad objects to a sublane multiple (zeros; mean corrected exactly in-kernel)
    if o_pad != o:
        feat = jnp.pad(feat, ((0, 0), (0, o_pad - o), (0, 0)))
        pos = jnp.pad(pos, ((0, 0), (0, o_pad - o), (0, 0)))
    feat2d = feat.reshape(b * o_pad, f).astype(jnp.bfloat16)
    pos2d = pos.reshape(b * o_pad, 4).astype(jnp.bfloat16)

    flops = 2 * (b * o_pad * (f + 4) * hid + b * hid * 2 * hid + b * 2 * hid * na_pad)
    bytes_accessed = ((feat2d.size + pos2d.size) * 2
                      + sum(int(v.size) * v.dtype.itemsize for v in kparams.values())
                      + b * na_pad * 4)
    cost = pl.CostEstimate(flops=int(flops),
                           transcendentals=int(b * o_pad * hid + b * 2 * hid),
                           bytes_accessed=int(bytes_accessed))

    est = _vmem_bytes(block_b, o_pad, f, hid, na_pad, weight_bufs=2)
    vmem_cap = (110 << 20) if ("v5" in kind or "v6" in kind) else (48 << 20)
    vmem_limit = int(max(32 << 20, min(2 * est, vmem_cap)))

    def build(single_buffer_weights):
        if single_buffer_weights:
            def wspec(shape):
                return pl.BlockSpec(shape, lambda i: (0, 0),
                                    pipeline_mode=pl.Buffered(1))
        else:
            def wspec(shape):
                return pl.BlockSpec(shape, lambda i: (0, 0))

        grid_spec = pltpu.PrefetchScalarGridSpec(
            num_scalar_prefetch=0,
            grid=(nb,),
            in_specs=[
                pl.BlockSpec((block_b * o_pad, f), lambda i: (i, 0)),  # feat rows (streamed)
                pl.BlockSpec((block_b * o_pad, 4), lambda i: (i, 0)),  # pos rows  (streamed)
                wspec((f, hid)),            # wv_feat (resident)
                wspec((4, hid)),            # wv_pos  (resident)
                wspec((1, hid)),            # bv      (resident)
                wspec((hid, 2 * hid)),      # w1      (resident)
                wspec((3, 2 * hid)),        # [b1; gamma; beta] (resident)
                wspec((2 * hid, na_pad)),   # w2      (resident, lane-padded)
                wspec((1, na_pad)),         # b2      (resident)
            ],
            out_specs=pl.BlockSpec((block_b, na_pad), lambda i: (i, 0)),
        )
        return pl.pallas_call(
            functools.partial(_vqa_kernel, n_obj=o),
            out_shape=jax.ShapeDtypeStruct((b, na_pad), jnp.float32),
            grid_spec=grid_spec,
            compiler_params=pltpu.CompilerParams(
                dimension_semantics=("parallel",),
                vmem_limit_bytes=vmem_limit),
            cost_estimate=cost,
        )

    def run(single_buffer_weights):
        out = build(single_buffer_weights)(
            feat2d, pos2d,
            kparams["wv_feat"], kparams["wv_pos"], kparams["bv"],
            kparams["w1"], kparams["lnp"], kparams["w2"], kparams["b2"])
        return jax.block_until_ready(out)

    try:
        out_padded = run(True)
    except Exception:
        # TODO(synk): this jax build rejected pl.Buffered(1) single buffering of
        # the grid-invariant weights; fall back to default double buffering.
        out_padded = run(False)

    return out_padded[:, :num_answers]


def _reference_forward(feat, pos, kparams, num_answers):
    """Pure-JAX reference (no object padding) mirroring the kernel's bf16 casts."""
    b, o, f = feat.shape
    hid = kparams["wv_feat"].shape[1]
    feat2d = feat.reshape(b * o, f).astype(jnp.bfloat16)
    pos2d = pos.reshape(b * o, 4).astype(jnp.bfloat16)

    h = (jnp.dot(feat2d, kparams["wv_feat"], preferred_element_type=jnp.float32)
         + jnp.dot(pos2d, kparams["wv_pos"], preferred_element_type=jnp.float32)
         + kparams["bv"])
    h = _gelu(h)
    x = jnp.mean(h.reshape(b, o, hid), axis=1)

    lnp = kparams["lnp"]
    b1, gamma, beta = lnp[0:1], lnp[1:2], lnp[2:3]
    h1 = _gelu(jnp.dot(x.astype(jnp.bfloat16), kparams["w1"],
                       preferred_element_type=jnp.float32) + b1)
    mu = jnp.mean(h1, axis=-1, keepdims=True)
    var = jnp.mean((h1 - mu) ** 2, axis=-1, keepdims=True)
    ln = (h1 - mu) * jax.lax.rsqrt(var + 1e-12) * gamma + beta
    logit = jnp.dot(ln.astype(jnp.bfloat16), kparams["w2"],
                    preferred_element_type=jnp.float32) + kparams["b2"]
    return logit[:, :num_answers]


if __name__ == "__main__":
    # small shapes consistent with forward(feat=(b,o,f), pos=(b,o,4));
    # o=12 is not a multiple of 8 so the object-padding correction is exercised.
    b, o, f = 16, 12, 32         # batch, objects, visual feature size
    hid_dim = 32                 # lxrt_encoder.dim stand-in
    num_answers = 200            # lane-padded to 256 inside prepare_params

    key = jax.random.PRNGKey(0)
    k_feat, k_pos, k_param = jax.random.split(key, 3)
    feat = jax.random.normal(k_feat, (b, o, f), jnp.float32)
    pos = jax.random.uniform(k_pos, (b, o, 4), jnp.float32)

    params = init_params(k_param, f, hid_dim, num_answers)
    kparams, na = prepare_params(params)

    # auto-tiled (generation-aware block_b) ...
    logits = vqa_forward(feat, pos, kparams, na)
    jax.block_until_ready(logits)
    # ... and an explicit 2-batch-tile grid; results must match
    logits2 = vqa_forward(feat, pos, kparams, na, block_b=8)
    jax.block_until_ready(logits2)

    ref = _reference_forward(feat, pos, kparams, na)
    assert logits.shape == (b, num_answers)
    assert jnp.allclose(logits, logits2, atol=1e-5, rtol=1e-5)
    assert jnp.allclose(logits, ref, atol=3e-2, rtol=3e-2)
    print("KERNEL_OK")
</pallas_src>

<mosaic_0001>
module attributes {stable_mosaic.version = 11 : i64} {
  func.func @_vqa_kernel(%arg0: i32, %arg1: memref<256x32xbf16, #tpu.memory_space<vmem>>, %arg2: memref<256x4xbf16, #tpu.memory_space<vmem>>, %arg3: memref<32x32xbf16, #tpu.memory_space<vmem>>, %arg4: memref<4x32xbf16, #tpu.memory_space<vmem>>, %arg5: memref<1x32xf32, #tpu.memory_space<vmem>>, %arg6: memref<32x64xbf16, #tpu.memory_space<vmem>>, %arg7: memref<3x64xf32, #tpu.memory_space<vmem>>, %arg8: memref<64x256xbf16, #tpu.memory_space<vmem>>, %arg9: memref<1x256xf32, #tpu.memory_space<vmem>>, %arg10: memref<16x256xf32, #tpu.memory_space<vmem>>) attributes {dimension_semantics = [#tpu.dimension_semantics<parallel>], iteration_bounds = array<i64: 1>, scalar_prefetch = 0 : i64, scratch_operands = 0 : i64, tpu.core_type = #tpu.core_type<tc>, window_params = [{transform_indices = @transform_0, window_bounds = array<i64: 256, 32>}, {transform_indices = @transform_1, window_bounds = array<i64: 256, 4>}, {pipeline_mode = #tpu.pipeline_mode<synchronous>, transform_indices = @transform_2, window_bounds = array<i64: 32, 32>}, {pipeline_mode = #tpu.pipeline_mode<synchronous>, transform_indices = @transform_3, window_bounds = array<i64: 4, 32>}, {pipeline_mode = #tpu.pipeline_mode<synchronous>, transform_indices = @transform_4, window_bounds = array<i64: 1, 32>}, {pipeline_mode = #tpu.pipeline_mode<synchronous>, transform_indices = @transform_5, window_bounds = array<i64: 32, 64>}, {pipeline_mode = #tpu.pipeline_mode<synchronous>, transform_indices = @transform_6, window_bounds = array<i64: 3, 64>}, {pipeline_mode = #tpu.pipeline_mode<synchronous>, transform_indices = @transform_7, window_bounds = array<i64: 64, 256>}, {pipeline_mode = #tpu.pipeline_mode<synchronous>, transform_indices = @transform_8, window_bounds = array<i64: 1, 256>}, {transform_indices = @transform_9, window_bounds = array<i64: 16, 256>}]} {
    %c0 = arith.constant 0 : index
    %c0_0 = arith.constant 0 : index
    %0 = vector.load %arg1[%c0, %c0_0] : memref<256x32xbf16, #tpu.memory_space<vmem>>, vector<256x32xbf16>
    %c0_1 = arith.constant 0 : index
    %c0_2 = arith.constant 0 : index
    %1 = vector.load %arg3[%c0_1, %c0_2] : memref<32x32xbf16, #tpu.memory_space<vmem>>, vector<32x32xbf16>
    %cst = arith.constant dense<0.000000e+00> : vector<256x32xf32>
    %2 = tpu.matmul %0, %1, %cst {dimension_numbers = #tpu.dot_dimension_numbers<[1], [0], [0], [1], [0, 0, 1, 1], [], []>} : vector<256x32xbf16>, vector<32x32xbf16>, vector<256x32xf32> -> vector<256x32xf32>
    %c0_3 = arith.constant 0 : index
    %c0_4 = arith.constant 0 : index
    %3 = vector.load %arg2[%c0_3, %c0_4] : memref<256x4xbf16, #tpu.memory_space<vmem>>, vector<256x4xbf16>
    %c0_5 = arith.constant 0 : index
    %c0_6 = arith.constant 0 : index
    %4 = vector.load %arg4[%c0_5, %c0_6] : memref<4x32xbf16, #tpu.memory_space<vmem>>, vector<4x32xbf16>
    %cst_7 = arith.constant dense<0.000000e+00> : vector<256x32xf32>
    %5 = tpu.matmul %3, %4, %cst_7 {dimension_numbers = #tpu.dot_dimension_numbers<[1], [0], [0], [1], [0, 0, 1, 1], [], []>} : vector<256x4xbf16>, vector<4x32xbf16>, vector<256x32xf32> -> vector<256x32xf32>
    %6 = arith.addf %2, %5 : vector<256x32xf32>
    %c0_8 = arith.constant 0 : index
    %c0_9 = arith.constant 0 : index
    %7 = vector.load %arg5[%c0_8, %c0_9] : memref<1x32xf32, #tpu.memory_space<vmem>>, vector<1x32xf32>
    %8 = vector.broadcast %7 : vector<1x32xf32> to vector<256x32xf32>
    %9 = arith.addf %6, %8 : vector<256x32xf32>
    %cst_10 = arith.constant 5.000000e-01 : f32
    %10 = vector.broadcast %cst_10 : f32 to vector<256x32xf32>
    %11 = arith.mulf %10, %9 : vector<256x32xf32>
    %cst_11 = arith.constant 4.471500e-02 : f32
    %12 = vector.broadcast %cst_11 : f32 to vector<256x32xf32>
    %13 = arith.mulf %12, %9 : vector<256x32xf32>
    %14 = arith.mulf %13, %9 : vector<256x32xf32>
    %15 = arith.mulf %14, %9 : vector<256x32xf32>
    %16 = arith.addf %9, %15 : vector<256x32xf32>
    %cst_12 = arith.constant 0.797884583 : f32
    %17 = vector.broadcast %cst_12 : f32 to vector<256x32xf32>
    %18 = arith.mulf %17, %16 : vector<256x32xf32>
    %19 = math.tanh %18 : vector<256x32xf32>
    %cst_13 = arith.constant 1.000000e+00 : f32
    %20 = vector.broadcast %cst_13 : f32 to vector<256x32xf32>
    %21 = arith.addf %20, %19 : vector<256x32xf32>
    %22 = arith.mulf %11, %21 : vector<256x32xf32>
    %23 = vector.shape_cast %22 : vector<256x32xf32> to vector<16x16x32xf32>
    %cst_14 = arith.constant dense<0.000000e+00> : vector<16x32xf32>
    %24 = vector.multi_reduction <add>, %23, %cst_14 [1] : vector<16x16x32xf32> to vector<16x32xf32>
    %c0_15 = arith.constant 0 : index
    %c0_16 = arith.constant 0 : index
    %25 = vector.load %arg5[%c0_15, %c0_16] : memref<1x32xf32, #tpu.memory_space<vmem>>, vector<1x32xf32>
    %cst_17 = arith.constant 5.000000e-01 : f32
    %26 = vector.broadcast %cst_17 : f32 to vector<1x32xf32>
    %27 = arith.mulf %26, %25 : vector<1x32xf32>
    %cst_18 = arith.constant 4.471500e-02 : f32
    %28 = vector.broadcast %cst_18 : f32 to vector<1x32xf32>
    %29 = arith.mulf %28, %25 : vector<1x32xf32>
    %30 = arith.mulf %29, %25 : vector<1x32xf32>
    %31 = arith.mulf %30, %25 : vector<1x32xf32>
    %32 = arith.addf %25, %31 : vector<1x32xf32>
    %cst_19 = arith.constant 0.797884583 : f32
    %33 = vector.broadcast %cst_19 : f32 to vector<1x32xf32>
    %34 = arith.mulf %33, %32 : vector<1x32xf32>
    %35 = math.tanh %34 : vector<1x32xf32>
    %cst_20 = arith.constant 1.000000e+00 : f32
    %36 = vector.broadcast %cst_20 : f32 to vector<1x32xf32>
    %37 = arith.addf %36, %35 : vector<1x32xf32>
    %38 = arith.mulf %27, %37 : vector<1x32xf32>
    %cst_21 = arith.constant 4.000000e+00 : f32
    %39 = vector.broadcast %cst_21 : f32 to vector<1x32xf32>
    %40 = arith.mulf %39, %38 : vector<1x32xf32>
    %41 = vector.broadcast %40 : vector<1x32xf32> to vector<16x32xf32>
    %42 = arith.subf %24, %41 : vector<16x32xf32>
    %cst_22 = arith.constant 0.0833333358 : f32
    %43 = vector.broadcast %cst_22 : f32 to vector<16x32xf32>
    %44 = arith.mulf %42, %43 : vector<16x32xf32>
    %c0_23 = arith.constant 0 : index
    %c0_24 = arith.constant 0 : index
    %45 = vector.load %arg7[%c0_23, %c0_24] : memref<3x64xf32, #tpu.memory_space<vmem>>, vector<3x64xf32>
    %46 = vector.extract_strided_slice %45 {offsets = [0, 0], sizes = [1, 64], strides = [1, 1]} : vector<3x64xf32> to vector<1x64xf32>
    %47 = vector.extract_strided_slice %45 {offsets = [1, 0], sizes = [1, 64], strides = [1, 1]} : vector<3x64xf32> to vector<1x64xf32>
    %48 = vector.extract_strided_slice %45 {offsets = [2, 0], sizes = [1, 64], strides = [1, 1]} : vector<3x64xf32> to vector<1x64xf32>
    %49 = arith.truncf %44 : vector<16x32xf32> to vector<16x32xbf16>
    %c0_25 = arith.constant 0 : index
    %c0_26 = arith.constant 0 : index
    %50 = vector.load %arg6[%c0_25, %c0_26] : memref<32x64xbf16, #tpu.memory_space<vmem>>, vector<32x64xbf16>
    %cst_27 = arith.constant dense<0.000000e+00> : vector<16x64xf32>
    %51 = tpu.matmul %49, %50, %cst_27 {dimension_numbers = #tpu.dot_dimension_numbers<[1], [0], [0], [1], [0, 0, 1, 1], [], []>} : vector<16x32xbf16>, vector<32x64xbf16>, vector<16x64xf32> -> vector<16x64xf32>
    %52 = vector.broadcast %46 : vector<1x64xf32> to vector<16x64xf32>
    %53 = arith.addf %51, %52 : vector<16x64xf32>
    %cst_28 = arith.constant 5.000000e-01 : f32
    %54 = vector.broadcast %cst_28 : f32 to vector<16x64xf32>
    %55 = arith.mulf %54, %53 : vector<16x64xf32>
    %cst_29 = arith.constant 4.471500e-02 : f32
    %56 = vector.broadcast %cst_29 : f32 to vector<16x64xf32>
    %57 = arith.mulf %56, %53 : vector<16x64xf32>
    %58 = arith.mulf %57, %53 : vector<16x64xf32>
    %59 = arith.mulf %58, %53 : vector<16x64xf32>
    %60 = arith.addf %53, %59 : vector<16x64xf32>
    %cst_30 = arith.constant 0.797884583 : f32
    %61 = vector.broadcast %cst_30 : f32 to vector<16x64xf32>
    %62 = arith.mulf %61, %60 : vector<16x64xf32>
    %63 = math.tanh %62 : vector<16x64xf32>
    %cst_31 = arith.constant 1.000000e+00 : f32
    %64 = vector.broadcast %cst_31 : f32 to vector<16x64xf32>
    %65 = arith.addf %64, %63 : vector<16x64xf32>
    %66 = arith.mulf %55, %65 : vector<16x64xf32>
    %cst_32 = arith.constant dense<0.000000e+00> : vector<16xf32>
    %67 = vector.multi_reduction <add>, %66, %cst_32 [1] : vector<16x64xf32> to vector<16xf32>
    %68 = vector.shape_cast %67 : vector<16xf32> to vector<16x1xf32>
    %cst_33 = arith.constant 6.400000e+01 : f32
    %69 = vector.broadcast %cst_33 : f32 to vector<16x1xf32>
    %70 = arith.divf %68, %69 : vector<16x1xf32>
    %71 = arith.mulf %66, %66 : vector<16x64xf32>
    %cst_34 = arith.constant dense<0.000000e+00> : vector<16xf32>
    %72 = vector.multi_reduction <add>, %71, %cst_34 [1] : vector<16x64xf32> to vector<16xf32>
    %73 = vector.shape_cast %72 : vector<16xf32> to vector<16x1xf32>
    %cst_35 = arith.constant 6.400000e+01 : f32
    %74 = vector.broadcast %cst_35 : f32 to vector<16x1xf32>
    %75 = arith.divf %73, %74 : vector<16x1xf32>
    %76 = arith.mulf %70, %70 : vector<16x1xf32>
    %77 = arith.subf %75, %76 : vector<16x1xf32>
    %cst_36 = arith.constant 0.000000e+00 : f32
    %78 = vector.broadcast %cst_36 : f32 to vector<16x1xf32>
    %79 = arith.maximumf %77, %78 : vector<16x1xf32>
    %80 = vector.broadcast %70 : vector<16x1xf32> to vector<16x64xf32>
    %81 = arith.subf %66, %80 : vector<16x64xf32>
    %cst_37 = arith.constant 9.99999996E-13 : f32
    %82 = vector.broadcast %cst_37 : f32 to vector<16x1xf32>
    %83 = arith.addf %79, %82 : vector<16x1xf32>
    %84 = math.rsqrt %83 : vector<16x1xf32>
    %85 = vector.broadcast %84 : vector<16x1xf32> to vector<16x64xf32>
    %86 = arith.mulf %81, %85 : vector<16x64xf32>
    %87 = vector.broadcast %47 : vector<1x64xf32> to vector<16x64xf32>
    %88 = arith.mulf %86, %87 : vector<16x64xf32>
    %89 = vector.broadcast %48 : vector<1x64xf32> to vector<16x64xf32>
    %90 = arith.addf %88, %89 : vector<16x64xf32>
    %91 = arith.truncf %90 : vector<16x64xf32> to vector<16x64xbf16>
    %c0_38 = arith.constant 0 : index
    %c0_39 = arith.constant 0 : index
    %92 = vector.load %arg8[%c0_38, %c0_39] : memref<64x256xbf16, #tpu.memory_space<vmem>>, vector<64x256xbf16>
    %cst_40 = arith.constant dense<0.000000e+00> : vector<16x256xf32>
    %93 = tpu.matmul %91, %92, %cst_40 {dimension_numbers = #tpu.dot_dimension_numbers<[1], [0], [0], [1], [0, 0, 1, 1], [], []>} : vector<16x64xbf16>, vector<64x256xbf16>, vector<16x256xf32> -> vector<16x256xf32>
    %c0_41 = arith.constant 0 : index
    %c0_42 = arith.constant 0 : index
    %94 = vector.load %arg9[%c0_41, %c0_42] : memref<1x256xf32, #tpu.memory_space<vmem>>, vector<1x256xf32>
    %95 = vector.broadcast %94 : vector<1x256xf32> to vector<16x256xf32>
    %96 = arith.addf %93, %95 : vector<16x256xf32>
    %c0_43 = arith.constant 0 : index
    %c0_44 = arith.constant 0 : index
    %97 = vector.load %arg10[%c0_43, %c0_44] : memref<16x256xf32, #tpu.memory_space<vmem>>, vector<16x256xf32>
    tpu.vector_store %arg10[%c0_43, %c0_44], %96 {strides = array<i32>} : memref<16x256xf32, #tpu.memory_space<vmem>>, vector<16x256xf32>,
    return
  }
  func.func @transform_0(%arg0: i32) -> (i32, i32) {
    %c0_i32 = arith.constant 0 : i32
    %c0_i32_0 = arith.constant 0 : i32
    return %arg0, %c0_i32 : i32, i32
  }
  func.func @transform_1(%arg0: i32) -> (i32, i32) {
    %c0_i32 = arith.constant 0 : i32
    %c0_i32_0 = arith.constant 0 : i32
    return %arg0, %c0_i32 : i32, i32
  }
  func.func @transform_2(%arg0: i32) -> (i32, i32) {
    %c0_i32 = arith.constant 0 : i32
    %c0_i32_0 = arith.constant 0 : i32
    %c0_i32_1 = arith.constant 0 : i32
    return %c0_i32, %c0_i32_0 : i32, i32
  }
  func.func @transform_3(%arg0: i32) -> (i32, i32) {
    %c0_i32 = arith.constant 0 : i32
    %c0_i32_0 = arith.constant 0 : i32
    %c0_i32_1 = arith.constant 0 : i32
    return %c0_i32, %c0_i32_0 : i32, i32
  }
  func.func @transform_4(%arg0: i32) -> (i32, i32) {
    %c0_i32 = arith.constant 0 : i32
    %c0_i32_0 = arith.constant 0 : i32
    %c0_i32_1 = arith.constant 0 : i32
    return %c0_i32, %c0_i32_0 : i32, i32
  }
  func.func @transform_5(%arg0: i32) -> (i32, i32) {
    %c0_i32 = arith.constant 0 : i32
    %c0_i32_0 = arith.constant 0 : i32
    %c0_i32_1 = arith.constant 0 : i32
    return %c0_i32, %c0_i32_0 : i32, i32
  }
  func.func @transform_6(%arg0: i32) -> (i32, i32) {
    %c0_i32 = arith.constant 0 : i32
    %c0_i32_0 = arith.constant 0 : i32
    %c0_i32_1 = arith.constant 0 : i32
    return %c0_i32, %c0_i32_0 : i32, i32
  }
  func.func @transform_7(%arg0: i32) -> (i32, i32) {
    %c0_i32 = arith.constant 0 : i32
    %c0_i32_0 = arith.constant 0 : i32
    %c0_i32_1 = arith.constant 0 : i32
    return %c0_i32, %c0_i32_0 : i32, i32
  }
  func.func @transform_8(%arg0: i32) -> (i32, i32) {
    %c0_i32 = arith.constant 0 : i32
    %c0_i32_0 = arith.constant 0 : i32
    %c0_i32_1 = arith.constant 0 : i32
    return %c0_i32, %c0_i32_0 : i32, i32
  }
  func.func @transform_9(%arg0: i32) -> (i32, i32) {
    %c0_i32 = arith.constant 0 : i32
    %c0_i32_0 = arith.constant 0 : i32
    return %arg0, %c0_i32 : i32, i32
  }
}

module attributes {stable_mosaic.version = 11 : i64} {
  func.func @_vqa_kernel(%arg0: i32, %arg1: memref<256x32xbf16, #tpu.memory_space<vmem>>, %arg2: memref<256x4xbf16, #tpu.memory_space<vmem>>, %arg3: memref<32x32xbf16, #tpu.memory_space<vmem>>, %arg4: memref<4x32xbf16, #tpu.memory_space<vmem>>, %arg5: memref<1x32xf32, #tpu.memory_space<vmem>>, %arg6: memref<32x64xbf16, #tpu.memory_space<vmem>>, %arg7: memref<3x64xf32, #tpu.memory_space<vmem>>, %arg8: memref<64x256xbf16, #tpu.memory_space<vmem>>, %arg9: memref<1x256xf32, #tpu.memory_space<vmem>>, %arg10: memref<16x256xf32, #tpu.memory_space<vmem>>) attributes {dimension_semantics = [#tpu.dimension_semantics<parallel>], iteration_bounds = array<i64: 1>, scalar_prefetch = 0 : i64, scratch_operands = 0 : i64, tpu.core_type = #tpu.core_type<tc>, window_params = [{transform_indices = @transform_0, window_bounds = array<i64: 256, 32>}, {transform_indices = @transform_1, window_bounds = array<i64: 256, 4>}, {pipeline_mode = #tpu.pipeline_mode<synchronous>, transform_indices = @transform_2, window_bounds = array<i64: 32, 32>}, {pipeline_mode = #tpu.pipeline_mode<synchronous>, transform_indices = @transform_3, window_bounds = array<i64: 4, 32>}, {pipeline_mode = #tpu.pipeline_mode<synchronous>, transform_indices = @transform_4, window_bounds = array<i64: 1, 32>}, {pipeline_mode = #tpu.pipeline_mode<synchronous>, transform_indices = @transform_5, window_bounds = array<i64: 32, 64>}, {pipeline_mode = #tpu.pipeline_mode<synchronous>, transform_indices = @transform_6, window_bounds = array<i64: 3, 64>}, {pipeline_mode = #tpu.pipeline_mode<synchronous>, transform_indices = @transform_7, window_bounds = array<i64: 64, 256>}, {pipeline_mode = #tpu.pipeline_mode<synchronous>, transform_indices = @transform_8, window_bounds = array<i64: 1, 256>}, {transform_indices = @transform_9, window_bounds = array<i64: 16, 256>}]} {
    %c0 = arith.constant 0 : index
    %c0_0 = arith.constant 0 : index
    %0 = vector.load %arg1[%c0, %c0_0] : memref<256x32xbf16, #tpu.memory_space<vmem>>, vector<256x32xbf16>
    %c0_1 = arith.constant 0 : index
    %c0_2 = arith.constant 0 : index
    %1 = vector.load %arg3[%c0_1, %c0_2] : memref<32x32xbf16, #tpu.memory_space<vmem>>, vector<32x32xbf16>
    %cst = arith.constant dense<0.000000e+00> : vector<256x32xf32>
    %2 = tpu.matmul %0, %1, %cst {dimension_numbers = #tpu.dot_dimension_numbers<[1], [0], [0], [1], [0, 0, 1, 1], [], []>} : vector<256x32xbf16>, vector<32x32xbf16>, vector<256x32xf32> -> vector<256x32xf32>
    %c0_3 = arith.constant 0 : index
    %c0_4 = arith.constant 0 : index
    %3 = vector.load %arg2[%c0_3, %c0_4] : memref<256x4xbf16, #tpu.memory_space<vmem>>, vector<256x4xbf16>
    %c0_5 = arith.constant 0 : index
    %c0_6 = arith.constant 0 : index
    %4 = vector.load %arg4[%c0_5, %c0_6] : memref<4x32xbf16, #tpu.memory_space<vmem>>, vector<4x32xbf16>
    %cst_7 = arith.constant dense<0.000000e+00> : vector<256x32xf32>
    %5 = tpu.matmul %3, %4, %cst_7 {dimension_numbers = #tpu.dot_dimension_numbers<[1], [0], [0], [1], [0, 0, 1, 1], [], []>} : vector<256x4xbf16>, vector<4x32xbf16>, vector<256x32xf32> -> vector<256x32xf32>
    %6 = arith.addf %2, %5 : vector<256x32xf32>
    %c0_8 = arith.constant 0 : index
    %c0_9 = arith.constant 0 : index
    %7 = vector.load %arg5[%c0_8, %c0_9] : memref<1x32xf32, #tpu.memory_space<vmem>>, vector<1x32xf32>
    %8 = vector.broadcast %7 : vector<1x32xf32> to vector<256x32xf32>
    %9 = arith.addf %6, %8 : vector<256x32xf32>
    %cst_10 = arith.constant 5.000000e-01 : f32
    %10 = vector.broadcast %cst_10 : f32 to vector<256x32xf32>
    %11 = arith.mulf %10, %9 : vector<256x32xf32>
    %cst_11 = arith.constant 4.471500e-02 : f32
    %12 = vector.broadcast %cst_11 : f32 to vector<256x32xf32>
    %13 = arith.mulf %12, %9 : vector<256x32xf32>
    %14 = arith.mulf %13, %9 : vector<256x32xf32>
    %15 = arith.mulf %14, %9 : vector<256x32xf32>
    %16 = arith.addf %9, %15 : vector<256x32xf32>
    %cst_12 = arith.constant 0.797884583 : f32
    %17 = vector.broadcast %cst_12 : f32 to vector<256x32xf32>
    %18 = arith.mulf %17, %16 : vector<256x32xf32>
    %19 = math.tanh %18 : vector<256x32xf32>
    %cst_13 = arith.constant 1.000000e+00 : f32
    %20 = vector.broadcast %cst_13 : f32 to vector<256x32xf32>
    %21 = arith.addf %20, %19 : vector<256x32xf32>
    %22 = arith.mulf %11, %21 : vector<256x32xf32>
    %23 = vector.shape_cast %22 : vector<256x32xf32> to vector<16x16x32xf32>
    %cst_14 = arith.constant dense<0.000000e+00> : vector<16x32xf32>
    %24 = vector.multi_reduction <add>, %23, %cst_14 [1] : vector<16x16x32xf32> to vector<16x32xf32>
    %c0_15 = arith.constant 0 : index
    %c0_16 = arith.constant 0 : index
    %25 = vector.load %arg5[%c0_15, %c0_16] : memref<1x32xf32, #tpu.memory_space<vmem>>, vector<1x32xf32>
    %cst_17 = arith.constant 5.000000e-01 : f32
    %26 = vector.broadcast %cst_17 : f32 to vector<1x32xf32>
    %27 = arith.mulf %26, %25 : vector<1x32xf32>
    %cst_18 = arith.constant 4.471500e-02 : f32
    %28 = vector.broadcast %cst_18 : f32 to vector<1x32xf32>
    %29 = arith.mulf %28, %25 : vector<1x32xf32>
    %30 = arith.mulf %29, %25 : vector<1x32xf32>
    %31 = arith.mulf %30, %25 : vector<1x32xf32>
    %32 = arith.addf %25, %31 : vector<1x32xf32>
    %cst_19 = arith.constant 0.797884583 : f32
    %33 = vector.broadcast %cst_19 : f32 to vector<1x32xf32>
    %34 = arith.mulf %33, %32 : vector<1x32xf32>
    %35 = math.tanh %34 : vector<1x32xf32>
    %cst_20 = arith.constant 1.000000e+00 : f32
    %36 = vector.broadcast %cst_20 : f32 to vector<1x32xf32>
    %37 = arith.addf %36, %35 : vector<1x32xf32>
    %38 = arith.mulf %27, %37 : vector<1x32xf32>
    %cst_21 = arith.constant 4.000000e+00 : f32
    %39 = vector.broadcast %cst_21 : f32 to vector<1x32xf32>
    %40 = arith.mulf %39, %38 : vector<1x32xf32>
    %41 = vector.broadcast %40 : vector<1x32xf32> to vector<16x32xf32>
    %42 = arith.subf %24, %41 : vector<16x32xf32>
    %cst_22 = arith.constant 0.0833333358 : f32
    %43 = vector.broadcast %cst_22 : f32 to vector<16x32xf32>
    %44 = arith.mulf %42, %43 : vector<16x32xf32>
    %c0_23 = arith.constant 0 : index
    %c0_24 = arith.constant 0 : index
    %45 = vector.load %arg7[%c0_23, %c0_24] : memref<3x64xf32, #tpu.memory_space<vmem>>, vector<3x64xf32>
    %46 = vector.extract_strided_slice %45 {offsets = [0, 0], sizes = [1, 64], strides = [1, 1]} : vector<3x64xf32> to vector<1x64xf32>
    %47 = vector.extract_strided_slice %45 {offsets = [1, 0], sizes = [1, 64], strides = [1, 1]} : vector<3x64xf32> to vector<1x64xf32>
    %48 = vector.extract_strided_slice %45 {offsets = [2, 0], sizes = [1, 64], strides = [1, 1]} : vector<3x64xf32> to vector<1x64xf32>
    %49 = arith.truncf %44 : vector<16x32xf32> to vector<16x32xbf16>
    %c0_25 = arith.constant 0 : index
    %c0_26 = arith.constant 0 : index
    %50 = vector.load %arg6[%c0_25, %c0_26] : memref<32x64xbf16, #tpu.memory_space<vmem>>, vector<32x64xbf16>
    %cst_27 = arith.constant dense<0.000000e+00> : vector<16x64xf32>
    %51 = tpu.matmul %49, %50, %cst_27 {dimension_numbers = #tpu.dot_dimension_numbers<[1], [0], [0], [1], [0, 0, 1, 1], [], []>} : vector<16x32xbf16>, vector<32x64xbf16>, vector<16x64xf32> -> vector<16x64xf32>
    %52 = vector.broadcast %46 : vector<1x64xf32> to vector<16x64xf32>
    %53 = arith.addf %51, %52 : vector<16x64xf32>
    %cst_28 = arith.constant 5.000000e-01 : f32
    %54 = vector.broadcast %cst_28 : f32 to vector<16x64xf32>
    %55 = arith.mulf %54, %53 : vector<16x64xf32>
    %cst_29 = arith.constant 4.471500e-02 : f32
    %56 = vector.broadcast %cst_29 : f32 to vector<16x64xf32>
    %57 = arith.mulf %56, %53 : vector<16x64xf32>
    %58 = arith.mulf %57, %53 : vector<16x64xf32>
    %59 = arith.mulf %58, %53 : vector<16x64xf32>
    %60 = arith.addf %53, %59 : vector<16x64xf32>
    %cst_30 = arith.constant 0.797884583 : f32
    %61 = vector.broadcast %cst_30 : f32 to vector<16x64xf32>
    %62 = arith.mulf %61, %60 : vector<16x64xf32>
    %63 = math.tanh %62 : vector<16x64xf32>
    %cst_31 = arith.constant 1.000000e+00 : f32
    %64 = vector.broadcast %cst_31 : f32 to vector<16x64xf32>
    %65 = arith.addf %64, %63 : vector<16x64xf32>
    %66 = arith.mulf %55, %65 : vector<16x64xf32>
    %cst_32 = arith.constant dense<0.000000e+00> : vector<16xf32>
    %67 = vector.multi_reduction <add>, %66, %cst_32 [1] : vector<16x64xf32> to vector<16xf32>
    %68 = vector.shape_cast %67 : vector<16xf32> to vector<16x1xf32>
    %cst_33 = arith.constant 6.400000e+01 : f32
    %69 = vector.broadcast %cst_33 : f32 to vector<16x1xf32>
    %70 = arith.divf %68, %69 : vector<16x1xf32>
    %71 = arith.mulf %66, %66 : vector<16x64xf32>
    %cst_34 = arith.constant dense<0.000000e+00> : vector<16xf32>
    %72 = vector.multi_reduction <add>, %71, %cst_34 [1] : vector<16x64xf32> to vector<16xf32>
    %73 = vector.shape_cast %72 : vector<16xf32> to vector<16x1xf32>
    %cst_35 = arith.constant 6.400000e+01 : f32
    %74 = vector.broadcast %cst_35 : f32 to vector<16x1xf32>
    %75 = arith.divf %73, %74 : vector<16x1xf32>
    %76 = arith.mulf %70, %70 : vector<16x1xf32>
    %77 = arith.subf %75, %76 : vector<16x1xf32>
    %cst_36 = arith.constant 0.000000e+00 : f32
    %78 = vector.broadcast %cst_36 : f32 to vector<16x1xf32>
    %79 = arith.maximumf %77, %78 : vector<16x1xf32>
    %80 = vector.broadcast %70 : vector<16x1xf32> to vector<16x64xf32>
    %81 = arith.subf %66, %80 : vector<16x64xf32>
    %cst_37 = arith.constant 9.99999996E-13 : f32
    %82 = vector.broadcast %cst_37 : f32 to vector<16x1xf32>
    %83 = arith.addf %79, %82 : vector<16x1xf32>
    %84 = math.rsqrt %83 : vector<16x1xf32>
    %85 = vector.broadcast %84 : vector<16x1xf32> to vector<16x64xf32>
    %86 = arith.mulf %81, %85 : vector<16x64xf32>
    %87 = vector.broadcast %47 : vector<1x64xf32> to vector<16x64xf32>
    %88 = arith.mulf %86, %87 : vector<16x64xf32>
    %89 = vector.broadcast %48 : vector<1x64xf32> to vector<16x64xf32>
    %90 = arith.addf %88, %89 : vector<16x64xf32>
    %91 = arith.truncf %90 : vector<16x64xf32> to vector<16x64xbf16>
    %c0_38 = arith.constant 0 : index
    %c0_39 = arith.constant 0 : index
    %92 = vector.load %arg8[%c0_38, %c0_39] : memref<64x256xbf16, #tpu.memory_space<vmem>>, vector<64x256xbf16>
    %cst_40 = arith.constant dense<0.000000e+00> : vector<16x256xf32>
    %93 = tpu.matmul %91, %92, %cst_40 {dimension_numbers = #tpu.dot_dimension_numbers<[1], [0], [0], [1], [0, 0, 1, 1], [], []>} : vector<16x64xbf16>, vector<64x256xbf16>, vector<16x256xf32> -> vector<16x256xf32>
    %c0_41 = arith.constant 0 : index
    %c0_42 = arith.constant 0 : index
    %94 = vector.load %arg9[%c0_41, %c0_42] : memref<1x256xf32, #tpu.memory_space<vmem>>, vector<1x256xf32>
    %95 = vector.broadcast %94 : vector<1x256xf32> to vector<16x256xf32>
    %96 = arith.addf %93, %95 : vector<16x256xf32>
    %c0_43 = arith.constant 0 : index
    %c0_44 = arith.constant 0 : index
    %97 = vector.load %arg10[%c0_43, %c0_44] : memref<16x256xf32, #tpu.memory_space<vmem>>, vector<16x256xf32>
    tpu.vector_store %arg10[%c0_43, %c0_44], %96 {strides = array<i32>} : memref<16x256xf32, #tpu.memory_space<vmem>>, vector<16x256xf32>,
    return
  }
  func.func @transform_0(%arg0: i32) -> (i32, i32) {
    %c0_i32 = arith.constant 0 : i32
    %c0_i32_0 = arith.constant 0 : i32
    return %arg0, %c0_i32 : i32, i32
  }
  func.func @transform_1(%arg0: i32) -> (i32, i32) {
    %c0_i32 = arith.constant 0 : i32
    %c0_i32_0 = arith.constant 0 : i32
    return %arg0, %c0_i32 : i32, i32
  }
  func.func @transform_2(%arg0: i32) -> (i32, i32) {
    %c0_i32 = arith.constant 0 : i32
    %c0_i32_0 = arith.constant 0 : i32
    %c0_i32_1 = arith.constant 0 : i32
    return %c0_i32, %c0_i32_0 : i32, i32
  }
  func.func @transform_3(%arg0: i32) -> (i32, i32) {
    %c0_i32 = arith.constant 0 : i32
    %c0_i32_0 = arith.constant 0 : i32
    %c0_i32_1 = arith.constant 0 : i32
    return %c0_i32, %c0_i32_0 : i32, i32
  }
  func.func @transform_4(%arg0: i32) -> (i32, i32) {
    %c0_i32 = arith.constant 0 : i32
    %c0_i32_0 = arith.constant 0 : i32
    %c0_i32_1 = arith.constant 0 : i32
    return %c0_i32, %c0_i32_0 : i32, i32
  }
  func.func @transform_5(%arg0: i32) -> (i32, i32) {
    %c0_i32 = arith.constant 0 : i32
    %c0_i32_0 = arith.constant 0 : i32
    %c0_i32_1 = arith.constant 0 : i32
    return %c0_i32, %c0_i32_0 : i32, i32
  }
  func.func @transform_6(%arg0: i32) -> (i32, i32) {
    %c0_i32 = arith.constant 0 : i32
    %c0_i32_0 = arith.constant 0 : i32
    %c0_i32_1 = arith.constant 0 : i32
    return %c0_i32, %c0_i32_0 : i32, i32
  }
  func.func @transform_7(%arg0: i32) -> (i32, i32) {
    %c0_i32 = arith.constant 0 : i32
    %c0_i32_0 = arith.constant 0 : i32
    %c0_i32_1 = arith.constant 0 : i32
    return %c0_i32, %c0_i32_0 : i32, i32
  }
  func.func @transform_8(%arg0: i32) -> (i32, i32) {
    %c0_i32 = arith.constant 0 : i32
    %c0_i32_0 = arith.constant 0 : i32
    %c0_i32_1 = arith.constant 0 : i32
    return %c0_i32, %c0_i32_0 : i32, i32
  }
  func.func @transform_9(%arg0: i32) -> (i32, i32) {
    %c0_i32 = arith.constant 0 : i32
    %c0_i32_0 = arith.constant 0 : i32
    return %arg0, %c0_i32 : i32, i32
  }
}

</mosaic_0001>

<bundles_post_ra>
// kernel: tpu_custom_call.1
= control target key start
LH: loop header
LB: loop body
LE: loop exit
PB: predicated region body
PF: predicated region fallthrough
CT: control target
= control target key end

     0   :  { %vm232_vm0 = vcmask 1041408   ;;  %vm183_vm1 = vcmask 31744   ;;  %vm489_vm2 = vcmask 261120   ;;  %s2594_s0 = inlined_call_operand.vmem [shape: bf16[256,32], index: 0, kind: input, shape index: {}]   ;;  %s2595_s1 = inlined_call_operand.vmem [shape: bf16[256,4], index: 1, kind: input, shape index: {}]   ;;  %s2596_s2 = inlined_call_operand.vmem [shape: bf16[32,32], index: 2, kind: input, shape index: {}]   ;;  %s2597_s3 = inlined_call_operand.vmem [shape: bf16[4,32], index: 3, kind: input, shape index: {}]   ;;  %s2598_s4 = inlined_call_operand.vmem [shape: f32[1,32], index: 4, kind: input, shape index: {}]   ;;  %s2599_s5 = inlined_call_operand.vmem [shape: bf16[32,64], index: 5, kind: input, shape index: {}]   ;;  %s2600_s6 = inlined_call_operand.vmem [shape: f32[3,64], index: 6, kind: input, shape index: {}]   ;;  %s2601_s7 = inlined_call_operand.vmem [shape: bf16[64,256], index: 7, kind: input, shape index: {}]   ;;  %s2602_s8 = inlined_call_operand.vmem [shape: f32[1,256], index: 8, kind: input, shape index: {}]   ;;  %s2603_s9 = inlined_call_operand.hbm [shape: f32[16,256], index: 9, kind: output, shape index: {}]  }
   0x1   :  { %v102_v0 = vld [vmem:[%s2597_s3] sm:$0x3]  ;;  %v1759_v1 = vld [vmem:[%s2596_s2 + $0x8] sm:$0xff]   ;;  %v1765_v8 = vld [vmem:[%s2595_s1 + $0x10] sm:$0xff]  }
   0x2   :  { %1752 = vmatprep.subr.msk.bf16.mxu0 %vm232_vm0, %v102_v0  ;;  %v234_v2 = vsel %vm232_vm0, %v102_v0, 0  ;;  %v1760_v3 = vld [vmem:[%s2595_s1] sm:$0xff]   ;;  %1708 = vmatprep.subr.bf16.mxu1 %v1759_v1  ;;  %v1761_v4 = vld [vmem:[%s2595_s1 + $0x8] sm:$0xff]   ;;  %v1766_v9 = vld [vmem:[%s2595_s1 + $0x18] sm:$0xff]  }
   0x3   :  { %1675 = vmatpush3.bf16.msra.mxu0 %v234_v2  ;;  %1676 = vmatprep.mubr.msk.bf16.mxu0 %vm183_vm1, %v1760_v3  ;;  %v1762_v5 = vld [vmem:[%s2596_s2] sm:$0xff]   ;;  %v1764_v7 = vld [vmem:[%s2594_s0 + $0x8] sm:$0xff]   ;;  %v1767_v10 = vld [vmem:[%s2594_s0 + $0x10] sm:$0xff]  }
   0x4   :  { %1709 = vmatpush3.bf16.msra.mxu1 %v1759_v1  ;;  %v1763_v6 = vld [vmem:[%s2594_s0] sm:$0xff]   ;;  %v1768_v12 = vld [vmem:[%s2594_s0 + $0x18] sm:$0xff]   ;;  %v1770_v14 = vld [vmem:[%s2595_s1 + $0x28] sm:$0xff]  }
   0x5   :  { %1710 = vmatprep.subr.bf16.mxu1 %v1762_v5  ;;  %1712 = vmatprep.mubr.msk.bf16.mxu1 %vm489_vm2, %v1763_v6  ;;  %v1769_v11 = vld [vmem:[%s2595_s1 + $0x20] sm:$0xff]   ;;  %v1773_v15 = vld [vmem:[%s2595_s1 + $0x30] sm:$0xff]   ;;  %v1772_v16 = vld [vmem:[%s2594_s0 + $0x28] sm:$0xff]  }
   0x6   :  { %1677 = vmatmul.mubr.msk.bf16.vlgmr.msra.gmra.mxu0 %vm183_vm1, %v1761_v4  ;;  %v1771_v13 = vld [vmem:[%s2594_s0 + $0x20] sm:$0xff]   ;;  %v1775_v17 = vld [vmem:[%s2594_s0 + $0x30] sm:$0xff]   ;;  %v1774_v18 = vld [vmem:[%s2595_s1 + $0x38] sm:$0xff]  }
   0x7   :  { %1680 = vmatprep.mubr.msk.bf16.mxu0 %vm183_vm1, %v1765_v8  ;;  %v1777_v19 = vld [vmem:[%s2595_s1 + $0x40] sm:$0xff]   ;;  %v1776_v20 = vld [vmem:[%s2594_s0 + $0x38] sm:$0xff]   ;;  %v1778_v22 = vld [vmem:[%s2595_s1 + $0x48] sm:$0xff]  }
   0x8   :  { %1711 = vmatpush3.bf16.msra.mxu1 %v1762_v5  ;;  %v1779_v21 = vld [vmem:[%s2594_s0 + $0x40] sm:$0xff]   ;;  %v1781_v23 = vld [vmem:[%s2595_s1 + $0x50] sm:$0xff]   ;;  %v1780_v24 = vld [vmem:[%s2594_s0 + $0x48] sm:$0xff]  }
   0xb   :  { %1713 = vmatmul.mubr.msk.bf16.vlgmr.msra.gmra.mxu1 %vm489_vm2, %v1764_v7 }
   0xc   :  { %1716 = vmatprep.mubr.msk.bf16.mxu1 %vm489_vm2, %v1767_v10 }
   0xe   :  { %1681 = vmatmul.mubr.msk.bf16.gmra.mxu0 %vm183_vm1, %v1766_v9 }
   0xf   :  { %1684 = vmatprep.mubr.msk.bf16.mxu0 %vm183_vm1, %v1769_v11 }
  0x13   :  { %1717 = vmatmul.mubr.msk.bf16.gmra.mxu1 %vm489_vm2, %v1768_v12 }
  0x14   :  { %1720 = vmatprep.mubr.msk.bf16.mxu1 %vm489_vm2, %v1771_v13 }
  0x16   :  { %1685 = vmatmul.mubr.msk.bf16.gmra.mxu0 %vm183_vm1, %v1770_v14 }
  0x17   :  { %1688 = vmatprep.mubr.msk.bf16.mxu0 %vm183_vm1, %v1773_v15 }
  0x1b   :  { %1721 = vmatmul.mubr.msk.bf16.gmra.mxu1 %vm489_vm2, %v1772_v16 }
  0x1c   :  { %1724 = vmatprep.mubr.msk.bf16.mxu1 %vm489_vm2, %v1775_v17 }
  0x1e   :  { %1689 = vmatmul.mubr.msk.bf16.gmra.mxu0 %vm183_vm1, %v1774_v18 }
  0x1f   :  { %1692 = vmatprep.mubr.msk.bf16.mxu0 %vm183_vm1, %v1777_v19 }
  0x23   :  { %1725 = vmatmul.mubr.msk.bf16.gmra.mxu1 %vm489_vm2, %v1776_v20 }
  0x24   :  { %1728 = vmatprep.mubr.msk.bf16.mxu1 %vm489_vm2, %v1779_v21 }
  0x26   :  { %1693 = vmatmul.mubr.msk.bf16.gmra.mxu0 %vm183_vm1, %v1778_v22 }
  0x27   :  { %1696 = vmatprep.mubr.msk.bf16.mxu0 %vm183_vm1, %v1781_v23 }
  0x28   :  { %14 = vsyncpa [#allocation3], 0  ;;  %v1783_v25 = vld [vmem:[%s2594_s0 + $0x50] sm:$0xff]   ;;  %v1782_v26 = vld [vmem:[%s2595_s1 + $0x58] sm:$0xff]   ;;  %v701_v36 = vlaneseq  ;;  %vm1904_vm3 = vmmov 0   ;;  %vm1276_vm4 = vcmask 1041409  }
  0x29   :  { %v1785_v27 = vld [vmem:[%s2595_s1 + $0x60] sm:$0xff]   ;;  %v1784_v28 = vld [vmem:[%s2594_s0 + $0x58] sm:$0xff]   ;;  %v1786_v30 = vld [vmem:[%s2595_s1 + $0x68] sm:$0xff]   ;;  %vm1279_vm5 = vcmask 1042434   ;;  %vm1282_vm6 = vcmask 1043459   ;;  %vm1285_vm7 = vcmask 1044484  }
  0x2a   :  { %v1787_v29 = vld [vmem:[%s2594_s0 + $0x60] sm:$0xff]   ;;  %v1789_v31 = vld [vmem:[%s2595_s1 + $0x70] sm:$0xff]   ;;  %v1788_v32 = vld [vmem:[%s2594_s0 + $0x68] sm:$0xff]   ;;  %v2096_v37 = vshrl.u32 %v701_v36, 7  ;;  %vm1288_vm8 = vcmask 1045509   ;;  %vm1291_vm9 = vcmask 1046534  }
  0x2b   :  { %1729 = vmatmul.mubr.msk.bf16.gmra.mxu1 %vm489_vm2, %v1780_v24  ;;  %v1791_v33 = vld [vmem:[%s2594_s0 + $0x70] sm:$0xff]   ;;  %v1790_v34 = vld [vmem:[%s2595_s1 + $0x78] sm:$0xff]   ;;  %v2104_v40 = vld [vmem:[%s2598_s4] sm:$0x1]  ;;  %vm1294_vm10 = vcmask 1047559   ;;  %vm1385_vm11 = vcmask 523264  }
  0x2c   :  { %1732 = vmatprep.mubr.msk.bf16.mxu1 %vm489_vm2, %v1783_v25  ;;  %v1792_v35 = vld [vmem:[%s2594_s0 + $0x78] sm:$0xff]   ;;  %v2099_v39 = vsub.s32 0, %v2096_v37  ;;  %v1171_v58 = vmul.f32 0.044715, %v2104_v40  ;;  %s1906_s28 = smov [#allocation2]  }
  0x2d   :  { %s1547_s29 = sshll.u32 %s1906_s28, 4  ;;  %s1548_s29 = int_to_ptr.vmem [resolvable:$true] %s1547_s29 }
  0x2e   :  { %1697 = vmatmul.mubr.msk.bf16.gmra.mxu0 %vm183_vm1, %v1782_v26  ;;  %v2108_v43 = vrot.slane %v2104_v40, %v2099_v39  ;;  %v1172_v4 = vmul.f32 %v1171_v58, %v2104_v40  ;;  %s1881_s30 = scalar_lea.vmem %s1548_s29, 512  ;;  %p1886_p1 = scmp.lt.s32.totalorder %s1548_s29, %s1548_s29 }
  0x2f   :  { %1700 = vmatprep.mubr.msk.bf16.mxu0 %vm183_vm1, %v1785_v27  ;;  %p1882_p0 = scmp.ne.s32.totalorder %s1548_s29, %s1881_s30  ;;  %p1887_p2 = scmp.lt.s32.totalorder %s1881_s30, %s1881_s30 }
  0x30   :  { %v1173_v13 = vmul.f32 %v1172_v4, %v2104_v40 }
  0x31   :  { %p1888_p3 = por %p1887_p2, %p1886_p1 }
  0x32   :  { %v1174_v23 = vadd.f32 %v1173_v13, %v2104_v40 }
  0x33   :  { %1733 = vmatmul.mubr.msk.bf16.gmra.mxu1 %vm489_vm2, %v1784_v28  ;;  %p1889_p4 = pnand %p1888_p3, %p1882_p0 }
  0x34   :  { %1736 = vmatprep.mubr.msk.bf16.mxu1 %vm489_vm2, %v1787_v29 }
  0x36   :  { %1701 = vmatmul.mubr.msk.bf16.gmra.mxu0 %vm183_vm1, %v1786_v30 }
  0x37   :  { %1704 = vmatprep.mubr.msk.bf16.mxu0 %vm183_vm1, %v1789_v31 }
  0x3b   :  { %1737 = vmatmul.mubr.msk.bf16.gmra.mxu1 %vm489_vm2, %v1788_v32 }
  0x3c   :  { %1740 = vmatprep.mubr.msk.bf16.mxu1 %vm489_vm2, %v1791_v33 }
  0x3e   :  { %1705 = vmatmul.mubr.msk.bf16.gmra.mxu0 %vm183_vm1, %v1790_v34 }
  0x43   :  { %1741 = vmatmul.mubr.msk.bf16.gmra.mxu1 %vm489_vm2, %v1792_v35  ;;  %v1175_v35 = vmul.f32 0.7978846, %v1174_v23 }
  0xc6   :  { %v1678_v38 = vpop.f32.mrf.mxu0 }
  0xc8   :  { %v270_v41 = vpop.f32.mrf.mxu0 }
  0xca   :  { %v1679_v42 = vpop.f32.mrf.mxu0 }
  0xcb   :  { %v1714_v44 = vpop.f32.mrf.mxu1 }
  0xcc   :  { %v273_v45 = vpop.f32.mrf.mxu0  ;;  %v581_v46 = vadd.f32 %v1714_v44, %v1678_v38 }
  0xcd   :  { %v572_v47 = vpop.f32.mrf.mxu1 }
  0xce   :  { %v2111_v48 = vadd.f32 %v2108_v43, %v581_v46  ;;  %v1682_v49 = vpop.f32.mrf.mxu0  ;;  %v573_v50 = vadd.f32 %v572_v47, %v270_v41 }
  0xcf   :  { %v1715_v51 = vpop.f32.mrf.mxu1 }
  0xd0   :  { %v584_v52 = vadd.f32 %v1715_v51, %v1679_v42  ;;  %v286_v53 = vpop.f32.mrf.mxu0  ;;  %v772_v55 = vmul.f32 0.044715, %v2111_v48  ;;  %v2118_v57 = vadd.f32 %v2108_v43, %v573_v50 }
  0xd1   :  { %v575_v54 = vpop.f32.mrf.mxu1 }
  0xd2   :  { %v2115_v56 = vadd.f32 %v2108_v43, %v584_v52  ;;  %v576_v59 = vadd.f32 %v575_v54, %v273_v45  ;;  %v1683_v62 = vpop.f32.mrf.mxu0  ;;  %v804_v1 = vmul.f32 %v772_v55, %v2111_v48  ;;  %v770_v3 = vmul.f32 0.044715, %v2118_v57 }
  0xd3   :  { %v1718_v60 = vpop.f32.mrf.mxu1 }
  0xd4   :  { %v773_v61 = vmul.f32 0.044715, %v2115_v56  ;;  %v2123_v63 = vadd.f32 %v2108_v43, %v576_v59  ;;  %v289_v9 = vpop.f32.mrf.mxu0  ;;  %v836_v11 = vmul.f32 %v804_v1, %v2111_v48  ;;  %v802_v12 = vmul.f32 %v770_v3, %v2118_v57 }
  0xd5   :  { %v588_v0 = vpop.f32.mrf.mxu1  ;;  %v597_v14 = vadd.f32 %v1718_v60, %v1682_v49 }
  0xd6   :  { %v805_v2 = vmul.f32 %v773_v61, %v2115_v56  ;;  %v771_v5 = vmul.f32 0.044715, %v2123_v63  ;;  %v1686_v19 = vpop.f32.mrf.mxu0  ;;  %v589_v20 = vadd.f32 %v588_v0, %v286_v53  ;;  %v868_v21 = vadd.f32 %v836_v11, %v2111_v48 }
  0xd7   :  { %v1719_v6 = vpop.f32.mrf.mxu1  ;;  %v834_v22 = vmul.f32 %v802_v12, %v2118_v57  ;;  %v2141_v24 = vadd.f32 %v2108_v43, %v597_v14 }
  0xd8   :  { %v837_v7 = vmul.f32 %v805_v2, %v2115_v56  ;;  %v803_v8 = vmul.f32 %v771_v5, %v2123_v63  ;;  %v600_v17 = vadd.f32 %v1719_v6, %v1683_v62  ;;  %v2148_v30 = vadd.f32 %v2108_v43, %v589_v20  ;;  %v302_v31 = vpop.f32.mrf.mxu0 }
  0xd9   :  { %v591_v10 = vpop.f32.mrf.mxu1  ;;  %v900_v32 = vmul.f32 0.7978846, %v868_v21  ;;  %v866_v34 = vadd.f32 %v834_v22, %v2118_v57  ;;  %v776_v36 = vmul.f32 0.044715, %v2141_v24 }
  0xda   :  { %v869_v16 = vadd.f32 %v837_v7, %v2115_v56  ;;  %v835_v18 = vmul.f32 %v803_v8, %v2123_v63  ;;  %v2144_v27 = vadd.f32 %v2108_v43, %v600_v17  ;;  %v592_v28 = vadd.f32 %v591_v10, %v289_v9  ;;  %v1687_v46 = vpop.f32.mrf.mxu0 }
  0xdb   :  { %v1722_v15 = vpop.f32.mrf.mxu1  ;;  %v774_v45 = vmul.f32 0.044715, %v2148_v30  ;;  %v898_v49 = vmul.f32 0.7978846, %v866_v34  ;;  %v808_v50 = vmul.f32 %v776_v36, %v2141_v24 }
  0xdc   :  { %v901_v26 = vmul.f32 0.7978846, %v869_v16  ;;  %v867_v29 = vadd.f32 %v835_v18, %v2123_v63  ;;  %v613_v33 = vadd.f32 %v1722_v15, %v1686_v19  ;;  %v777_v41 = vmul.f32 0.044715, %v2144_v27  ;;  %v305_v55 = vpop.f32.mrf.mxu0 }
  0xdd   :  { %v604_v25 = vpop.f32.mrf.mxu1  ;;  %v2154_v42 = vadd.f32 %v2108_v43, %v592_v28  ;;  %v806_v54 = vmul.f32 %v774_v45, %v2148_v30  ;;  %v840_v60 = vmul.f32 %v808_v50, %v2141_v24  ;;  %v740_v45 = vmul.f32 0.5, %v2111_v48 }
  0xde   :  { %1807 = vtanh.f32 %v901_v26  ;;  %v899_v44 = vmul.f32 0.7978846, %v867_v29  ;;  %v2158_v47 = vadd.f32 %v2108_v43, %v613_v33  ;;  %v809_v52 = vmul.f32 %v777_v41, %v2144_v27  ;;  %v1690_v2 = vpop.f32.mrf.mxu0 }
  0xdf   :  { %v1723_v38 = vpop.f32.mrf.mxu1  ;;  %1809 = vtanh.f32 %v900_v32  ;;  %v775_v53 = vmul.f32 0.044715, %v2154_v42  ;;  %v605_v58 = vadd.f32 %v604_v25, %v302_v31  ;;  %v838_v1 = vmul.f32 %v806_v54, %v2148_v30 }
  0xe0   :  { %1811 = vtanh.f32 %v1175_v35  ;;  %v780_v59 = vmul.f32 0.044715, %v2158_v47  ;;  %v841_v62 = vmul.f32 %v809_v52, %v2144_v27  ;;  %v872_v5 = vadd.f32 %v840_v60, %v2141_v24  ;;  %v318_v13 = vpop.f32.mrf.mxu0 }
  0xe1   :  { %v607_v51 = vpop.f32.mrf.mxu1  ;;  %1813 = vtanh.f32 %v899_v44  ;;  %v807_v0 = vmul.f32 %v775_v53, %v2154_v42  ;;  %v2170_v3 = vadd.f32 %v2108_v43, %v605_v58  ;;  %v616_v6 = vadd.f32 %v1723_v38, %v1687_v46 }
  0xe2   :  { %1815 = vtanh.f32 %v898_v49  ;;  %v812_v4 = vmul.f32 %v780_v59, %v2158_v47  ;;  %v873_v8 = vadd.f32 %v841_v62, %v2144_v27  ;;  %v870_v11 = vadd.f32 %v838_v1, %v2148_v30  ;;  %v2187_v29 = vpop.f32.mrf.mxu0 }
  0xe3   :  { %v1726_v61 = vpop.f32.mrf.mxu1  ;;  %v839_v9 = vmul.f32 %v807_v0, %v2154_v42  ;;  %v778_v12 = vmul.f32 0.044715, %v2170_v3  ;;  %v904_v16 = vmul.f32 0.7978846, %v872_v5  ;;  %v2180_v17 = vadd.f32 %v2108_v43, %v616_v6 }
  0xe4   :  { %v844_v14 = vmul.f32 %v812_v4, %v2158_v47  ;;  %v608_v18 = vadd.f32 %v607_v51, %v305_v55  ;;  %v905_v22 = vmul.f32 0.7978846, %v873_v8  ;;  %v1170_v25 = vmul.f32 0.5, %v2104_v40  ;;  %v321_v51 = vpop.f32.mrf.mxu0 }
  0xe5   :  { %v620_v7 = vpop.f32.mrf.mxu1  ;;  %v871_v23 = vadd.f32 %v839_v9, %v2154_v42  ;;  %v902_v26 = vmul.f32 0.7978846, %v870_v11  ;;  %v810_v28 = vmul.f32 %v778_v12, %v2170_v3  ;;  %v741_v33 = vmul.f32 0.5, %v2115_v56 }
  0xe6   :  { %v876_v34 = vadd.f32 %v844_v14, %v2158_v47  ;;  %v629_v35 = vadd.f32 %v1726_v61, %v1690_v2  ;;  %1817 = vtanh.f32 %v904_v16  ;;  %v781_v38 = vmul.f32 0.044715, %v2180_v17  ;;  %v2208_v5 = vpop.f32.mrf.mxu0 }
  0xe7   :  { %v2182_v19 = vpop.f32.mrf.mxu1  ;;  %v2193_v41 = vadd.f32 %v2108_v43, %v608_v18  ;;  %1819 = vtanh.f32 %v905_v22  ;;  %v903_v49 = vmul.f32 0.7978846, %v871_v23  ;;  %v842_v56 = vmul.f32 %v810_v28, %v2170_v3 }
  0xe8   :  { %1821 = vtanh.f32 %v902_v26  ;;  %v908_v53 = vmul.f32 0.7978846, %v876_v34  ;;  %v2198_v54 = vadd.f32 %v2108_v43, %v629_v35  ;;  %v739_v58 = vmul.f32 0.5, %v2123_v63 }
  0xe9   :  { %v623_v40 = vpop.f32.mrf.mxu1  ;;  %v813_v59 = vmul.f32 %v781_v38, %v2180_v17  ;;  %v779_v48 = vmul.f32 0.044715, %v2193_v41  ;;  %1823 = vtanh.f32 %v903_v49  ;;  %v621_v0 = vadd.f32 %v620_v7, %v318_v13 }
  0xea   :  { %v738_v1 = vmul.f32 0.5, %v2118_v57  ;;  %v874_v4 = vadd.f32 %v842_v56, %v2170_v3  ;;  %1825 = vtanh.f32 %v908_v53  ;;  %v784_v6 = vmul.f32 0.044715, %v2198_v54 }
  0xeb   :  { %v1808_v10 = vpop.eup %1807  ;;  %v2203_v60 = vpop.f32.mrf.mxu1  ;;  %v811_v11 = vmul.f32 %v779_v48, %v2193_v41  ;;  %v2217_v57 = vadd.f32 %v2108_v43, %v621_v0  ;;  %v742_v34 = vmul.f32 0.5, %v2148_v30  ;;  %v632_v49 = vadd.f32 %v2182_v19, %v2187_v29 }
  0xec   :  { %v1810_v15 = vpop.eup %1809  ;;  %v965_v21 = vadd.f32 1.0, %v1808_v10  ;;  %v845_v10 = vmul.f32 %v813_v59, %v2180_v17  ;;  %v906_v14 = vmul.f32 0.7978846, %v874_v4  ;;  %v816_v16 = vmul.f32 %v784_v6, %v2198_v54 }
  0xed   :  { %v1812_v20 = vpop.eup %1811  ;;  %v964_v32 = vadd.f32 1.0, %v1810_v15  ;;  %v2214_v12 = vpop.f32.mrf.mxu1  ;;  %v843_v22 = vmul.f32 %v811_v11, %v2193_v41  ;;  %v2242_v59 = vmul.f32 0.5, %v2180_v17  ;;  %v2248_v48 = vmul.f32 0.5, %v2193_v41 }
  0xee   :  { %v1814_v31 = vpop.eup %1813  ;;  %v1177_v36 = vadd.f32 1.0, %v1812_v20  ;;  %v997_v46 = vmul.f32 %v965_v21, %v741_v33  ;;  %v334_v15 = vpop.f32.mrf.mxu0  ;;  %v877_v21 = vadd.f32 %v845_v10, %v2180_v17  ;;  %v744_v33 = vmul.f32 0.5, %v2141_v24 }
  0xef   :  { %v1816_v44 = vpop.eup %1815  ;;  %v963_v50 = vadd.f32 1.0, %v1814_v31  ;;  %v996_v52 = vmul.f32 %v964_v32, %v740_v45  ;;  %v1731_v23 = vpop.f32.mrf.mxu1  ;;  %v782_v31 = vmul.f32 0.044715, %v2217_v57  ;;  %1827 = vtanh.f32 %v906_v14 }
  0xf0   :  { %v962_v55 = vadd.f32 1.0, %v1816_v44  ;;  %v1036_v61 = vsel %vm489_vm2, %v997_v46, 0.0  ;;  %v1178_v62 = vmul.f32 %v1177_v36, %v1170_v25  ;;  %v1695_v35 = vpop.f32.mrf.mxu0  ;;  %v624_v36 = vadd.f32 %v623_v40, %v321_v51 }
  0xf1   :  { %v995_v2 = vmul.f32 %v963_v50, %v739_v58  ;;  %v1035_v63 = vsel %vm489_vm2, %v996_v52, 0.0  ;;  %v745_v44 = vmul.f32 0.5, %v2144_v27  ;;  %v743_v45 = vmul.f32 0.5, %v2154_v42  ;;  %v639_v53 = vpop.f32.mrf.mxu1 }
  0xf2   :  { %v994_v8 = vmul.f32 %v962_v55, %v738_v1  ;;  %v1037_v9 = vadd.f32 %v1036_v61, %v1035_v63  ;;  %v1179_v7 = vmul.f32 4.0, %v1178_v62  ;;  %v848_v46 = vmul.f32 %v816_v16, %v2198_v54  ;;  %v337_v29 = vpop.f32.mrf.mxu0 }
  0xf3   :  { %v1027_v13 = vsel %vm489_vm2, %v995_v2, 0.0  ;;  %v1818_v25 = vpop.eup %1817  ;;  %v909_v52 = vmul.f32 0.7978846, %v877_v21  ;;  %v875_v24 = vadd.f32 %v843_v22, %v2193_v41  ;;  %v748_v40 = vmul.f32 0.5, %v2158_v47  ;;  %v1734_v2 = vpop.f32.mrf.mxu1 }
  0xf4   :  { %v1026_v18 = vsel %vm489_vm2, %v994_v8, 0.0  ;;  %v1038_v20 = vrot.slane %v1037_v9, 4  ;;  %v2225_v26 = vrot.slane %v1179_v7, %v2099_v39  ;;  %v1820_v32 = vpop.eup %1819  ;;  %v968_v56 = vadd.f32 1.0, %v1818_v25  ;;  %v1698_v11 = vpop.f32.mrf.mxu0 }
  0xf5   :  { %v1028_v28 = vadd.f32 %v1027_v13, %v1026_v18  ;;  %v1822_v38 = vpop.eup %1821  ;;  %v969_v55 = vadd.f32 1.0, %v1820_v32  ;;  %v814_v51 = vmul.f32 %v782_v31, %v2217_v57  ;;  %v2239_v42 = vmul.f32 0.5, %v2170_v3  ;;  %v652_v22 = vpop.f32.mrf.mxu1 }
  0xf6   :  { %v1039_v50 = vadd.f32 %v1038_v20, %v1037_v9  ;;  %v1824_v27 = vpop.eup %1823  ;;  %v966_v58 = vadd.f32 1.0, %v1822_v38  ;;  %v2245_v19 = vadd.f32 %v2108_v43, %v624_v36  ;;  %v2251_v61 = vmul.f32 0.5, %v2198_v54 }
  0xf7   :  { %v1029_v30 = vrot.slane %v1028_v28, 4  ;;  %v880_v47 = vadd.f32 %v848_v46, %v2198_v54  ;;  %v2255_v62 = vadd.f32 %v2108_v43, %v632_v49  ;;  %v1826_v3 = vpop.eup %1825  ;;  %v1000_v1 = vmul.f32 %v968_v56, %v744_v33  ;;  %v1735_v46 = vpop.f32.mrf.mxu1 }
  0xf8   :  { %v1040_v0 = vrot.slane %v1039_v50, 2  ;;  %1829 = vtanh.f32 %v909_v52  ;;  %v907_v17 = vmul.f32 0.7978846, %v875_v24  ;;  %v1001_v63 = vmul.f32 %v969_v55, %v745_v44 }
  0xf9   :  { %v1030_v4 = vadd.f32 %v1029_v30, %v1028_v28  ;;  %v967_v6 = vadd.f32 1.0, %v1824_v27  ;;  %v846_v41 = vmul.f32 %v814_v51, %v2217_v57  ;;  %v998_v8 = vmul.f32 %v966_v58, %v742_v34 }
  0xfa   :  { %v2259_v9 = vmul.f32 0.5, %v2217_v57  ;;  %v783_v54 = vmul.f32 0.044715, %v2245_v19  ;;  %v645_v10 = vadd.f32 %v2203_v60, %v2208_v5  ;;  %v912_v7 = vmul.f32 0.7978846, %v880_v47 }
  0xfb   :  { %v785_v13 = vmul.f32 0.044715, %v2255_v62  ;;  %v637_v14 = vadd.f32 %v2214_v12, %v334_v15  ;;  %v648_v16 = vadd.f32 %v1731_v23, %v1695_v35  ;;  %v1041_v18 = vadd.f32 %v1040_v0, %v1039_v50  ;;  %v350_v23 = vpop.f32.mrf.mxu0 }
  0xfc   :  { %v1053_v20 = vsel %vm489_vm2, %v1000_v1, 0.0  ;;  %v972_v21 = vadd.f32 1.0, %v1826_v3  ;;  %1831 = vtanh.f32 %v907_v17  ;;  %v1031_v25 = vrot.slane %v1030_v4, 2  ;;  %v1828_v33 = vpop.eup %1827  ;;  %v655_v17 = vpop.f32.mrf.mxu1 }
  0xfd   :  { %v1054_v28 = vsel %vm489_vm2, %v1001_v63, 0.0  ;;  %v999_v31 = vmul.f32 %v967_v6, %v743_v45  ;;  %v878_v32 = vadd.f32 %v846_v41, %v2217_v57  ;;  %v1044_v60 = vsel %vm489_vm2, %v998_v8, 0.0  ;;  %v1699_v27 = vpop.f32.mrf.mxu0 }
  0xfe   :  { %v2271_v5 = vmul.f32 0.5, %v2255_v62  ;;  %v815_v12 = vmul.f32 %v783_v54, %v2245_v19  ;;  %v2275_v15 = vadd.f32 %v2108_v43, %v645_v10  ;;  %1833 = vtanh.f32 %v912_v7 }
  0xff   :  { %v817_v34 = vmul.f32 %v785_v13, %v2255_v62  ;;  %v2279_v35 = vadd.f32 %v2108_v43, %v637_v14  ;;  %v2282_v57 = vadd.f32 %v2108_v43, %v648_v16  ;;  %v1042_v36 = vrot.slane %v1041_v18, 1 }
 0x100   :  { %v1055_v38 = vadd.f32 %v1054_v28, %v1053_v20  ;;  %v2285_v44 = vmul.f32 0.5, %v2245_v19  ;;  %v640_v45 = vadd.f32 %v639_v53, %v337_v29  ;;  %v1032_v49 = vadd.f32 %v1031_v25, %v1030_v4 }
 0x101   :  { %v1045_v50 = vsel %vm489_vm2, %v999_v31, 0.0  ;;  %v1004_v56 = vmul.f32 %v972_v21, %v748_v40  ;;  %v910_v52 = vmul.f32 0.7978846, %v878_v32  ;;  %v970_v24 = vadd.f32 1.0, %v1828_v33 }
 0x102   :  { %v847_v30 = vmul.f32 %v815_v12, %v2245_v19  ;;  %v788_v55 = vmul.f32 0.044715, %v2275_v15  ;;  %v789_v51 = vmul.f32 0.044715, %v2282_v57  ;;  %v786_v58 = vmul.f32 0.044715, %v2279_v35 }
 0x103   :  { %v2293_v47 = vadd.f32 %v2108_v43, %v640_v45  ;;  %v661_v53 = vadd.f32 %v1734_v2, %v1698_v11  ;;  %v653_v29 = vadd.f32 %v652_v22, %v350_v23  ;;  %v1043_v3 = vadd.f32 %v1042_v36, %v1041_v18  ;;  %v353_v11 = vpop.f32.mrf.mxu0  ;;  %v1738_v22 = vpop.f32.mrf.mxu1 }
 0x104   :  { %v1056_v0 = vrot.slane %v1055_v38, 4  ;;  %v849_v40 = vmul.f32 %v817_v34, %v2255_v62  ;;  %v821_v1 = vmul.f32 %v789_v51, %v2282_v57  ;;  %v1033_v63 = vrot.slane %v1032_v49, 1 }
 0x105   :  { %v1830_v4 = vpop.eup %1829  ;;  %v1046_v6 = vadd.f32 %v1045_v50, %v1044_v60  ;;  %v787_v41 = vmul.f32 0.044715, %v2293_v47  ;;  %v2299_v8 = vadd.f32 %v2108_v43, %v661_v53  ;;  %v2302_v54 = vsel %vm489_vm2, %v1004_v56, 0.0  ;;  %v1702_v23 = vpop.f32.mrf.mxu0 }
 0x106   :  { %v879_v2 = vadd.f32 %v847_v30, %v2245_v19  ;;  %v820_v10 = vmul.f32 %v788_v55, %v2275_v15  ;;  %v2307_v7 = vadd.f32 %v2108_v43, %v653_v29  ;;  %v1002_v13 = vmul.f32 %v970_v24, %v2239_v42  ;;  %v668_v30 = vpop.f32.mrf.mxu1 }
 0x107   :  { %1835 = vtanh.f32 %v910_v52  ;;  %v818_v14 = vmul.f32 %v786_v58, %v2279_v35  ;;  %v853_v16 = vmul.f32 %v821_v1, %v2282_v57  ;;  %v1187_v18 = vsub.f32 %v1043_v3, %v2225_v26  ;;  %v366_v29 = vpop.f32.mrf.mxu0 }
 0x108   :  { %v881_v20 = vadd.f32 %v849_v40, %v2255_v62  ;;  %v819_v21 = vmul.f32 %v787_v41, %v2293_v47  ;;  %v792_v19 = vmul.f32 0.044715, %v2299_v8  ;;  %v2316_v28 = vadd.f32 %v1033_v63, %v1032_v49 }
 0x109   :  { %v1832_v25 = vpop.eup %1831  ;;  %v2318_v31 = vadd.f32 %v1056_v0, %v1055_v38  ;;  %v1047_v42 = vrot.slane %v1046_v6, 4  ;;  %v973_v32 = vadd.f32 1.0, %v1830_v4  ;;  %v911_v60 = vmul.f32 0.7978846, %v879_v2 }
 0x10a   :  { %v852_v12 = vmul.f32 %v820_v10, %v2275_v15  ;;  %v790_v33 = vmul.f32 0.044715, %v2307_v7  ;;  %v664_v34 = vadd.f32 %v1735_v46, %v1699_v27  ;;  %v2323_v62 = vsel %vm489_vm2, %v1002_v13, 0.0  ;;  %v1739_v10 = vpop.f32.mrf.mxu1 }
 0x10b   :  { %v850_v36 = vmul.f32 %v818_v14, %v2279_v35  ;;  %v885_v45 = vadd.f32 %v853_v16, %v2282_v57  ;;  %v656_v49 = vadd.f32 %v655_v17, %v353_v11  ;;  %v2327_v50 = vpop.eup %1833  ;;  %v913_v38 = vmul.f32 0.7978846, %v881_v20 }
 0x10c   :  { %v851_v56 = vmul.f32 %v819_v21, %v2293_v47  ;;  %v824_v52 = vmul.f32 %v792_v19, %v2299_v8  ;;  %v822_v24 = vmul.f32 %v790_v33, %v2307_v7  ;;  %v2332_v55 = vmul.f32 0.083333336, %v1187_v18  ;;  %v1703_v18 = vpop.f32.mrf.mxu0 }
 0x10d   :  { %v1058_v46 = vrot.slane %v2318_v31, 2  ;;  %v2336_v51 = vadd.f32 %v2108_v43, %v664_v34  ;;  %v2339_v27 = vadd.f32 %v2108_v43, %v656_v49  ;;  %1837 = vtanh.f32 %v911_v60 }
 0x10e   :  { %v884_v58 = vadd.f32 %v852_v12, %v2275_v15  ;;  %v854_v53 = vmul.f32 %v822_v24, %v2307_v7  ;;  %v677_v3 = vadd.f32 %v1738_v22, %v1702_v23  ;;  %v2343_v0 = vadd.f32 %v1047_v42, %v1046_v6 }
 0x10f   :  { %v882_v40 = vadd.f32 %v850_v36, %v2279_v35  ;;  %v917_v1 = vmul.f32 0.7978846, %v885_v45  ;;  %v793_v17 = vmul.f32 0.044715, %v2336_v51  ;;  %v1005_v4 = vmul.f32 %v973_v32, %v2242_v59 }
 0x110   :  { %v883_v63 = vadd.f32 %v851_v56, %v2293_v47  ;;  %v856_v41 = vmul.f32 %v824_v52, %v2299_v8  ;;  %v791_v2 = vmul.f32 0.044715, %v2339_v27  ;;  %1839 = vtanh.f32 %v913_v38  ;;  %v369_v52 = vpop.f32.mrf.mxu0 }
 0x111   :  { %v886_v11 = vadd.f32 %v854_v53, %v2307_v7  ;;  %v825_v6 = vmul.f32 %v793_v17, %v2336_v51  ;;  %v2354_v13 = vadd.f32 %v2108_v43, %v677_v3  ;;  %v971_v14 = vadd.f32 1.0, %v1832_v25  ;;  %v671_v25 = vpop.f32.mrf.mxu1 }
 0x112   :  { %v916_v16 = vmul.f32 0.7978846, %v884_v58  ;;  %v823_v59 = vmul.f32 %v791_v2, %v2339_v27  ;;  %v669_v20 = vadd.f32 %v668_v30, %v366_v29  ;;  %v914_v21 = vmul.f32 0.7978846, %v882_v40  ;;  %v1706_v2 = vpop.f32.mrf.mxu0 }
 0x113   :  { %1841 = vtanh.f32 %v917_v1  ;;  %v857_v19 = vmul.f32 %v825_v6, %v2336_v51  ;;  %v796_v22 = vmul.f32 0.044715, %v2354_v13  ;;  %v915_v32 = vmul.f32 0.7978846, %v883_v63  ;;  %v1742_v40 = vpop.f32.mrf.mxu1 }
 0x114   :  { %v1836_v42 = vpop.eup %1835  ;;  %v888_v60 = vadd.f32 %v856_v41, %v2299_v8  ;;  %v855_v12 = vmul.f32 %v823_v59, %v2339_v27  ;;  %v2362_v23 = vadd.f32 %v2108_v43, %v669_v20  ;;  %v918_v33 = vmul.f32 0.7978846, %v886_v11  ;;  %v1793_v11 = vld [vmem:[%s2599_s5 + $0x8] sm:$0xff]  }
 0x115   :  { %v889_v34 = vadd.f32 %v857_v19, %v2336_v51  ;;  %v828_v36 = vmul.f32 %v796_v22, %v2354_v13  ;;  %v680_v45 = vadd.f32 %v1739_v10, %v1703_v18  ;;  %v1186_v49 = vsub.f32 %v2316_v28, %v2225_v26  ;;  %v684_v59 = vpop.f32.mrf.mxu1 }
 0x116   :  { %v1072_v38 = vsel %vm489_vm2, %v1005_v4, 0.0  ;;  %1843 = vtanh.f32 %v916_v16  ;;  %v887_v56 = vadd.f32 %v855_v12, %v2339_v27  ;;  %v794_v30 = vmul.f32 0.044715, %v2362_v23  ;;  %v382_v12 = vpop.f32.mrf.mxu0 }
 0x117   :  { %1845 = vtanh.f32 %v914_v21  ;;  %v860_v24 = vmul.f32 %v828_v36, %v2354_v13  ;;  %v2373_v58 = vadd.f32 %v2108_v43, %v680_v45  ;;  %v920_v53 = vmul.f32 0.7978846, %v888_v60 }
 0x118   :  { %1847 = vtanh.f32 %v915_v32  ;;  %v919_v29 = vmul.f32 0.7978846, %v887_v56  ;;  %v672_v3 = vadd.f32 %v671_v25, %v369_v52  ;;  %v1003_v1 = vmul.f32 %v971_v14, %v2248_v48 }
 0x119   :  { %1849 = vtanh.f32 %v918_v33  ;;  %v921_v17 = vmul.f32 0.7978846, %v889_v34  ;;  %v826_v4 = vmul.f32 %v794_v30, %v2362_v23  ;;  %v2378_v63 = vadd.f32 %v1058_v46, %v2318_v31 }
 0x11a   :  { %v1049_v41 = vrot.slane %v2343_v0, 2  ;;  %1851 = vtanh.f32 %v919_v29  ;;  %v797_v10 = vmul.f32 0.044715, %v2373_v58  ;;  %v1838_v6 = vpop.eup %1837  ;;  %v892_v48 = vadd.f32 %v860_v24, %v2354_v13 }
 0x11b   :  { %v858_v14 = vmul.f32 %v826_v4, %v2362_v23  ;;  %v2388_v16 = vadd.f32 %v2108_v43, %v672_v3  ;;  %v693_v31 = vadd.f32 %v1742_v40, %v1706_v2  ;;  %v2391_v46 = vadd.f32 %v1072_v38, %v2302_v54 }
 0x11c   :  { %1853 = vtanh.f32 %v920_v53  ;;  %v829_v18 = vmul.f32 %v797_v10, %v2373_v58  ;;  %v1063_v20 = vsel %vm489_vm2, %v1003_v1, 0.0  ;;  %v974_v21 = vadd.f32 1.0, %v1836_v42  ;;  %v1794_v42 = vld [vmem:[%s2599_s5] sm:$0xff]  }
 0x11d   :  { %1855 = vtanh.f32 %v921_v17  ;;  %v890_v19 = vadd.f32 %v858_v14, %v2362_v23  ;;  %v1903_v22 = vmov 0.0   ;;  %v1840_v32 = vpop.eup %1839  ;;  %v975_v60 = vadd.f32 1.0, %v1838_v6  ;;  %v1743_v6 = vpop.f32.mrf.mxu1 }
 0x11e   :  { %1744 = vmatprep.subr.bf16.mxu0 %v1903_v22  ;;  %v861_v25 = vmul.f32 %v829_v18, %v2373_v58  ;;  %v795_v54 = vmul.f32 0.044715, %v2388_v16  ;;  %v2400_v33 = vadd.f32 %v2108_v43, %v693_v31  ;;  %v976_v34 = vadd.f32 1.0, %v2327_v50  ;;  %1748 = vmatprep.mubr.msk.bf16.mxu0 %vm1904_vm3, %v1903_v22 }
 0x11f   :  { %1745 = vmatpush3.bf16.msra.mxu0 %v1793_v11  ;;  %v924_v36 = vmul.f32 0.7978846, %v892_v48  ;;  %v922_v45 = vmul.f32 0.7978846, %v890_v19  ;;  %v685_v38 = vadd.f32 %v684_v59, %v382_v12  ;;  %v2408_v52 = vadd.f32 %v1063_v20, %v2323_v62 }
 0x120   :  { %1746 = vmatprep.subr.bf16.mxu0 %v1903_v22  ;;  %v1842_v56 = vpop.eup %1841  ;;  %v893_v24 = vadd.f32 %v861_v25, %v2373_v58  ;;  %v827_v30 = vmul.f32 %v795_v54, %v2388_v16  ;;  %v800_v53 = vmul.f32 0.044715, %v2400_v33  ;;  %v1060_v29 = vrot.slane %v2378_v63, 1 }
 0x121   :  { %v1074_v3 = vrot.slane %v2391_v46, 4  ;;  %v1006_v50 = vmul.f32 %v974_v21, %v2259_v9  ;;  %v977_v40 = vadd.f32 1.0, %v1840_v32  ;;  %v1007_v1 = vmul.f32 %v975_v60, %v2285_v44  ;;  %v1707_v21 = vpop.f32.mrf.mxu0 }
 0x122   :  { %1857 = vtanh.f32 %v922_v45  ;;  %v925_v17 = vmul.f32 0.7978846, %v893_v24  ;;  %v859_v62 = vmul.f32 %v827_v30, %v2388_v16  ;;  %v981_v2 = vadd.f32 1.0, %v1842_v56 }
 0x123   :  { %1747 = vmatpush3.bf16.msra.mxu0 %v1794_v42  ;;  %v1844_v4 = vpop.eup %1843  ;;  %1859 = vtanh.f32 %v924_v36  ;;  %v832_v10 = vmul.f32 %v800_v53, %v2400_v33  ;;  %v2420_v11 = vadd.f32 %v2108_v43, %v685_v38  ;;  %v1065_v9 = vrot.slane %v2408_v52, 4 }
 0x124   :  { %v1846_v48 = vpop.eup %1845  ;;  %v2424_v14 = vmul.f32 %v976_v34, %v2251_v61  ;;  %1861 = vtanh.f32 %v925_v17  ;;  %v891_v44 = vadd.f32 %v859_v62, %v2388_v16  ;;  %v1009_v18 = vmul.f32 %v977_v40, %v2271_v5 }
 0x125   :  { %v1848_v31 = vpop.eup %1847  ;;  %v756_v59 = vmul.f32 0.5, %v2275_v15  ;;  %v757_v20 = vmul.f32 0.5, %v2282_v57  ;;  %v864_v19 = vmul.f32 %v832_v10, %v2400_v33  ;;  %v980_v60 = vadd.f32 1.0, %v1844_v4 }
 0x126   :  { %v1850_v32 = vpop.eup %1849  ;;  %v923_v12 = vmul.f32 0.7978846, %v891_v44  ;;  %v798_v25 = vmul.f32 0.044715, %v2420_v11  ;;  %v696_v61 = vadd.f32 %v1743_v6, %v1707_v21  ;;  %v1080_v42 = vsel %vm489_vm2, %v1006_v50, 0.0  ;;  %v687_v6 = vpop.f32.mrf.mxu1 }
 0x127   :  { %v1852_v54 = vpop.eup %1851  ;;  %v1081_v34 = vsel %vm489_vm2, %v1007_v1, 0.0  ;;  %v754_v5 = vmul.f32 0.5, %v2279_v35  ;;  %v1013_v36 = vmul.f32 %v981_v2, %v757_v20  ;;  %v979_v15 = vadd.f32 1.0, %v1848_v31 }
 0x128   :  { %v983_v45 = vadd.f32 1.0, %v1852_v54  ;;  %1863 = vtanh.f32 %v923_v12  ;;  %v2436_v57 = vadd.f32 %v2108_v43, %v696_v61  ;;  %v2439_v56 = vsel %vm489_vm2, %v1009_v18, 0.0 }
 0x129   :  { %v1854_v38 = vpop.eup %1853  ;;  %v755_v24 = vmul.f32 0.5, %v2293_v47  ;;  %v982_v30 = vadd.f32 1.0, %v1850_v32  ;;  %v896_v53 = vadd.f32 %v864_v19, %v2400_v33  ;;  %v1012_v40 = vmul.f32 %v980_v60, %v756_v59 }
 0x12a   :  { %v1856_v50 = vpop.eup %1855  ;;  %v759_v35 = vmul.f32 0.5, %v2339_v27  ;;  %v830_v1 = vmul.f32 %v798_v25, %v2420_v11  ;;  %v801_v17 = vmul.f32 0.044715, %v2436_v57  ;;  %v2446_v62 = vadd.f32 %v1081_v34, %v1080_v42  ;;  %v385_v27 = vpop.f32.mrf.mxu0 }
 0x12b   :  { %v978_v4 = vadd.f32 1.0, %v1846_v48  ;;  %v760_v2 = vmul.f32 0.5, %v2299_v8  ;;  %v758_v10 = vmul.f32 0.5, %v2307_v7  ;;  %v1108_v47 = vsel %vm489_vm2, %v1013_v36, 0.0 }
 0x12c   :  { %v1011_v44 = vmul.f32 %v979_v15, %v755_v24  ;;  %v984_v31 = vadd.f32 1.0, %v1854_v38  ;;  %v1015_v18 = vmul.f32 %v983_v45, %v759_v35  ;;  %v985_v20 = vadd.f32 1.0, %v1856_v50 }
 0x12d   :  { %v1014_v59 = vmul.f32 %v982_v30, %v758_v10  ;;  %v928_v21 = vmul.f32 0.7978846, %v896_v53  ;;  %v833_v19 = vmul.f32 %v801_v17, %v2436_v57  ;;  %v1107_v32 = vsel %vm489_vm2, %v1012_v40, 0.0 }
 0x12e   :  { %v761_v48 = vmul.f32 0.5, %v2336_v51  ;;  %v862_v8 = vmul.f32 %v830_v1, %v2420_v11  ;;  %v688_v60 = vadd.f32 %v687_v6, %v385_v27  ;;  %v1010_v12 = vmul.f32 %v978_v4, %v754_v5 }
 0x12f   :  { %v1858_v7 = vpop.eup %1857  ;;  %v1109_v25 = vadd.f32 %v1108_v47, %v1107_v32  ;;  %v764_v61 = vmul.f32 0.5, %v2354_v13  ;;  %v762_v54 = vmul.f32 0.5, %v2362_v23  ;;  %v1099_v34 = vsel %vm489_vm2, %v1011_v44, 0.0 }
 0x130   :  { %v1860_v42 = vpop.eup %1859  ;;  %v1016_v36 = vmul.f32 %v984_v31, %v760_v2  ;;  %v1117_v15 = vsel %vm489_vm2, %v1015_v18, 0.0  ;;  %v865_v45 = vmul.f32 %v833_v19, %v2436_v57  ;;  %v1116_v51 = vsel %vm489_vm2, %v1014_v59, 0.0 }
 0x131   :  { %v1862_v38 = vpop.eup %1861  ;;  %v1017_v24 = vmul.f32 %v985_v20, %v761_v48  ;;  %1865 = vtanh.f32 %v928_v21  ;;  %v2462_v5 = vadd.f32 %v2108_v43, %v688_v60  ;;  %v986_v30 = vadd.f32 1.0, %v1858_v7 }
 0x132   :  { %v989_v13 = vadd.f32 1.0, %v1862_v38  ;;  %v894_v23 = vadd.f32 %v862_v8, %v2420_v11  ;;  %v897_v53 = vadd.f32 %v865_v45, %v2436_v57  ;;  %v1098_v50 = vsel %vm489_vm2, %v1010_v12, 0.0 }
 0x133   :  { %v1118_v40 = vadd.f32 %v1117_v15, %v1116_v51  ;;  %v988_v35 = vadd.f32 1.0, %v1860_v42  ;;  %v765_v1 = vmul.f32 0.5, %v2373_v58  ;;  %v1110_v17 = vrot.slane %v1109_v25, 4 }
 0x134   :  { %v1100_v4 = vadd.f32 %v1099_v34, %v1098_v50  ;;  %v763_v2 = vmul.f32 0.5, %v2388_v16  ;;  %v929_v10 = vmul.f32 0.7978846, %v897_v53  ;;  %v1126_v43 = vsel %vm489_vm2, %v1017_v24, 0.0 }
 0x135   :  { %v1864_v6 = vpop.eup %1863  ;;  %v1021_v47 = vmul.f32 %v989_v13, %v765_v1  ;;  %v799_v44 = vmul.f32 0.044715, %v2462_v5  ;;  %v1125_v31 = vsel %vm489_vm2, %v1016_v36, 0.0  ;;  %v1018_v18 = vmul.f32 %v986_v30, %v762_v54 }
 0x136   :  { %v987_v59 = vadd.f32 1.0, %v1864_v6  ;;  %v926_v20 = vmul.f32 0.7978846, %v894_v23  ;;  %v1119_v58 = vrot.slane %v1118_v40, 4  ;;  %v1020_v27 = vmul.f32 %v988_v35, %v764_v61 }
 0x137   :  { %1867 = vtanh.f32 %v929_v10  ;;  %v831_v16 = vmul.f32 %v799_v44, %v2462_v5  ;;  %v1089_v21 = vsel %vm489_vm2, %v2424_v14, 0.0  ;;  %v1111_v19 = vadd.f32 %v1110_v17, %v1109_v25 }
 0x138   :  { %v1127_v32 = vadd.f32 %v1126_v43, %v1125_v31  ;;  %v1019_v48 = vmul.f32 %v987_v59, %v763_v2  ;;  %v1066_v8 = vadd.f32 %v1065_v9, %v2408_v52  ;;  %v1101_v60 = vrot.slane %v1100_v4, 4 }
 0x139   :  { %v1144_v7 = vsel %vm489_vm2, %v1021_v47, 0.0  ;;  %v863_v22 = vmul.f32 %v831_v16, %v2462_v5  ;;  %v1091_v12 = vadd.f32 %v2439_v56, %v1089_v21  ;;  %v1134_v61 = vsel %vm489_vm2, %v1018_v18, 0.0 }
 0x13a   :  { %v1135_v54 = vsel %vm489_vm2, %v1019_v48, 0.0  ;;  %1869 = vtanh.f32 %v926_v20  ;;  %v1083_v14 = vrot.slane %v2446_v62, 4  ;;  %v1120_v25 = vadd.f32 %v1119_v58, %v1118_v40 }
 0x13b   :  { %v1143_v42 = vsel %vm489_vm2, %v1020_v27, 0.0  ;;  %v1136_v34 = vadd.f32 %v1135_v54, %v1134_v61  ;;  %v1112_v36 = vrot.slane %v1111_v19, 2  ;;  %v1128_v52 = vrot.slane %v1127_v32, 4 }
 0x13c   :  { %v1145_v9 = vadd.f32 %v1144_v7, %v1143_v42  ;;  %v895_v15 = vadd.f32 %v863_v22, %v2462_v5  ;;  %v1220_v45 = vpack.c.bf16 %v2332_v55, %v2332_v55  ;;  %v1050_v56 = vadd.f32 %v1049_v41, %v2343_v0 }
 0x13d   :  { %v1102_v38 = vadd.f32 %v1101_v60, %v1100_v4  ;;  %v1137_v51 = vrot.slane %v1136_v34, 4  ;;  %v1061_v30 = vadd.f32 %v1060_v29, %v2378_v63  ;;  %v1075_v13 = vadd.f32 %v1074_v3, %v2391_v46 }
 0x13e   :  { %v1866_v24 = vpop.eup %1865  ;;  %v1092_v23 = vrot.slane %v1091_v12, 4  ;;  %v927_v53 = vmul.f32 0.7978846, %v895_v15  ;;  %v1067_v50 = vrot.slane %v1066_v8, 2  ;;  %v1084_v55 = vadd.f32 %v1083_v14, %v2446_v62 }
 0x13f   :  { %v1121_v40 = vrot.slane %v1120_v25, 2  ;;  %v1138_v35 = vadd.f32 %v1137_v51, %v1136_v34  ;;  %v1113_v1 = vadd.f32 %v1112_v36, %v1111_v19  ;;  %v1129_v0 = vadd.f32 %v1128_v52, %v1127_v32 }
 0x140   :  { %v1146_v41 = vrot.slane %v1145_v9, 4  ;;  %1871 = vtanh.f32 %v927_v53  ;;  %v2499_v17 = vunpack.c.l.b16 %v1220_v45  ;;  %v2504_v63 = vmul.f32 0.083333336, %v1186_v49 }
 0x141   :  { %v1103_v29 = vrot.slane %v1102_v38, 2  ;;  %v992_v46 = vadd.f32 1.0, %v1866_v24  ;;  %v1189_v3 = vsub.f32 %v1061_v30, %v2225_v26  ;;  %v1051_v4 = vrot.slane %v1050_v56, 1 }
 0x142   :  { %v1076_v2 = vrot.slane %v1075_v13, 2  ;;  %v1093_v62 = vadd.f32 %v1092_v23, %v1091_v12  ;;  %v1085_v10 = vrot.slane %v1084_v55, 2  ;;  %v1122_v6 = vadd.f32 %v1121_v40, %v1120_v25 }
 0x143   :  { %v1139_v43 = vrot.slane %v1138_v35, 2  ;;  %v768_v47 = vmul.f32 0.5, %v2400_v33  ;;  %v1068_v31 = vadd.f32 %v1067_v50, %v1066_v8  ;;  %v1114_v18 = vrot.slane %v1113_v1, 1 }
 0x144   :  { %v1868_v44 = vpop.eup %1867  ;;  %v1130_v59 = vrot.slane %v1129_v0, 2  ;;  %v1147_v20 = vadd.f32 %v1146_v41, %v1145_v9  ;;  %v1104_v28 = vadd.f32 %v1103_v29, %v1102_v38  ;;  %v769_v58 = vmul.f32 0.5, %v2436_v57 }
 0x145   :  { %v1024_v49 = vmul.f32 %v992_v46, %v768_v47  ;;  %v993_v27 = vadd.f32 1.0, %v1868_v44  ;;  %v1219_v16 = vpack.c.bf16 %v2504_v63, %v2504_v63  ;;  %v2511_v21 = vmul.f32 0.083333336, %v1189_v3 }
 0x146   :  { %v1052_v19 = vadd.f32 %v1051_v4, %v1050_v56  ;;  %v1094_v32 = vrot.slane %v1093_v62, 2  ;;  %v1086_v60 = vadd.f32 %v1085_v10, %v1084_v55  ;;  %v1123_v33 = vrot.slane %v1122_v6, 1 }
 0x147   :  { %v1870_v48 = vpop.eup %1869  ;;  %v1140_v7 = vadd.f32 %v1139_v43, %v1138_v35  ;;  %v1025_v8 = vmul.f32 %v993_v27, %v769_v58  ;;  %v1077_v22 = vadd.f32 %v1076_v2, %v1075_v13  ;;  %v1069_v12 = vrot.slane %v1068_v31, 1 }
 0x148   :  { %v1131_v61 = vadd.f32 %v1130_v59, %v1129_v0  ;;  %v1148_v54 = vrot.slane %v1147_v20, 2  ;;  %v1115_v14 = vadd.f32 %v1114_v18, %v1113_v1  ;;  %v1105_v25 = vrot.slane %v1104_v28, 1 }
 0x149   :  { %v1161_v57 = vsel %vm489_vm2, %v1024_v49, 0.0  ;;  %v1162_v42 = vsel %vm489_vm2, %v1025_v8, 0.0  ;;  %v1222_v34 = vpack.c.bf16 %v2511_v21, %v2511_v21  ;;  %v1188_v36 = vsub.f32 %v1052_v19, %v2225_v26 }
 0x14a   :  { %v990_v52 = vadd.f32 1.0, %v1870_v48  ;;  %v1163_v9 = vadd.f32 %v1162_v42, %v1161_v57  ;;  %v1095_v15 = vadd.f32 %v1094_v32, %v1093_v62  ;;  %v1087_v45 = vrot.slane %v1086_v60, 1 }
 0x14b   :  { %v1124_v56 = vadd.f32 %v1123_v33, %v1122_v6  ;;  %v1141_v38 = vrot.slane %v1140_v7, 1  ;;  %v1132_v51 = vrot.slane %v1131_v61, 1  ;;  %v1149_v24 = vadd.f32 %v1148_v54, %v1147_v20 }
 0x14c   :  { %v766_v30 = vmul.f32 0.5, %v2420_v11  ;;  %v1164_v13 = vrot.slane %v1163_v9, 4  ;;  %v1078_v53 = vrot.slane %v1077_v22, 1  ;;  %v1070_v50 = vadd.f32 %v1069_v12, %v1068_v31 }
 0x14d   :  { %v1872_v23 = vpop.eup %1871  ;;  %v1195_v55 = vsub.f32 %v1115_v14, %v2225_v26  ;;  %v1106_v40 = vadd.f32 %v1105_v25, %v1104_v28  ;;  %v767_v0 = vmul.f32 0.5, %v2462_v5  ;;  %v1096_v29 = vrot.slane %v1095_v15, 1 }
 0x14e   :  { %v1022_v35 = vmul.f32 %v990_v52, %v766_v30  ;;  %v1165_v1 = vadd.f32 %v1164_v13, %v1163_v9  ;;  %v991_v41 = vadd.f32 1.0, %v1872_v23  ;;  %v1088_v46 = vadd.f32 %v1087_v45, %v1086_v60 }
 0x14f   :  { %v1196_v3 = vsub.f32 %v1124_v56, %v2225_v26  ;;  %v1142_v4 = vadd.f32 %v1141_v38, %v1140_v7  ;;  %v1133_v2 = vadd.f32 %v1132_v51, %v1131_v61  ;;  %v1150_v62 = vrot.slane %v1149_v24, 1 }
 0x150   :  { %v1166_v11 = vrot.slane %v1165_v1, 2  ;;  %v1023_v10 = vmul.f32 %v991_v41, %v767_v0  ;;  %v1204_v6 = vmul.f32 0.083333336, %v1188_v36  ;;  %v1079_v43 = vadd.f32 %v1078_v53, %v1077_v22 }
 0x151   :  { %v1190_v47 = vsub.f32 %v1070_v50, %v2225_v26  ;;  %v1211_v44 = vmul.f32 0.083333336, %v1195_v55  ;;  %v1194_v31 = vsub.f32 %v1106_v40, %v2225_v26  ;;  %v1152_v18 = vsel %vm489_vm2, %v1022_v35, 0.0 }
 0x152   :  { %v1167_v5 = vadd.f32 %v1166_v11, %v1165_v1  ;;  %v1153_v59 = vsel %vm489_vm2, %v1023_v10, 0.0  ;;  %v1097_v20 = vadd.f32 %v1096_v29, %v1095_v15  ;;  %v1212_v28 = vmul.f32 0.083333336, %v1196_v3 }
 0x153   :  { %v1198_v49 = vsub.f32 %v1142_v4, %v2225_v26  ;;  %v1154_v58 = vadd.f32 %v1153_v59, %v1152_v18  ;;  %v1197_v27 = vsub.f32 %v1133_v2, %v2225_v26  ;;  %v1151_v21 = vadd.f32 %v1150_v62, %v1149_v24 }
 0x154   :  { %v1168_v19 = vrot.slane %v1167_v5, 1  ;;  %v1192_v32 = vsub.f32 %v1088_v46, %v2225_v26  ;;  %v1221_v48 = vpack.c.bf16 %v1204_v6, %v1204_v6  ;;  %v1206_v60 = vmul.f32 0.083333336, %v1190_v47 }
 0x155   :  { %v1228_v33 = vpack.c.bf16 %v1211_v44, %v1211_v44  ;;  %v1155_v7 = vrot.slane %v1154_v58, 4  ;;  %v1275_v8 = vrot.slane %v2499_v17, 7  ;;  %v1191_v22 = vsub.f32 %v1079_v43, %v2225_v26 }
 0x156   :  { %v1210_v12 = vmul.f32 0.083333336, %v1194_v31  ;;  %v1169_v61 = vadd.f32 %v1168_v19, %v1167_v5  ;;  %v1229_v54 = vpack.c.bf16 %v1212_v28, %v1212_v28  ;;  %v1214_v14 = vmul.f32 0.083333336, %v1198_v49 }
 0x157   :  { %v1156_v25 = vadd.f32 %v1155_v7, %v1154_v58  ;;  %v1193_v57 = vsub.f32 %v1097_v20, %v2225_v26  ;;  %v1262_v42 = vunpack.c.l.b16 %v1222_v34  ;;  %v1213_v36 = vmul.f32 0.083333336, %v1197_v27 }
 0x158   :  { %v1199_v52 = vsub.f32 %v1151_v21, %v2225_v26  ;;  %v1208_v9 = vmul.f32 0.083333336, %v1192_v32  ;;  %v1261_v15 = vunpack.c.l.b16 %v1221_v48  ;;  %v1223_v45 = vpack.c.bf16 %v1206_v60, %v1206_v60 }
 0x159   :  { %v1268_v56 = vunpack.c.l.b16 %v1228_v33  ;;  %v1157_v38 = vrot.slane %v1156_v25, 2  ;;  %v1259_v17 = vunpack.c.l.b16 %v1219_v16  ;;  %v1207_v51 = vmul.f32 0.083333336, %v1191_v22 }
 0x15a   :  { %v1227_v24 = vpack.c.bf16 %v1210_v12, %v1210_v12  ;;  %v1201_v30 = vsub.f32 %v1169_v61, %v2225_v26  ;;  %v1269_v13 = vunpack.c.l.b16 %v1229_v54  ;;  %v1231_v23 = vpack.c.bf16 %v1214_v14, %v1214_v14 }
 0x15b   :  { %v1158_v53 = vadd.f32 %v1157_v38, %v1156_v25  ;;  %v1209_v34 = vmul.f32 0.083333336, %v1193_v57  ;;  %v1281_v50 = vrot.slane %v1262_v42, 5  ;;  %v1230_v55 = vpack.c.bf16 %v1213_v36, %v1213_v36  ;;  %v1800_v38 = vld [vmem:[%s2601_s7 + $0x24] ss:$8 sps:$4 sm:$0xff]  }
 0x15c   :  { %v1215_v40 = vmul.f32 0.083333336, %v1199_v52  ;;  %v1225_v35 = vpack.c.bf16 %v1208_v9, %v1208_v9  ;;  %v1278_v1 = vrot.slane %v1261_v15, 6  ;;  %v1263_v0 = vunpack.c.l.b16 %v1223_v45  ;;  %v1795_v45 = vld [vmem:[%s2601_s7 + $0x30] ss:$8 sps:$4 sm:$0xff]  }
 0x15d   :  { %v1296_v41 = vrot.slane %v1268_v56, 7  ;;  %v1159_v29 = vrot.slane %v1158_v53, 1  ;;  %v1267_v46 = vunpack.c.l.b16 %v1227_v24  ;;  %v1217_v3 = vmul.f32 0.083333336, %v1201_v30  ;;  %v1797_v56 = vld [vmem:[%s2601_s7 + $0x34] ss:$8 sps:$4 sm:$0xff]  }
 0x15e   :  { %v1224_v63 = vpack.c.bf16 %v1207_v51, %v1207_v51  ;;  %v1298_v16 = vrot.slane %v1269_v13, 6  ;;  %v1271_v4 = vunpack.c.l.b16 %v1231_v23  ;;  %v1226_v62 = vpack.c.bf16 %v1209_v34, %v1209_v34  ;;  %1503 = vmatprep.subr.bf16.mxu1 %v1797_v56  ;;  %v2562_v51 = vld [vmem:[%s2600_s6] sm:$0x7] }
 0x15f   :  { %v1160_v2 = vadd.f32 %v1159_v29, %v1158_v53  ;;  %v1270_v11 = vunpack.c.l.b16 %v1230_v55  ;;  %v1232_v10 = vpack.c.bf16 %v1215_v40, %v1215_v40  ;;  %v1265_v6 = vunpack.c.l.b16 %v1225_v35  ;;  %1504 = vmatpush1.bf16.msra.mxu1 %v1795_v45 }
 0x160   :  { %v1277_v43 = vsel %vm1276_vm4, %v1275_v8, %v1259_v17  ;;  %v1284_v31 = vrot.slane %v1263_v0, 4  ;;  %v1234_v18 = vpack.c.bf16 %v1217_v3, %v1217_v3  ;;  %v1264_v5 = vunpack.c.l.b16 %v1224_v63  ;;  %v1798_v17 = vld [vmem:[%s2601_s7 + $0x20] ss:$8 sps:$4 sm:$0xff]   ;;  %1505 = vmatprep.subr.bf16.mxu1 %v1800_v38 }
 0x161   :  { %v1200_v47 = vsub.f32 %v1160_v2, %v2225_v26  ;;  %v1280_v44 = vsel %vm1279_vm5, %v1278_v1, %v1277_v43  ;;  %v1297_v59 = vsel %vm1276_vm4, %v1296_v41, %v1267_v46  ;;  %v1302_v49 = vrot.slane %v1271_v4, 4 }
 0x162   :  { %v1299_v28 = vsel %vm1279_vm5, %v1298_v16, %v1297_v59  ;;  %v1300_v58 = vrot.slane %v1270_v11, 5  ;;  %v1266_v27 = vunpack.c.l.b16 %v1226_v62  ;;  %v1272_v21 = vunpack.c.l.b16 %v1232_v10 }
 0x163   :  { %v1216_v20 = vmul.f32 0.083333336, %v1200_v47  ;;  %v1283_v19 = vsel %vm1282_vm6, %v1281_v50, %v1280_v44  ;;  %v1290_v48 = vrot.slane %v1265_v6, 2  ;;  %v1274_v60 = vunpack.c.l.b16 %v1234_v18  ;;  %1506 = vmatpush1.bf16.msra.mxu1 %v1798_v17 }
 0x164   :  { %v1286_v26 = vsel %vm1285_vm7, %v1284_v31, %v1283_v19  ;;  %v1287_v33 = vrot.slane %v1264_v5, 3  ;;  %v1301_v7 = vsel %vm1282_vm6, %v1300_v58, %v1299_v28  ;;  %v1304_v61 = vrot.slane %v1272_v21, 3  ;;  %v1803_v28 = vld [vmem:[%s2601_s7 + $0x14] ss:$8 sps:$4 sm:$0xff]   ;;  %v1806_v58 = vld [vmem:[%s2601_s7 + $0x4] ss:$8 sps:$4 sm:$0xff]  }
 0x165   :  { %v1233_v32 = vpack.c.bf16 %v1216_v20, %v1216_v20  ;;  %v1303_v22 = vsel %vm1285_vm7, %v1302_v49, %v1301_v7  ;;  %v1293_v25 = vrot.slane %v1266_v27, 1  ;;  %v1308_v42 = vrot.slane %v1274_v60, 1  ;;  %v1801_v20 = vld [vmem:[%s2601_s7 + $0x10] ss:$8 sps:$4 sm:$0xff]   ;;  %1507 = vmatprep.subr.bf16.mxu1 %v1803_v28  ;;  %v1804_v49 = vld [vmem:[%s2601_s7] ss:$8 sps:$4 sm:$0xff]  }
 0x166   :  { %v1289_v12 = vsel %vm1288_vm8, %v1287_v33, %v1286_v26  ;;  %v1305_v57 = vsel %vm1288_vm8, %v1304_v61, %v1303_v22  ;;  %v1242_v24 = vrot.slane %v2562_v51, %v2099_v39  ;;  %v1905_v27 = vmov 0  }
 0x167   :  { %v1273_v8 = vunpack.c.l.b16 %v1233_v32  ;;  %v1292_v54 = vsel %vm1291_vm9, %v1290_v48, %v1289_v12  ;;  %1508 = vmatpush1.bf16.msra.mxu1 %v1801_v20  ;;  %1527 = vmatprep.mubr.bf16.mxu1 %v1905_v27 }
 0x168   :  { %v1295_v52 = vsel %vm1294_vm10, %v1293_v25, %v1292_v54  ;;  %1509 = vmatprep.subr.bf16.mxu1 %v1806_v58 }
 0x169   :  { %v1306_v14 = vrot.slane %v1273_v8, 2 }
 0x16b   :  { %v1307_v36 = vsel %vm1291_vm9, %v1306_v14, %v1305_v57  ;;  %1510 = vmatpush1.bf16.msra.mxu1 %v1804_v49 }
 0x16c   :  { %v1309_v9 = vsel %vm1294_vm10, %v1308_v42, %v1307_v36  ;;  %v1421_v42 = vsub.s32 1, %v2096_v37 }
 0x16d   :  { %v1310_v15 = vpack.c.b16 %v1309_v9, %v1295_v52 }
 0x16e   :  { %v1422_v9 = vrot.slane %v2562_v51, %v1421_v42 }
 0x16f   :  { %1749 = vmatmul.mubr.msk.bf16.vlgmr.msra.gmra.mxu0 %vm489_vm2, %v1310_v15  ;;  %v1427_v15 = vsub.s32 2, %v2096_v37 }
 0x171   :  { %v1428_v17 = vrot.slane %v2562_v51, %v1427_v15 }
 0x22f   :  { %v1360_v30 = vpop.f32.mrf.mxu0 }
 0x230   :  { %v1361_v13 = vadd.f32 %v1360_v30, %v1242_v24 }
 0x231   :  { %v1750_v23 = vpop.f32.mrf.mxu0 }
 0x232   :  { %v1369_v53 = vmul.f32 0.044715, %v1361_v13  ;;  %v1367_v4 = vmul.f32 0.5, %v1361_v13 }
 0x233   :  { %v1363_v34 = vpop.f32.mrf.mxu0 }
 0x234   :  { %v1371_v50 = vmul.f32 %v1369_v53, %v1361_v13  ;;  %v1364_v55 = vadd.f32 %v1363_v34, %v1242_v24 }
 0x235   :  { %v1751_v40 = vpop.f32.mrf.mxu0 }
 0x236   :  { %v1370_v35 = vmul.f32 0.044715, %v1364_v55  ;;  %v1373_v1 = vmul.f32 %v1371_v50, %v1361_v13  ;;  %v1368_v43 = vmul.f32 0.5, %v1364_v55  ;;  %v1440_v50 = vld [vmem:[%s2602_s8] sm:$0x3] }
 0x237   :  { %v1449_v37 = vrot.slane %v1440_v50, %v1421_v42 }
 0x238   :  { %v1372_v0 = vmul.f32 %v1370_v35, %v1364_v55  ;;  %v1375_v41 = vadd.f32 %v1373_v1, %v1361_v13 }
 0x23a   :  { %v1374_v29 = vmul.f32 %v1372_v0, %v1364_v55  ;;  %v1377_v46 = vmul.f32 0.7978846, %v1375_v41 }
 0x23c   :  { %1873 = vtanh.f32 %v1377_v46  ;;  %v1376_v3 = vadd.f32 %v1374_v29, %v1364_v55  ;;  %v1445_v55 = vrot.slane %v1440_v50, %v2099_v39 }
 0x23e   :  { %v1378_v63 = vmul.f32 0.7978846, %v1376_v3 }
 0x240   :  { %1875 = vtanh.f32 %v1378_v63 }
 0x249   :  { %v1874_v16 = vpop.eup %1873 }
 0x24a   :  { %v1381_v2 = vadd.f32 1.0, %v1874_v16 }
 0x24c   :  { %v1383_v62 = vmul.f32 %v1381_v2, %v1367_v4 }
 0x24d   :  { %v1876_v11 = vpop.eup %1875 }
 0x24e   :  { %v1386_v10 = vsel %vm1385_vm11, %v1383_v62, 0.0  ;;  %v1395_v6 = vmul.f32 %v1383_v62, %v1383_v62  ;;  %v1382_v47 = vadd.f32 1.0, %v1876_v11 }
 0x24f   :  { %1387 = vadd.xlane.f32.xlu0 %v1386_v10 }
 0x250   :  { %v1397_v44 = vsel %vm1385_vm11, %v1395_v6, 0.0  ;;  %v1384_v31 = vmul.f32 %v1382_v47, %v1368_v43 }
 0x251   :  { %1398 = vadd.xlane.f32.xlu1 %v1397_v44 }
 0x252   :  { %v1389_v18 = vsel %vm1385_vm11, %v1384_v31, 0.0  ;;  %v1396_v5 = vmul.f32 %v1384_v31, %v1384_v31 }
 0x253   :  { %1390 = vadd.xlane.f32.xlu0 %v1389_v18 }
 0x254   :  { %v1400_v59 = vsel %vm1385_vm11, %v1396_v5, 0.0 }
 0x255   :  { %1401 = vadd.xlane.f32.xlu1 %v1400_v59 }
 0x2d8   :  { %v1388_v21 = vpop.xlane.xlu0 %1387 }
 0x2d9   :  { %v1393_v19 = vmul.f32 0.015625, %v1388_v21 }
 0x2da   :  { %v1399_v32 = vpop.xlane.xlu1 %1398 }
 0x2db   :  { %v1405_v26 = vmul.f32 %v1393_v19, %v1393_v19  ;;  %v1403_v48 = vmul.f32 0.015625, %v1399_v32  ;;  %v1411_v36 = vsub.f32 %v1383_v62, %v1393_v19 }
 0x2dc   :  { %v1391_v60 = vpop.xlane.xlu0 %1390 }
 0x2dd   :  { %v1407_v33 = vsub.f32 %v1403_v48, %v1405_v26  ;;  %v1394_v7 = vmul.f32 0.015625, %v1391_v60 }
 0x2de   :  { %v1402_v8 = vpop.xlane.xlu1 %1401 }
 0x2df   :  { %v1409_v22 = vmax.f32 %v1407_v33, 0.0  ;;  %v1406_v12 = vmul.f32 %v1394_v7, %v1394_v7  ;;  %v1404_v61 = vmul.f32 0.015625, %v1402_v8  ;;  %v1412_v56 = vsub.f32 %v1384_v31, %v1394_v7 }
 0x2e1   :  { %v1413_v54 = vadd.f32 1e-12, %v1409_v22  ;;  %v1408_v14 = vsub.f32 %v1404_v61, %v1406_v12 }
 0x2e3   :  { %1877 = vrsqrt.f32 %v1413_v54  ;;  %v1410_v25 = vmax.f32 %v1408_v14, 0.0 }
 0x2e5   :  { %v1414_v57 = vadd.f32 1e-12, %v1410_v25 }
 0x2e7   :  { %1879 = vrsqrt.f32 %v1414_v57 }
 0x2f0   :  { %v1878_v52 = vpop.eup %1877 }
 0x2f1   :  { %v1417_v45 = vmul.f32 %v1878_v52, %v1411_v36 }
 0x2f3   :  { %v1423_v24 = vmul.f32 %v1422_v9, %v1417_v45 }
 0x2f4   :  { %v1880_v38 = vpop.eup %1879 }
 0x2f5   :  { %v1418_v30 = vmul.f32 %v1880_v38, %v1412_v56  ;;  %v1429_v23 = vadd.f32 %v1428_v17, %v1423_v24 }
 0x2f7   :  { %v1424_v13 = vmul.f32 %v1422_v9, %v1418_v30 }
 0x2f9   :  { %v1430_v53 = vadd.f32 %v1428_v17, %v1424_v13 }
 0x2fb   :  { %v1431_v34 = vpack.c.bf16 %v1430_v53, %v1429_v23 }
 0x2fd   :  { %1635 = vmatmul.mubr.msk.bf16.vlgmr.msra.gmra.mxu1 %vm1385_vm11, %v1431_v34 }
 0x3bd   :  { %v1529_v40 = vpop.f32.mrf.mxu1 }
 0x3be   :  { %v1530_v35 = vadd.f32 %v1529_v40, %v1445_v55 }
 0x3bf   :  { %v1531_v1 = vpop.f32.mrf.mxu1 }
 0x3c0   :  { %1538 = vst [vmem:[#allocation2] sm:$0xff] %v1530_v35  ;;  %v1532_v51 = vadd.f32 %v1531_v1, %v1449_v37 }
 0x3c1   :  { %v1533_v0 = vpop.f32.mrf.mxu1 }
 0x3c2   :  { %1539 = vst [vmem:[#allocation2 + $0x8] sm:$0xff] %v1532_v51  ;;  %v1534_v41 = vadd.f32 %v1533_v0, %v1445_v55 }
 0x3c3   :  { %v1535_v29 = vpop.f32.mrf.mxu1 }
 0x3c4   :  { %1540 = vst [vmem:[#allocation2 + $0x10] sm:$0xff] %v1534_v41  ;;  %v1536_v46 = vadd.f32 %v1535_v29, %v1449_v37 }
 0x3c6   :  { %1541 = vst [vmem:[#allocation2 + $0x18] sm:$0xff] %v1536_v46 }
 0x3c7   :  { %1892 = shalt.err (!%p1889_p4)
}
 0x3c8   :  { %s1907_s8 = smov 256   ;;  %s1908_s1 = smov 16  }
 0x3c9   :  { %1553 = dma.vmem_to_hbm [thread:$0]  %s1548_s29, 512, %s2603_s9, [#allocation3], %s1907_s8, %s1907_s8, %s1908_s1  }
 0x3ca   :  { %1901 = dma.done.wait [#allocation3], 512  }
 0x3cb   :  { %1902 = vsyncadd [#allocation3], 4294966784 }
 0x3cc   :  { %1557 = vsyncpa [#allocation3], 1 }

// kernel: tpu_custom_call.1
= control target key start
LH: loop header
LB: loop body
LE: loop exit
PB: predicated region body
PF: predicated region fallthrough
CT: control target
= control target key end

     0   :  { %vm232_vm0 = vcmask 1041408   ;;  %vm183_vm1 = vcmask 31744   ;;  %vm489_vm2 = vcmask 261120   ;;  %s2594_s0 = inlined_call_operand.vmem [shape: bf16[256,32], index: 0, kind: input, shape index: {}]   ;;  %s2595_s1 = inlined_call_operand.vmem [shape: bf16[256,4], index: 1, kind: input, shape index: {}]   ;;  %s2596_s2 = inlined_call_operand.vmem [shape: bf16[32,32], index: 2, kind: input, shape index: {}]   ;;  %s2597_s3 = inlined_call_operand.vmem [shape: bf16[4,32], index: 3, kind: input, shape index: {}]   ;;  %s2598_s4 = inlined_call_operand.vmem [shape: f32[1,32], index: 4, kind: input, shape index: {}]   ;;  %s2599_s5 = inlined_call_operand.vmem [shape: bf16[32,64], index: 5, kind: input, shape index: {}]   ;;  %s2600_s6 = inlined_call_operand.vmem [shape: f32[3,64], index: 6, kind: input, shape index: {}]   ;;  %s2601_s7 = inlined_call_operand.vmem [shape: bf16[64,256], index: 7, kind: input, shape index: {}]   ;;  %s2602_s8 = inlined_call_operand.vmem [shape: f32[1,256], index: 8, kind: input, shape index: {}]   ;;  %s2603_s9 = inlined_call_operand.hbm [shape: f32[16,256], index: 9, kind: output, shape index: {}]  }
   0x1   :  { %v102_v0 = vld [vmem:[%s2597_s3] sm:$0x3]  ;;  %v1759_v1 = vld [vmem:[%s2596_s2 + $0x8] sm:$0xff]   ;;  %v1765_v8 = vld [vmem:[%s2595_s1 + $0x10] sm:$0xff]  }
   0x2   :  { %1752 = vmatprep.subr.msk.bf16.mxu0 %vm232_vm0, %v102_v0  ;;  %v234_v2 = vsel %vm232_vm0, %v102_v0, 0  ;;  %v1760_v3 = vld [vmem:[%s2595_s1] sm:$0xff]   ;;  %1708 = vmatprep.subr.bf16.mxu1 %v1759_v1  ;;  %v1761_v4 = vld [vmem:[%s2595_s1 + $0x8] sm:$0xff]   ;;  %v1766_v9 = vld [vmem:[%s2595_s1 + $0x18] sm:$0xff]  }
   0x3   :  { %1675 = vmatpush3.bf16.msra.mxu0 %v234_v2  ;;  %1676 = vmatprep.mubr.msk.bf16.mxu0 %vm183_vm1, %v1760_v3  ;;  %v1762_v5 = vld [vmem:[%s2596_s2] sm:$0xff]   ;;  %v1764_v7 = vld [vmem:[%s2594_s0 + $0x8] sm:$0xff]   ;;  %v1767_v10 = vld [vmem:[%s2594_s0 + $0x10] sm:$0xff]  }
   0x4   :  { %1709 = vmatpush3.bf16.msra.mxu1 %v1759_v1  ;;  %v1763_v6 = vld [vmem:[%s2594_s0] sm:$0xff]   ;;  %v1768_v12 = vld [vmem:[%s2594_s0 + $0x18] sm:$0xff]   ;;  %v1770_v14 = vld [vmem:[%s2595_s1 + $0x28] sm:$0xff]  }
   0x5   :  { %1710 = vmatprep.subr.bf16.mxu1 %v1762_v5  ;;  %1712 = vmatprep.mubr.msk.bf16.mxu1 %vm489_vm2, %v1763_v6  ;;  %v1769_v11 = vld [vmem:[%s2595_s1 + $0x20] sm:$0xff]   ;;  %v1773_v15 = vld [vmem:[%s2595_s1 + $0x30] sm:$0xff]   ;;  %v1772_v16 = vld [vmem:[%s2594_s0 + $0x28] sm:$0xff]  }
   0x6   :  { %1677 = vmatmul.mubr.msk.bf16.vlgmr.msra.gmra.mxu0 %vm183_vm1, %v1761_v4  ;;  %v1771_v13 = vld [vmem:[%s2594_s0 + $0x20] sm:$0xff]   ;;  %v1775_v17 = vld [vmem:[%s2594_s0 + $0x30] sm:$0xff]   ;;  %v1774_v18 = vld [vmem:[%s2595_s1 + $0x38] sm:$0xff]  }
   0x7   :  { %1680 = vmatprep.mubr.msk.bf16.mxu0 %vm183_vm1, %v1765_v8  ;;  %v1777_v19 = vld [vmem:[%s2595_s1 + $0x40] sm:$0xff]   ;;  %v1776_v20 = vld [vmem:[%s2594_s0 + $0x38] sm:$0xff]   ;;  %v1778_v22 = vld [vmem:[%s2595_s1 + $0x48] sm:$0xff]  }
   0x8   :  { %1711 = vmatpush3.bf16.msra.mxu1 %v1762_v5  ;;  %v1779_v21 = vld [vmem:[%s2594_s0 + $0x40] sm:$0xff]   ;;  %v1781_v23 = vld [vmem:[%s2595_s1 + $0x50] sm:$0xff]   ;;  %v1780_v24 = vld [vmem:[%s2594_s0 + $0x48] sm:$0xff]  }
   0xb   :  { %1713 = vmatmul.mubr.msk.bf16.vlgmr.msra.gmra.mxu1 %vm489_vm2, %v1764_v7 }
   0xc   :  { %1716 = vmatprep.mubr.msk.bf16.mxu1 %vm489_vm2, %v1767_v10 }
   0xe   :  { %1681 = vmatmul.mubr.msk.bf16.gmra.mxu0 %vm183_vm1, %v1766_v9 }
   0xf   :  { %1684 = vmatprep.mubr.msk.bf16.mxu0 %vm183_vm1, %v1769_v11 }
  0x13   :  { %1717 = vmatmul.mubr.msk.bf16.gmra.mxu1 %vm489_vm2, %v1768_v12 }
  0x14   :  { %1720 = vmatprep.mubr.msk.bf16.mxu1 %vm489_vm2, %v1771_v13 }
  0x16   :  { %1685 = vmatmul.mubr.msk.bf16.gmra.mxu0 %vm183_vm1, %v1770_v14 }
  0x17   :  { %1688 = vmatprep.mubr.msk.bf16.mxu0 %vm183_vm1, %v1773_v15 }
  0x1b   :  { %1721 = vmatmul.mubr.msk.bf16.gmra.mxu1 %vm489_vm2, %v1772_v16 }
  0x1c   :  { %1724 = vmatprep.mubr.msk.bf16.mxu1 %vm489_vm2, %v1775_v17 }
  0x1e   :  { %1689 = vmatmul.mubr.msk.bf16.gmra.mxu0 %vm183_vm1, %v1774_v18 }
  0x1f   :  { %1692 = vmatprep.mubr.msk.bf16.mxu0 %vm183_vm1, %v1777_v19 }
  0x23   :  { %1725 = vmatmul.mubr.msk.bf16.gmra.mxu1 %vm489_vm2, %v1776_v20 }
  0x24   :  { %1728 = vmatprep.mubr.msk.bf16.mxu1 %vm489_vm2, %v1779_v21 }
  0x26   :  { %1693 = vmatmul.mubr.msk.bf16.gmra.mxu0 %vm183_vm1, %v1778_v22 }
  0x27   :  { %1696 = vmatprep.mubr.msk.bf16.mxu0 %vm183_vm1, %v1781_v23 }
  0x28   :  { %14 = vsyncpa [#allocation3], 0  ;;  %v1783_v25 = vld [vmem:[%s2594_s0 + $0x50] sm:$0xff]   ;;  %v1782_v26 = vld [vmem:[%s2595_s1 + $0x58] sm:$0xff]   ;;  %v701_v36 = vlaneseq  ;;  %vm1904_vm3 = vmmov 0   ;;  %vm1276_vm4 = vcmask 1041409  }
  0x29   :  { %v1785_v27 = vld [vmem:[%s2595_s1 + $0x60] sm:$0xff]   ;;  %v1784_v28 = vld [vmem:[%s2594_s0 + $0x58] sm:$0xff]   ;;  %v1786_v30 = vld [vmem:[%s2595_s1 + $0x68] sm:$0xff]   ;;  %vm1279_vm5 = vcmask 1042434   ;;  %vm1282_vm6 = vcmask 1043459   ;;  %vm1285_vm7 = vcmask 1044484  }
  0x2a   :  { %v1787_v29 = vld [vmem:[%s2594_s0 + $0x60] sm:$0xff]   ;;  %v1789_v31 = vld [vmem:[%s2595_s1 + $0x70] sm:$0xff]   ;;  %v1788_v32 = vld [vmem:[%s2594_s0 + $0x68] sm:$0xff]   ;;  %v2096_v37 = vshrl.u32 %v701_v36, 7  ;;  %vm1288_vm8 = vcmask 1045509   ;;  %vm1291_vm9 = vcmask 1046534  }
  0x2b   :  { %1729 = vmatmul.mubr.msk.bf16.gmra.mxu1 %vm489_vm2, %v1780_v24  ;;  %v1791_v33 = vld [vmem:[%s2594_s0 + $0x70] sm:$0xff]   ;;  %v1790_v34 = vld [vmem:[%s2595_s1 + $0x78] sm:$0xff]   ;;  %v2104_v40 = vld [vmem:[%s2598_s4] sm:$0x1]  ;;  %vm1294_vm10 = vcmask 1047559   ;;  %vm1385_vm11 = vcmask 523264  }
  0x2c   :  { %1732 = vmatprep.mubr.msk.bf16.mxu1 %vm489_vm2, %v1783_v25  ;;  %v1792_v35 = vld [vmem:[%s2594_s0 + $0x78] sm:$0xff]   ;;  %v2099_v39 = vsub.s32 0, %v2096_v37  ;;  %v1171_v58 = vmul.f32 0.044715, %v2104_v40  ;;  %s1906_s28 = smov [#allocation2]  }
  0x2d   :  { %s1547_s29 = sshll.u32 %s1906_s28, 4  ;;  %s1548_s29 = int_to_ptr.vmem [resolvable:$true] %s1547_s29 }
  0x2e   :  { %1697 = vmatmul.mubr.msk.bf16.gmra.mxu0 %vm183_vm1, %v1782_v26  ;;  %v2108_v43 = vrot.slane %v2104_v40, %v2099_v39  ;;  %v1172_v4 = vmul.f32 %v1171_v58, %v2104_v40  ;;  %s1881_s30 = scalar_lea.vmem %s1548_s29, 512  ;;  %p1886_p1 = scmp.lt.s32.totalorder %s1548_s29, %s1548_s29 }
  0x2f   :  { %1700 = vmatprep.mubr.msk.bf16.mxu0 %vm183_vm1, %v1785_v27  ;;  %p1882_p0 = scmp.ne.s32.totalorder %s1548_s29, %s1881_s30  ;;  %p1887_p2 = scmp.lt.s32.totalorder %s1881_s30, %s1881_s30 }
  0x30   :  { %v1173_v13 = vmul.f32 %v1172_v4, %v2104_v40 }
  0x31   :  { %p1888_p3 = por %p1887_p2, %p1886_p1 }
  0x32   :  { %v1174_v23 = vadd.f32 %v1173_v13, %v2104_v40 }
  0x33   :  { %1733 = vmatmul.mubr.msk.bf16.gmra.mxu1 %vm489_vm2, %v1784_v28  ;;  %p1889_p4 = pnand %p1888_p3, %p1882_p0 }
  0x34   :  { %1736 = vmatprep.mubr.msk.bf16.mxu1 %vm489_vm2, %v1787_v29 }
  0x36   :  { %1701 = vmatmul.mubr.msk.bf16.gmra.mxu0 %vm183_vm1, %v1786_v30 }
  0x37   :  { %1704 = vmatprep.mubr.msk.bf16.mxu0 %vm183_vm1, %v1789_v31 }
  0x3b   :  { %1737 = vmatmul.mubr.msk.bf16.gmra.mxu1 %vm489_vm2, %v1788_v32 }
  0x3c   :  { %1740 = vmatprep.mubr.msk.bf16.mxu1 %vm489_vm2, %v1791_v33 }
  0x3e   :  { %1705 = vmatmul.mubr.msk.bf16.gmra.mxu0 %vm183_vm1, %v1790_v34 }
  0x43   :  { %1741 = vmatmul.mubr.msk.bf16.gmra.mxu1 %vm489_vm2, %v1792_v35  ;;  %v1175_v35 = vmul.f32 0.7978846, %v1174_v23 }
  0xc6   :  { %v1678_v38 = vpop.f32.mrf.mxu0 }
  0xc8   :  { %v270_v41 = vpop.f32.mrf.mxu0 }
  0xca   :  { %v1679_v42 = vpop.f32.mrf.mxu0 }
  0xcb   :  { %v1714_v44 = vpop.f32.mrf.mxu1 }
  0xcc   :  { %v273_v45 = vpop.f32.mrf.mxu0  ;;  %v581_v46 = vadd.f32 %v1714_v44, %v1678_v38 }
  0xcd   :  { %v572_v47 = vpop.f32.mrf.mxu1 }
  0xce   :  { %v2111_v48 = vadd.f32 %v2108_v43, %v581_v46  ;;  %v1682_v49 = vpop.f32.mrf.mxu0  ;;  %v573_v50 = vadd.f32 %v572_v47, %v270_v41 }
  0xcf   :  { %v1715_v51 = vpop.f32.mrf.mxu1 }
  0xd0   :  { %v584_v52 = vadd.f32 %v1715_v51, %v1679_v42  ;;  %v286_v53 = vpop.f32.mrf.mxu0  ;;  %v772_v55 = vmul.f32 0.044715, %v2111_v48  ;;  %v2118_v57 = vadd.f32 %v2108_v43, %v573_v50 }
  0xd1   :  { %v575_v54 = vpop.f32.mrf.mxu1 }
  0xd2   :  { %v2115_v56 = vadd.f32 %v2108_v43, %v584_v52  ;;  %v576_v59 = vadd.f32 %v575_v54, %v273_v45  ;;  %v1683_v62 = vpop.f32.mrf.mxu0  ;;  %v804_v1 = vmul.f32 %v772_v55, %v2111_v48  ;;  %v770_v3 = vmul.f32 0.044715, %v2118_v57 }
  0xd3   :  { %v1718_v60 = vpop.f32.mrf.mxu1 }
  0xd4   :  { %v773_v61 = vmul.f32 0.044715, %v2115_v56  ;;  %v2123_v63 = vadd.f32 %v2108_v43, %v576_v59  ;;  %v289_v9 = vpop.f32.mrf.mxu0  ;;  %v836_v11 = vmul.f32 %v804_v1, %v2111_v48  ;;  %v802_v12 = vmul.f32 %v770_v3, %v2118_v57 }
  0xd5   :  { %v588_v0 = vpop.f32.mrf.mxu1  ;;  %v597_v14 = vadd.f32 %v1718_v60, %v1682_v49 }
  0xd6   :  { %v805_v2 = vmul.f32 %v773_v61, %v2115_v56  ;;  %v771_v5 = vmul.f32 0.044715, %v2123_v63  ;;  %v1686_v19 = vpop.f32.mrf.mxu0  ;;  %v589_v20 = vadd.f32 %v588_v0, %v286_v53  ;;  %v868_v21 = vadd.f32 %v836_v11, %v2111_v48 }
  0xd7   :  { %v1719_v6 = vpop.f32.mrf.mxu1  ;;  %v834_v22 = vmul.f32 %v802_v12, %v2118_v57  ;;  %v2141_v24 = vadd.f32 %v2108_v43, %v597_v14 }
  0xd8   :  { %v837_v7 = vmul.f32 %v805_v2, %v2115_v56  ;;  %v803_v8 = vmul.f32 %v771_v5, %v2123_v63  ;;  %v600_v17 = vadd.f32 %v1719_v6, %v1683_v62  ;;  %v2148_v30 = vadd.f32 %v2108_v43, %v589_v20  ;;  %v302_v31 = vpop.f32.mrf.mxu0 }
  0xd9   :  { %v591_v10 = vpop.f32.mrf.mxu1  ;;  %v900_v32 = vmul.f32 0.7978846, %v868_v21  ;;  %v866_v34 = vadd.f32 %v834_v22, %v2118_v57  ;;  %v776_v36 = vmul.f32 0.044715, %v2141_v24 }
  0xda   :  { %v869_v16 = vadd.f32 %v837_v7, %v2115_v56  ;;  %v835_v18 = vmul.f32 %v803_v8, %v2123_v63  ;;  %v2144_v27 = vadd.f32 %v2108_v43, %v600_v17  ;;  %v592_v28 = vadd.f32 %v591_v10, %v289_v9  ;;  %v1687_v46 = vpop.f32.mrf.mxu0 }
  0xdb   :  { %v1722_v15 = vpop.f32.mrf.mxu1  ;;  %v774_v45 = vmul.f32 0.044715, %v2148_v30  ;;  %v898_v49 = vmul.f32 0.7978846, %v866_v34  ;;  %v808_v50 = vmul.f32 %v776_v36, %v2141_v24 }
  0xdc   :  { %v901_v26 = vmul.f32 0.7978846, %v869_v16  ;;  %v867_v29 = vadd.f32 %v835_v18, %v2123_v63  ;;  %v613_v33 = vadd.f32 %v1722_v15, %v1686_v19  ;;  %v777_v41 = vmul.f32 0.044715, %v2144_v27  ;;  %v305_v55 = vpop.f32.mrf.mxu0 }
  0xdd   :  { %v604_v25 = vpop.f32.mrf.mxu1  ;;  %v2154_v42 = vadd.f32 %v2108_v43, %v592_v28  ;;  %v806_v54 = vmul.f32 %v774_v45, %v2148_v30  ;;  %v840_v60 = vmul.f32 %v808_v50, %v2141_v24  ;;  %v740_v45 = vmul.f32 0.5, %v2111_v48 }
  0xde   :  { %1807 = vtanh.f32 %v901_v26  ;;  %v899_v44 = vmul.f32 0.7978846, %v867_v29  ;;  %v2158_v47 = vadd.f32 %v2108_v43, %v613_v33  ;;  %v809_v52 = vmul.f32 %v777_v41, %v2144_v27  ;;  %v1690_v2 = vpop.f32.mrf.mxu0 }
  0xdf   :  { %v1723_v38 = vpop.f32.mrf.mxu1  ;;  %1809 = vtanh.f32 %v900_v32  ;;  %v775_v53 = vmul.f32 0.044715, %v2154_v42  ;;  %v605_v58 = vadd.f32 %v604_v25, %v302_v31  ;;  %v838_v1 = vmul.f32 %v806_v54, %v2148_v30 }
  0xe0   :  { %1811 = vtanh.f32 %v1175_v35  ;;  %v780_v59 = vmul.f32 0.044715, %v2158_v47  ;;  %v841_v62 = vmul.f32 %v809_v52, %v2144_v27  ;;  %v872_v5 = vadd.f32 %v840_v60, %v2141_v24  ;;  %v318_v13 = vpop.f32.mrf.mxu0 }
  0xe1   :  { %v607_v51 = vpop.f32.mrf.mxu1  ;;  %1813 = vtanh.f32 %v899_v44  ;;  %v807_v0 = vmul.f32 %v775_v53, %v2154_v42  ;;  %v2170_v3 = vadd.f32 %v2108_v43, %v605_v58  ;;  %v616_v6 = vadd.f32 %v1723_v38, %v1687_v46 }
  0xe2   :  { %1815 = vtanh.f32 %v898_v49  ;;  %v812_v4 = vmul.f32 %v780_v59, %v2158_v47  ;;  %v873_v8 = vadd.f32 %v841_v62, %v2144_v27  ;;  %v870_v11 = vadd.f32 %v838_v1, %v2148_v30  ;;  %v2187_v29 = vpop.f32.mrf.mxu0 }
  0xe3   :  { %v1726_v61 = vpop.f32.mrf.mxu1  ;;  %v839_v9 = vmul.f32 %v807_v0, %v2154_v42  ;;  %v778_v12 = vmul.f32 0.044715, %v2170_v3  ;;  %v904_v16 = vmul.f32 0.7978846, %v872_v5  ;;  %v2180_v17 = vadd.f32 %v2108_v43, %v616_v6 }
  0xe4   :  { %v844_v14 = vmul.f32 %v812_v4, %v2158_v47  ;;  %v608_v18 = vadd.f32 %v607_v51, %v305_v55  ;;  %v905_v22 = vmul.f32 0.7978846, %v873_v8  ;;  %v1170_v25 = vmul.f32 0.5, %v2104_v40  ;;  %v321_v51 = vpop.f32.mrf.mxu0 }
  0xe5   :  { %v620_v7 = vpop.f32.mrf.mxu1  ;;  %v871_v23 = vadd.f32 %v839_v9, %v2154_v42  ;;  %v902_v26 = vmul.f32 0.7978846, %v870_v11  ;;  %v810_v28 = vmul.f32 %v778_v12, %v2170_v3  ;;  %v741_v33 = vmul.f32 0.5, %v2115_v56 }
  0xe6   :  { %v876_v34 = vadd.f32 %v844_v14, %v2158_v47  ;;  %v629_v35 = vadd.f32 %v1726_v61, %v1690_v2  ;;  %1817 = vtanh.f32 %v904_v16  ;;  %v781_v38 = vmul.f32 0.044715, %v2180_v17  ;;  %v2208_v5 = vpop.f32.mrf.mxu0 }
  0xe7   :  { %v2182_v19 = vpop.f32.mrf.mxu1  ;;  %v2193_v41 = vadd.f32 %v2108_v43, %v608_v18  ;;  %1819 = vtanh.f32 %v905_v22  ;;  %v903_v49 = vmul.f32 0.7978846, %v871_v23  ;;  %v842_v56 = vmul.f32 %v810_v28, %v2170_v3 }
  0xe8   :  { %1821 = vtanh.f32 %v902_v26  ;;  %v908_v53 = vmul.f32 0.7978846, %v876_v34  ;;  %v2198_v54 = vadd.f32 %v2108_v43, %v629_v35  ;;  %v739_v58 = vmul.f32 0.5, %v2123_v63 }
  0xe9   :  { %v623_v40 = vpop.f32.mrf.mxu1  ;;  %v813_v59 = vmul.f32 %v781_v38, %v2180_v17  ;;  %v779_v48 = vmul.f32 0.044715, %v2193_v41  ;;  %1823 = vtanh.f32 %v903_v49  ;;  %v621_v0 = vadd.f32 %v620_v7, %v318_v13 }
  0xea   :  { %v738_v1 = vmul.f32 0.5, %v2118_v57  ;;  %v874_v4 = vadd.f32 %v842_v56, %v2170_v3  ;;  %1825 = vtanh.f32 %v908_v53  ;;  %v784_v6 = vmul.f32 0.044715, %v2198_v54 }
  0xeb   :  { %v1808_v10 = vpop.eup %1807  ;;  %v2203_v60 = vpop.f32.mrf.mxu1  ;;  %v811_v11 = vmul.f32 %v779_v48, %v2193_v41  ;;  %v2217_v57 = vadd.f32 %v2108_v43, %v621_v0  ;;  %v742_v34 = vmul.f32 0.5, %v2148_v30  ;;  %v632_v49 = vadd.f32 %v2182_v19, %v2187_v29 }
  0xec   :  { %v1810_v15 = vpop.eup %1809  ;;  %v965_v21 = vadd.f32 1.0, %v1808_v10  ;;  %v845_v10 = vmul.f32 %v813_v59, %v2180_v17  ;;  %v906_v14 = vmul.f32 0.7978846, %v874_v4  ;;  %v816_v16 = vmul.f32 %v784_v6, %v2198_v54 }
  0xed   :  { %v1812_v20 = vpop.eup %1811  ;;  %v964_v32 = vadd.f32 1.0, %v1810_v15  ;;  %v2214_v12 = vpop.f32.mrf.mxu1  ;;  %v843_v22 = vmul.f32 %v811_v11, %v2193_v41  ;;  %v2242_v59 = vmul.f32 0.5, %v2180_v17  ;;  %v2248_v48 = vmul.f32 0.5, %v2193_v41 }
  0xee   :  { %v1814_v31 = vpop.eup %1813  ;;  %v1177_v36 = vadd.f32 1.0, %v1812_v20  ;;  %v997_v46 = vmul.f32 %v965_v21, %v741_v33  ;;  %v334_v15 = vpop.f32.mrf.mxu0  ;;  %v877_v21 = vadd.f32 %v845_v10, %v2180_v17  ;;  %v744_v33 = vmul.f32 0.5, %v2141_v24 }
  0xef   :  { %v1816_v44 = vpop.eup %1815  ;;  %v963_v50 = vadd.f32 1.0, %v1814_v31  ;;  %v996_v52 = vmul.f32 %v964_v32, %v740_v45  ;;  %v1731_v23 = vpop.f32.mrf.mxu1  ;;  %v782_v31 = vmul.f32 0.044715, %v2217_v57  ;;  %1827 = vtanh.f32 %v906_v14 }
  0xf0   :  { %v962_v55 = vadd.f32 1.0, %v1816_v44  ;;  %v1036_v61 = vsel %vm489_vm2, %v997_v46, 0.0  ;;  %v1178_v62 = vmul.f32 %v1177_v36, %v1170_v25  ;;  %v1695_v35 = vpop.f32.mrf.mxu0  ;;  %v624_v36 = vadd.f32 %v623_v40, %v321_v51 }
  0xf1   :  { %v995_v2 = vmul.f32 %v963_v50, %v739_v58  ;;  %v1035_v63 = vsel %vm489_vm2, %v996_v52, 0.0  ;;  %v745_v44 = vmul.f32 0.5, %v2144_v27  ;;  %v743_v45 = vmul.f32 0.5, %v2154_v42  ;;  %v639_v53 = vpop.f32.mrf.mxu1 }
  0xf2   :  { %v994_v8 = vmul.f32 %v962_v55, %v738_v1  ;;  %v1037_v9 = vadd.f32 %v1036_v61, %v1035_v63  ;;  %v1179_v7 = vmul.f32 4.0, %v1178_v62  ;;  %v848_v46 = vmul.f32 %v816_v16, %v2198_v54  ;;  %v337_v29 = vpop.f32.mrf.mxu0 }
  0xf3   :  { %v1027_v13 = vsel %vm489_vm2, %v995_v2, 0.0  ;;  %v1818_v25 = vpop.eup %1817  ;;  %v909_v52 = vmul.f32 0.7978846, %v877_v21  ;;  %v875_v24 = vadd.f32 %v843_v22, %v2193_v41  ;;  %v748_v40 = vmul.f32 0.5, %v2158_v47  ;;  %v1734_v2 = vpop.f32.mrf.mxu1 }
  0xf4   :  { %v1026_v18 = vsel %vm489_vm2, %v994_v8, 0.0  ;;  %v1038_v20 = vrot.slane %v1037_v9, 4  ;;  %v2225_v26 = vrot.slane %v1179_v7, %v2099_v39  ;;  %v1820_v32 = vpop.eup %1819  ;;  %v968_v56 = vadd.f32 1.0, %v1818_v25  ;;  %v1698_v11 = vpop.f32.mrf.mxu0 }
  0xf5   :  { %v1028_v28 = vadd.f32 %v1027_v13, %v1026_v18  ;;  %v1822_v38 = vpop.eup %1821  ;;  %v969_v55 = vadd.f32 1.0, %v1820_v32  ;;  %v814_v51 = vmul.f32 %v782_v31, %v2217_v57  ;;  %v2239_v42 = vmul.f32 0.5, %v2170_v3  ;;  %v652_v22 = vpop.f32.mrf.mxu1 }
  0xf6   :  { %v1039_v50 = vadd.f32 %v1038_v20, %v1037_v9  ;;  %v1824_v27 = vpop.eup %1823  ;;  %v966_v58 = vadd.f32 1.0, %v1822_v38  ;;  %v2245_v19 = vadd.f32 %v2108_v43, %v624_v36  ;;  %v2251_v61 = vmul.f32 0.5, %v2198_v54 }
  0xf7   :  { %v1029_v30 = vrot.slane %v1028_v28, 4  ;;  %v880_v47 = vadd.f32 %v848_v46, %v2198_v54  ;;  %v2255_v62 = vadd.f32 %v2108_v43, %v632_v49  ;;  %v1826_v3 = vpop.eup %1825  ;;  %v1000_v1 = vmul.f32 %v968_v56, %v744_v33  ;;  %v1735_v46 = vpop.f32.mrf.mxu1 }
  0xf8   :  { %v1040_v0 = vrot.slane %v1039_v50, 2  ;;  %1829 = vtanh.f32 %v909_v52  ;;  %v907_v17 = vmul.f32 0.7978846, %v875_v24  ;;  %v1001_v63 = vmul.f32 %v969_v55, %v745_v44 }
  0xf9   :  { %v1030_v4 = vadd.f32 %v1029_v30, %v1028_v28  ;;  %v967_v6 = vadd.f32 1.0, %v1824_v27  ;;  %v846_v41 = vmul.f32 %v814_v51, %v2217_v57  ;;  %v998_v8 = vmul.f32 %v966_v58, %v742_v34 }
  0xfa   :  { %v2259_v9 = vmul.f32 0.5, %v2217_v57  ;;  %v783_v54 = vmul.f32 0.044715, %v2245_v19  ;;  %v645_v10 = vadd.f32 %v2203_v60, %v2208_v5  ;;  %v912_v7 = vmul.f32 0.7978846, %v880_v47 }
  0xfb   :  { %v785_v13 = vmul.f32 0.044715, %v2255_v62  ;;  %v637_v14 = vadd.f32 %v2214_v12, %v334_v15  ;;  %v648_v16 = vadd.f32 %v1731_v23, %v1695_v35  ;;  %v1041_v18 = vadd.f32 %v1040_v0, %v1039_v50  ;;  %v350_v23 = vpop.f32.mrf.mxu0 }
  0xfc   :  { %v1053_v20 = vsel %vm489_vm2, %v1000_v1, 0.0  ;;  %v972_v21 = vadd.f32 1.0, %v1826_v3  ;;  %1831 = vtanh.f32 %v907_v17  ;;  %v1031_v25 = vrot.slane %v1030_v4, 2  ;;  %v1828_v33 = vpop.eup %1827  ;;  %v655_v17 = vpop.f32.mrf.mxu1 }
  0xfd   :  { %v1054_v28 = vsel %vm489_vm2, %v1001_v63, 0.0  ;;  %v999_v31 = vmul.f32 %v967_v6, %v743_v45  ;;  %v878_v32 = vadd.f32 %v846_v41, %v2217_v57  ;;  %v1044_v60 = vsel %vm489_vm2, %v998_v8, 0.0  ;;  %v1699_v27 = vpop.f32.mrf.mxu0 }
  0xfe   :  { %v2271_v5 = vmul.f32 0.5, %v2255_v62  ;;  %v815_v12 = vmul.f32 %v783_v54, %v2245_v19  ;;  %v2275_v15 = vadd.f32 %v2108_v43, %v645_v10  ;;  %1833 = vtanh.f32 %v912_v7 }
  0xff   :  { %v817_v34 = vmul.f32 %v785_v13, %v2255_v62  ;;  %v2279_v35 = vadd.f32 %v2108_v43, %v637_v14  ;;  %v2282_v57 = vadd.f32 %v2108_v43, %v648_v16  ;;  %v1042_v36 = vrot.slane %v1041_v18, 1 }
 0x100   :  { %v1055_v38 = vadd.f32 %v1054_v28, %v1053_v20  ;;  %v2285_v44 = vmul.f32 0.5, %v2245_v19  ;;  %v640_v45 = vadd.f32 %v639_v53, %v337_v29  ;;  %v1032_v49 = vadd.f32 %v1031_v25, %v1030_v4 }
 0x101   :  { %v1045_v50 = vsel %vm489_vm2, %v999_v31, 0.0  ;;  %v1004_v56 = vmul.f32 %v972_v21, %v748_v40  ;;  %v910_v52 = vmul.f32 0.7978846, %v878_v32  ;;  %v970_v24 = vadd.f32 1.0, %v1828_v33 }
 0x102   :  { %v847_v30 = vmul.f32 %v815_v12, %v2245_v19  ;;  %v788_v55 = vmul.f32 0.044715, %v2275_v15  ;;  %v789_v51 = vmul.f32 0.044715, %v2282_v57  ;;  %v786_v58 = vmul.f32 0.044715, %v2279_v35 }
 0x103   :  { %v2293_v47 = vadd.f32 %v2108_v43, %v640_v45  ;;  %v661_v53 = vadd.f32 %v1734_v2, %v1698_v11  ;;  %v653_v29 = vadd.f32 %v652_v22, %v350_v23  ;;  %v1043_v3 = vadd.f32 %v1042_v36, %v1041_v18  ;;  %v353_v11 = vpop.f32.mrf.mxu0  ;;  %v1738_v22 = vpop.f32.mrf.mxu1 }
 0x104   :  { %v1056_v0 = vrot.slane %v1055_v38, 4  ;;  %v849_v40 = vmul.f32 %v817_v34, %v2255_v62  ;;  %v821_v1 = vmul.f32 %v789_v51, %v2282_v57  ;;  %v1033_v63 = vrot.slane %v1032_v49, 1 }
 0x105   :  { %v1830_v4 = vpop.eup %1829  ;;  %v1046_v6 = vadd.f32 %v1045_v50, %v1044_v60  ;;  %v787_v41 = vmul.f32 0.044715, %v2293_v47  ;;  %v2299_v8 = vadd.f32 %v2108_v43, %v661_v53  ;;  %v2302_v54 = vsel %vm489_vm2, %v1004_v56, 0.0  ;;  %v1702_v23 = vpop.f32.mrf.mxu0 }
 0x106   :  { %v879_v2 = vadd.f32 %v847_v30, %v2245_v19  ;;  %v820_v10 = vmul.f32 %v788_v55, %v2275_v15  ;;  %v2307_v7 = vadd.f32 %v2108_v43, %v653_v29  ;;  %v1002_v13 = vmul.f32 %v970_v24, %v2239_v42  ;;  %v668_v30 = vpop.f32.mrf.mxu1 }
 0x107   :  { %1835 = vtanh.f32 %v910_v52  ;;  %v818_v14 = vmul.f32 %v786_v58, %v2279_v35  ;;  %v853_v16 = vmul.f32 %v821_v1, %v2282_v57  ;;  %v1187_v18 = vsub.f32 %v1043_v3, %v2225_v26  ;;  %v366_v29 = vpop.f32.mrf.mxu0 }
 0x108   :  { %v881_v20 = vadd.f32 %v849_v40, %v2255_v62  ;;  %v819_v21 = vmul.f32 %v787_v41, %v2293_v47  ;;  %v792_v19 = vmul.f32 0.044715, %v2299_v8  ;;  %v2316_v28 = vadd.f32 %v1033_v63, %v1032_v49 }
 0x109   :  { %v1832_v25 = vpop.eup %1831  ;;  %v2318_v31 = vadd.f32 %v1056_v0, %v1055_v38  ;;  %v1047_v42 = vrot.slane %v1046_v6, 4  ;;  %v973_v32 = vadd.f32 1.0, %v1830_v4  ;;  %v911_v60 = vmul.f32 0.7978846, %v879_v2 }
 0x10a   :  { %v852_v12 = vmul.f32 %v820_v10, %v2275_v15  ;;  %v790_v33 = vmul.f32 0.044715, %v2307_v7  ;;  %v664_v34 = vadd.f32 %v1735_v46, %v1699_v27  ;;  %v2323_v62 = vsel %vm489_vm2, %v1002_v13, 0.0  ;;  %v1739_v10 = vpop.f32.mrf.mxu1 }
 0x10b   :  { %v850_v36 = vmul.f32 %v818_v14, %v2279_v35  ;;  %v885_v45 = vadd.f32 %v853_v16, %v2282_v57  ;;  %v656_v49 = vadd.f32 %v655_v17, %v353_v11  ;;  %v2327_v50 = vpop.eup %1833  ;;  %v913_v38 = vmul.f32 0.7978846, %v881_v20 }
 0x10c   :  { %v851_v56 = vmul.f32 %v819_v21, %v2293_v47  ;;  %v824_v52 = vmul.f32 %v792_v19, %v2299_v8  ;;  %v822_v24 = vmul.f32 %v790_v33, %v2307_v7  ;;  %v2332_v55 = vmul.f32 0.083333336, %v1187_v18  ;;  %v1703_v18 = vpop.f32.mrf.mxu0 }
 0x10d   :  { %v1058_v46 = vrot.slane %v2318_v31, 2  ;;  %v2336_v51 = vadd.f32 %v2108_v43, %v664_v34  ;;  %v2339_v27 = vadd.f32 %v2108_v43, %v656_v49  ;;  %1837 = vtanh.f32 %v911_v60 }
 0x10e   :  { %v884_v58 = vadd.f32 %v852_v12, %v2275_v15  ;;  %v854_v53 = vmul.f32 %v822_v24, %v2307_v7  ;;  %v677_v3 = vadd.f32 %v1738_v22, %v1702_v23  ;;  %v2343_v0 = vadd.f32 %v1047_v42, %v1046_v6 }
 0x10f   :  { %v882_v40 = vadd.f32 %v850_v36, %v2279_v35  ;;  %v917_v1 = vmul.f32 0.7978846, %v885_v45  ;;  %v793_v17 = vmul.f32 0.044715, %v2336_v51  ;;  %v1005_v4 = vmul.f32 %v973_v32, %v2242_v59 }
 0x110   :  { %v883_v63 = vadd.f32 %v851_v56, %v2293_v47  ;;  %v856_v41 = vmul.f32 %v824_v52, %v2299_v8  ;;  %v791_v2 = vmul.f32 0.044715, %v2339_v27  ;;  %1839 = vtanh.f32 %v913_v38  ;;  %v369_v52 = vpop.f32.mrf.mxu0 }
 0x111   :  { %v886_v11 = vadd.f32 %v854_v53, %v2307_v7  ;;  %v825_v6 = vmul.f32 %v793_v17, %v2336_v51  ;;  %v2354_v13 = vadd.f32 %v2108_v43, %v677_v3  ;;  %v971_v14 = vadd.f32 1.0, %v1832_v25  ;;  %v671_v25 = vpop.f32.mrf.mxu1 }
 0x112   :  { %v916_v16 = vmul.f32 0.7978846, %v884_v58  ;;  %v823_v59 = vmul.f32 %v791_v2, %v2339_v27  ;;  %v669_v20 = vadd.f32 %v668_v30, %v366_v29  ;;  %v914_v21 = vmul.f32 0.7978846, %v882_v40  ;;  %v1706_v2 = vpop.f32.mrf.mxu0 }
 0x113   :  { %1841 = vtanh.f32 %v917_v1  ;;  %v857_v19 = vmul.f32 %v825_v6, %v2336_v51  ;;  %v796_v22 = vmul.f32 0.044715, %v2354_v13  ;;  %v915_v32 = vmul.f32 0.7978846, %v883_v63  ;;  %v1742_v40 = vpop.f32.mrf.mxu1 }
 0x114   :  { %v1836_v42 = vpop.eup %1835  ;;  %v888_v60 = vadd.f32 %v856_v41, %v2299_v8  ;;  %v855_v12 = vmul.f32 %v823_v59, %v2339_v27  ;;  %v2362_v23 = vadd.f32 %v2108_v43, %v669_v20  ;;  %v918_v33 = vmul.f32 0.7978846, %v886_v11  ;;  %v1793_v11 = vld [vmem:[%s2599_s5 + $0x8] sm:$0xff]  }
 0x115   :  { %v889_v34 = vadd.f32 %v857_v19, %v2336_v51  ;;  %v828_v36 = vmul.f32 %v796_v22, %v2354_v13  ;;  %v680_v45 = vadd.f32 %v1739_v10, %v1703_v18  ;;  %v1186_v49 = vsub.f32 %v2316_v28, %v2225_v26  ;;  %v684_v59 = vpop.f32.mrf.mxu1 }
 0x116   :  { %v1072_v38 = vsel %vm489_vm2, %v1005_v4, 0.0  ;;  %1843 = vtanh.f32 %v916_v16  ;;  %v887_v56 = vadd.f32 %v855_v12, %v2339_v27  ;;  %v794_v30 = vmul.f32 0.044715, %v2362_v23  ;;  %v382_v12 = vpop.f32.mrf.mxu0 }
 0x117   :  { %1845 = vtanh.f32 %v914_v21  ;;  %v860_v24 = vmul.f32 %v828_v36, %v2354_v13  ;;  %v2373_v58 = vadd.f32 %v2108_v43, %v680_v45  ;;  %v920_v53 = vmul.f32 0.7978846, %v888_v60 }
 0x118   :  { %1847 = vtanh.f32 %v915_v32  ;;  %v919_v29 = vmul.f32 0.7978846, %v887_v56  ;;  %v672_v3 = vadd.f32 %v671_v25, %v369_v52  ;;  %v1003_v1 = vmul.f32 %v971_v14, %v2248_v48 }
 0x119   :  { %1849 = vtanh.f32 %v918_v33  ;;  %v921_v17 = vmul.f32 0.7978846, %v889_v34  ;;  %v826_v4 = vmul.f32 %v794_v30, %v2362_v23  ;;  %v2378_v63 = vadd.f32 %v1058_v46, %v2318_v31 }
 0x11a   :  { %v1049_v41 = vrot.slane %v2343_v0, 2  ;;  %1851 = vtanh.f32 %v919_v29  ;;  %v797_v10 = vmul.f32 0.044715, %v2373_v58  ;;  %v1838_v6 = vpop.eup %1837  ;;  %v892_v48 = vadd.f32 %v860_v24, %v2354_v13 }
 0x11b   :  { %v858_v14 = vmul.f32 %v826_v4, %v2362_v23  ;;  %v2388_v16 = vadd.f32 %v2108_v43, %v672_v3  ;;  %v693_v31 = vadd.f32 %v1742_v40, %v1706_v2  ;;  %v2391_v46 = vadd.f32 %v1072_v38, %v2302_v54 }
 0x11c   :  { %1853 = vtanh.f32 %v920_v53  ;;  %v829_v18 = vmul.f32 %v797_v10, %v2373_v58  ;;  %v1063_v20 = vsel %vm489_vm2, %v1003_v1, 0.0  ;;  %v974_v21 = vadd.f32 1.0, %v1836_v42  ;;  %v1794_v42 = vld [vmem:[%s2599_s5] sm:$0xff]  }
 0x11d   :  { %1855 = vtanh.f32 %v921_v17  ;;  %v890_v19 = vadd.f32 %v858_v14, %v2362_v23  ;;  %v1903_v22 = vmov 0.0   ;;  %v1840_v32 = vpop.eup %1839  ;;  %v975_v60 = vadd.f32 1.0, %v1838_v6  ;;  %v1743_v6 = vpop.f32.mrf.mxu1 }
 0x11e   :  { %1744 = vmatprep.subr.bf16.mxu0 %v1903_v22  ;;  %v861_v25 = vmul.f32 %v829_v18, %v2373_v58  ;;  %v795_v54 = vmul.f32 0.044715, %v2388_v16  ;;  %v2400_v33 = vadd.f32 %v2108_v43, %v693_v31  ;;  %v976_v34 = vadd.f32 1.0, %v2327_v50  ;;  %1748 = vmatprep.mubr.msk.bf16.mxu0 %vm1904_vm3, %v1903_v22 }
 0x11f   :  { %1745 = vmatpush3.bf16.msra.mxu0 %v1793_v11  ;;  %v924_v36 = vmul.f32 0.7978846, %v892_v48  ;;  %v922_v45 = vmul.f32 0.7978846, %v890_v19  ;;  %v685_v38 = vadd.f32 %v684_v59, %v382_v12  ;;  %v2408_v52 = vadd.f32 %v1063_v20, %v2323_v62 }
 0x120   :  { %1746 = vmatprep.subr.bf16.mxu0 %v1903_v22  ;;  %v1842_v56 = vpop.eup %1841  ;;  %v893_v24 = vadd.f32 %v861_v25, %v2373_v58  ;;  %v827_v30 = vmul.f32 %v795_v54, %v2388_v16  ;;  %v800_v53 = vmul.f32 0.044715, %v2400_v33  ;;  %v1060_v29 = vrot.slane %v2378_v63, 1 }
 0x121   :  { %v1074_v3 = vrot.slane %v2391_v46, 4  ;;  %v1006_v50 = vmul.f32 %v974_v21, %v2259_v9  ;;  %v977_v40 = vadd.f32 1.0, %v1840_v32  ;;  %v1007_v1 = vmul.f32 %v975_v60, %v2285_v44  ;;  %v1707_v21 = vpop.f32.mrf.mxu0 }
 0x122   :  { %1857 = vtanh.f32 %v922_v45  ;;  %v925_v17 = vmul.f32 0.7978846, %v893_v24  ;;  %v859_v62 = vmul.f32 %v827_v30, %v2388_v16  ;;  %v981_v2 = vadd.f32 1.0, %v1842_v56 }
 0x123   :  { %1747 = vmatpush3.bf16.msra.mxu0 %v1794_v42  ;;  %v1844_v4 = vpop.eup %1843  ;;  %1859 = vtanh.f32 %v924_v36  ;;  %v832_v10 = vmul.f32 %v800_v53, %v2400_v33  ;;  %v2420_v11 = vadd.f32 %v2108_v43, %v685_v38  ;;  %v1065_v9 = vrot.slane %v2408_v52, 4 }
 0x124   :  { %v1846_v48 = vpop.eup %1845  ;;  %v2424_v14 = vmul.f32 %v976_v34, %v2251_v61  ;;  %1861 = vtanh.f32 %v925_v17  ;;  %v891_v44 = vadd.f32 %v859_v62, %v2388_v16  ;;  %v1009_v18 = vmul.f32 %v977_v40, %v2271_v5 }
 0x125   :  { %v1848_v31 = vpop.eup %1847  ;;  %v756_v59 = vmul.f32 0.5, %v2275_v15  ;;  %v757_v20 = vmul.f32 0.5, %v2282_v57  ;;  %v864_v19 = vmul.f32 %v832_v10, %v2400_v33  ;;  %v980_v60 = vadd.f32 1.0, %v1844_v4 }
 0x126   :  { %v1850_v32 = vpop.eup %1849  ;;  %v923_v12 = vmul.f32 0.7978846, %v891_v44  ;;  %v798_v25 = vmul.f32 0.044715, %v2420_v11  ;;  %v696_v61 = vadd.f32 %v1743_v6, %v1707_v21  ;;  %v1080_v42 = vsel %vm489_vm2, %v1006_v50, 0.0  ;;  %v687_v6 = vpop.f32.mrf.mxu1 }
 0x127   :  { %v1852_v54 = vpop.eup %1851  ;;  %v1081_v34 = vsel %vm489_vm2, %v1007_v1, 0.0  ;;  %v754_v5 = vmul.f32 0.5, %v2279_v35  ;;  %v1013_v36 = vmul.f32 %v981_v2, %v757_v20  ;;  %v979_v15 = vadd.f32 1.0, %v1848_v31 }
 0x128   :  { %v983_v45 = vadd.f32 1.0, %v1852_v54  ;;  %1863 = vtanh.f32 %v923_v12  ;;  %v2436_v57 = vadd.f32 %v2108_v43, %v696_v61  ;;  %v2439_v56 = vsel %vm489_vm2, %v1009_v18, 0.0 }
 0x129   :  { %v1854_v38 = vpop.eup %1853  ;;  %v755_v24 = vmul.f32 0.5, %v2293_v47  ;;  %v982_v30 = vadd.f32 1.0, %v1850_v32  ;;  %v896_v53 = vadd.f32 %v864_v19, %v2400_v33  ;;  %v1012_v40 = vmul.f32 %v980_v60, %v756_v59 }
 0x12a   :  { %v1856_v50 = vpop.eup %1855  ;;  %v759_v35 = vmul.f32 0.5, %v2339_v27  ;;  %v830_v1 = vmul.f32 %v798_v25, %v2420_v11  ;;  %v801_v17 = vmul.f32 0.044715, %v2436_v57  ;;  %v2446_v62 = vadd.f32 %v1081_v34, %v1080_v42  ;;  %v385_v27 = vpop.f32.mrf.mxu0 }
 0x12b   :  { %v978_v4 = vadd.f32 1.0, %v1846_v48  ;;  %v760_v2 = vmul.f32 0.5, %v2299_v8  ;;  %v758_v10 = vmul.f32 0.5, %v2307_v7  ;;  %v1108_v47 = vsel %vm489_vm2, %v1013_v36, 0.0 }
 0x12c   :  { %v1011_v44 = vmul.f32 %v979_v15, %v755_v24  ;;  %v984_v31 = vadd.f32 1.0, %v1854_v38  ;;  %v1015_v18 = vmul.f32 %v983_v45, %v759_v35  ;;  %v985_v20 = vadd.f32 1.0, %v1856_v50 }
 0x12d   :  { %v1014_v59 = vmul.f32 %v982_v30, %v758_v10  ;;  %v928_v21 = vmul.f32 0.7978846, %v896_v53  ;;  %v833_v19 = vmul.f32 %v801_v17, %v2436_v57  ;;  %v1107_v32 = vsel %vm489_vm2, %v1012_v40, 0.0 }
 0x12e   :  { %v761_v48 = vmul.f32 0.5, %v2336_v51  ;;  %v862_v8 = vmul.f32 %v830_v1, %v2420_v11  ;;  %v688_v60 = vadd.f32 %v687_v6, %v385_v27  ;;  %v1010_v12 = vmul.f32 %v978_v4, %v754_v5 }
 0x12f   :  { %v1858_v7 = vpop.eup %1857  ;;  %v1109_v25 = vadd.f32 %v1108_v47, %v1107_v32  ;;  %v764_v61 = vmul.f32 0.5, %v2354_v13  ;;  %v762_v54 = vmul.f32 0.5, %v2362_v23  ;;  %v1099_v34 = vsel %vm489_vm2, %v1011_v44, 0.0 }
 0x130   :  { %v1860_v42 = vpop.eup %1859  ;;  %v1016_v36 = vmul.f32 %v984_v31, %v760_v2  ;;  %v1117_v15 = vsel %vm489_vm2, %v1015_v18, 0.0  ;;  %v865_v45 = vmul.f32 %v833_v19, %v2436_v57  ;;  %v1116_v51 = vsel %vm489_vm2, %v1014_v59, 0.0 }
 0x131   :  { %v1862_v38 = vpop.eup %1861  ;;  %v1017_v24 = vmul.f32 %v985_v20, %v761_v48  ;;  %1865 = vtanh.f32 %v928_v21  ;;  %v2462_v5 = vadd.f32 %v2108_v43, %v688_v60  ;;  %v986_v30 = vadd.f32 1.0, %v1858_v7 }
 0x132   :  { %v989_v13 = vadd.f32 1.0, %v1862_v38  ;;  %v894_v23 = vadd.f32 %v862_v8, %v2420_v11  ;;  %v897_v53 = vadd.f32 %v865_v45, %v2436_v57  ;;  %v1098_v50 = vsel %vm489_vm2, %v1010_v12, 0.0 }
 0x133   :  { %v1118_v40 = vadd.f32 %v1117_v15, %v1116_v51  ;;  %v988_v35 = vadd.f32 1.0, %v1860_v42  ;;  %v765_v1 = vmul.f32 0.5, %v2373_v58  ;;  %v1110_v17 = vrot.slane %v1109_v25, 4 }
 0x134   :  { %v1100_v4 = vadd.f32 %v1099_v34, %v1098_v50  ;;  %v763_v2 = vmul.f32 0.5, %v2388_v16  ;;  %v929_v10 = vmul.f32 0.7978846, %v897_v53  ;;  %v1126_v43 = vsel %vm489_vm2, %v1017_v24, 0.0 }
 0x135   :  { %v1864_v6 = vpop.eup %1863  ;;  %v1021_v47 = vmul.f32 %v989_v13, %v765_v1  ;;  %v799_v44 = vmul.f32 0.044715, %v2462_v5  ;;  %v1125_v31 = vsel %vm489_vm2, %v1016_v36, 0.0  ;;  %v1018_v18 = vmul.f32 %v986_v30, %v762_v54 }
 0x136   :  { %v987_v59 = vadd.f32 1.0, %v1864_v6  ;;  %v926_v20 = vmul.f32 0.7978846, %v894_v23  ;;  %v1119_v58 = vrot.slane %v1118_v40, 4  ;;  %v1020_v27 = vmul.f32 %v988_v35, %v764_v61 }
 0x137   :  { %1867 = vtanh.f32 %v929_v10  ;;  %v831_v16 = vmul.f32 %v799_v44, %v2462_v5  ;;  %v1089_v21 = vsel %vm489_vm2, %v2424_v14, 0.0  ;;  %v1111_v19 = vadd.f32 %v1110_v17, %v1109_v25 }
 0x138   :  { %v1127_v32 = vadd.f32 %v1126_v43, %v1125_v31  ;;  %v1019_v48 = vmul.f32 %v987_v59, %v763_v2  ;;  %v1066_v8 = vadd.f32 %v1065_v9, %v2408_v52  ;;  %v1101_v60 = vrot.slane %v1100_v4, 4 }
 0x139   :  { %v1144_v7 = vsel %vm489_vm2, %v1021_v47, 0.0  ;;  %v863_v22 = vmul.f32 %v831_v16, %v2462_v5  ;;  %v1091_v12 = vadd.f32 %v2439_v56, %v1089_v21  ;;  %v1134_v61 = vsel %vm489_vm2, %v1018_v18, 0.0 }
 0x13a   :  { %v1135_v54 = vsel %vm489_vm2, %v1019_v48, 0.0  ;;  %1869 = vtanh.f32 %v926_v20  ;;  %v1083_v14 = vrot.slane %v2446_v62, 4  ;;  %v1120_v25 = vadd.f32 %v1119_v58, %v1118_v40 }
 0x13b   :  { %v1143_v42 = vsel %vm489_vm2, %v1020_v27, 0.0  ;;  %v1136_v34 = vadd.f32 %v1135_v54, %v1134_v61  ;;  %v1112_v36 = vrot.slane %v1111_v19, 2  ;;  %v1128_v52 = vrot.slane %v1127_v32, 4 }
 0x13c   :  { %v1145_v9 = vadd.f32 %v1144_v7, %v1143_v42  ;;  %v895_v15 = vadd.f32 %v863_v22, %v2462_v5  ;;  %v1220_v45 = vpack.c.bf16 %v2332_v55, %v2332_v55  ;;  %v1050_v56 = vadd.f32 %v1049_v41, %v2343_v0 }
 0x13d   :  { %v1102_v38 = vadd.f32 %v1101_v60, %v1100_v4  ;;  %v1137_v51 = vrot.slane %v1136_v34, 4  ;;  %v1061_v30 = vadd.f32 %v1060_v29, %v2378_v63  ;;  %v1075_v13 = vadd.f32 %v1074_v3, %v2391_v46 }
 0x13e   :  { %v1866_v24 = vpop.eup %1865  ;;  %v1092_v23 = vrot.slane %v1091_v12, 4  ;;  %v927_v53 = vmul.f32 0.7978846, %v895_v15  ;;  %v1067_v50 = vrot.slane %v1066_v8, 2  ;;  %v1084_v55 = vadd.f32 %v1083_v14, %v2446_v62 }
 0x13f   :  { %v1121_v40 = vrot.slane %v1120_v25, 2  ;;  %v1138_v35 = vadd.f32 %v1137_v51, %v1136_v34  ;;  %v1113_v1 = vadd.f32 %v1112_v36, %v1111_v19  ;;  %v1129_v0 = vadd.f32 %v1128_v52, %v1127_v32 }
 0x140   :  { %v1146_v41 = vrot.slane %v1145_v9, 4  ;;  %1871 = vtanh.f32 %v927_v53  ;;  %v2499_v17 = vunpack.c.l.b16 %v1220_v45  ;;  %v2504_v63 = vmul.f32 0.083333336, %v1186_v49 }
 0x141   :  { %v1103_v29 = vrot.slane %v1102_v38, 2  ;;  %v992_v46 = vadd.f32 1.0, %v1866_v24  ;;  %v1189_v3 = vsub.f32 %v1061_v30, %v2225_v26  ;;  %v1051_v4 = vrot.slane %v1050_v56, 1 }
 0x142   :  { %v1076_v2 = vrot.slane %v1075_v13, 2  ;;  %v1093_v62 = vadd.f32 %v1092_v23, %v1091_v12  ;;  %v1085_v10 = vrot.slane %v1084_v55, 2  ;;  %v1122_v6 = vadd.f32 %v1121_v40, %v1120_v25 }
 0x143   :  { %v1139_v43 = vrot.slane %v1138_v35, 2  ;;  %v768_v47 = vmul.f32 0.5, %v2400_v33  ;;  %v1068_v31 = vadd.f32 %v1067_v50, %v1066_v8  ;;  %v1114_v18 = vrot.slane %v1113_v1, 1 }
 0x144   :  { %v1868_v44 = vpop.eup %1867  ;;  %v1130_v59 = vrot.slane %v1129_v0, 2  ;;  %v1147_v20 = vadd.f32 %v1146_v41, %v1145_v9  ;;  %v1104_v28 = vadd.f32 %v1103_v29, %v1102_v38  ;;  %v769_v58 = vmul.f32 0.5, %v2436_v57 }
 0x145   :  { %v1024_v49 = vmul.f32 %v992_v46, %v768_v47  ;;  %v993_v27 = vadd.f32 1.0, %v1868_v44  ;;  %v1219_v16 = vpack.c.bf16 %v2504_v63, %v2504_v63  ;;  %v2511_v21 = vmul.f32 0.083333336, %v1189_v3 }
 0x146   :  { %v1052_v19 = vadd.f32 %v1051_v4, %v1050_v56  ;;  %v1094_v32 = vrot.slane %v1093_v62, 2  ;;  %v1086_v60 = vadd.f32 %v1085_v10, %v1084_v55  ;;  %v1123_v33 = vrot.slane %v1122_v6, 1 }
 0x147   :  { %v1870_v48 = vpop.eup %1869  ;;  %v1140_v7 = vadd.f32 %v1139_v43, %v1138_v35  ;;  %v1025_v8 = vmul.f32 %v993_v27, %v769_v58  ;;  %v1077_v22 = vadd.f32 %v1076_v2, %v1075_v13  ;;  %v1069_v12 = vrot.slane %v1068_v31, 1 }
 0x148   :  { %v1131_v61 = vadd.f32 %v1130_v59, %v1129_v0  ;;  %v1148_v54 = vrot.slane %v1147_v20, 2  ;;  %v1115_v14 = vadd.f32 %v1114_v18, %v1113_v1  ;;  %v1105_v25 = vrot.slane %v1104_v28, 1 }
 0x149   :  { %v1161_v57 = vsel %vm489_vm2, %v1024_v49, 0.0  ;;  %v1162_v42 = vsel %vm489_vm2, %v1025_v8, 0.0  ;;  %v1222_v34 = vpack.c.bf16 %v2511_v21, %v2511_v21  ;;  %v1188_v36 = vsub.f32 %v1052_v19, %v2225_v26 }
 0x14a   :  { %v990_v52 = vadd.f32 1.0, %v1870_v48  ;;  %v1163_v9 = vadd.f32 %v1162_v42, %v1161_v57  ;;  %v1095_v15 = vadd.f32 %v1094_v32, %v1093_v62  ;;  %v1087_v45 = vrot.slane %v1086_v60, 1 }
 0x14b   :  { %v1124_v56 = vadd.f32 %v1123_v33, %v1122_v6  ;;  %v1141_v38 = vrot.slane %v1140_v7, 1  ;;  %v1132_v51 = vrot.slane %v1131_v61, 1  ;;  %v1149_v24 = vadd.f32 %v1148_v54, %v1147_v20 }
 0x14c   :  { %v766_v30 = vmul.f32 0.5, %v2420_v11  ;;  %v1164_v13 = vrot.slane %v1163_v9, 4  ;;  %v1078_v53 = vrot.slane %v1077_v22, 1  ;;  %v1070_v50 = vadd.f32 %v1069_v12, %v1068_v31 }
 0x14d   :  { %v1872_v23 = vpop.eup %1871  ;;  %v1195_v55 = vsub.f32 %v1115_v14, %v2225_v26  ;;  %v1106_v40 = vadd.f32 %v1105_v25, %v1104_v28  ;;  %v767_v0 = vmul.f32 0.5, %v2462_v5  ;;  %v1096_v29 = vrot.slane %v1095_v15, 1 }
 0x14e   :  { %v1022_v35 = vmul.f32 %v990_v52, %v766_v30  ;;  %v1165_v1 = vadd.f32 %v1164_v13, %v1163_v9  ;;  %v991_v41 = vadd.f32 1.0, %v1872_v23  ;;  %v1088_v46 = vadd.f32 %v1087_v45, %v1086_v60 }
 0x14f   :  { %v1196_v3 = vsub.f32 %v1124_v56, %v2225_v26  ;;  %v1142_v4 = vadd.f32 %v1141_v38, %v1140_v7  ;;  %v1133_v2 = vadd.f32 %v1132_v51, %v1131_v61  ;;  %v1150_v62 = vrot.slane %v1149_v24, 1 }
 0x150   :  { %v1166_v11 = vrot.slane %v1165_v1, 2  ;;  %v1023_v10 = vmul.f32 %v991_v41, %v767_v0  ;;  %v1204_v6 = vmul.f32 0.083333336, %v1188_v36  ;;  %v1079_v43 = vadd.f32 %v1078_v53, %v1077_v22 }
 0x151   :  { %v1190_v47 = vsub.f32 %v1070_v50, %v2225_v26  ;;  %v1211_v44 = vmul.f32 0.083333336, %v1195_v55  ;;  %v1194_v31 = vsub.f32 %v1106_v40, %v2225_v26  ;;  %v1152_v18 = vsel %vm489_vm2, %v1022_v35, 0.0 }
 0x152   :  { %v1167_v5 = vadd.f32 %v1166_v11, %v1165_v1  ;;  %v1153_v59 = vsel %vm489_vm2, %v1023_v10, 0.0  ;;  %v1097_v20 = vadd.f32 %v1096_v29, %v1095_v15  ;;  %v1212_v28 = vmul.f32 0.083333336, %v1196_v3 }
 0x153   :  { %v1198_v49 = vsub.f32 %v1142_v4, %v2225_v26  ;;  %v1154_v58 = vadd.f32 %v1153_v59, %v1152_v18  ;;  %v1197_v27 = vsub.f32 %v1133_v2, %v2225_v26  ;;  %v1151_v21 = vadd.f32 %v1150_v62, %v1149_v24 }
 0x154   :  { %v1168_v19 = vrot.slane %v1167_v5, 1  ;;  %v1192_v32 = vsub.f32 %v1088_v46, %v2225_v26  ;;  %v1221_v48 = vpack.c.bf16 %v1204_v6, %v1204_v6  ;;  %v1206_v60 = vmul.f32 0.083333336, %v1190_v47 }
 0x155   :  { %v1228_v33 = vpack.c.bf16 %v1211_v44, %v1211_v44  ;;  %v1155_v7 = vrot.slane %v1154_v58, 4  ;;  %v1275_v8 = vrot.slane %v2499_v17, 7  ;;  %v1191_v22 = vsub.f32 %v1079_v43, %v2225_v26 }
 0x156   :  { %v1210_v12 = vmul.f32 0.083333336, %v1194_v31  ;;  %v1169_v61 = vadd.f32 %v1168_v19, %v1167_v5  ;;  %v1229_v54 = vpack.c.bf16 %v1212_v28, %v1212_v28  ;;  %v1214_v14 = vmul.f32 0.083333336, %v1198_v49 }
 0x157   :  { %v1156_v25 = vadd.f32 %v1155_v7, %v1154_v58  ;;  %v1193_v57 = vsub.f32 %v1097_v20, %v2225_v26  ;;  %v1262_v42 = vunpack.c.l.b16 %v1222_v34  ;;  %v1213_v36 = vmul.f32 0.083333336, %v1197_v27 }
 0x158   :  { %v1199_v52 = vsub.f32 %v1151_v21, %v2225_v26  ;;  %v1208_v9 = vmul.f32 0.083333336, %v1192_v32  ;;  %v1261_v15 = vunpack.c.l.b16 %v1221_v48  ;;  %v1223_v45 = vpack.c.bf16 %v1206_v60, %v1206_v60 }
 0x159   :  { %v1268_v56 = vunpack.c.l.b16 %v1228_v33  ;;  %v1157_v38 = vrot.slane %v1156_v25, 2  ;;  %v1259_v17 = vunpack.c.l.b16 %v1219_v16  ;;  %v1207_v51 = vmul.f32 0.083333336, %v1191_v22 }
 0x15a   :  { %v1227_v24 = vpack.c.bf16 %v1210_v12, %v1210_v12  ;;  %v1201_v30 = vsub.f32 %v1169_v61, %v2225_v26  ;;  %v1269_v13 = vunpack.c.l.b16 %v1229_v54  ;;  %v1231_v23 = vpack.c.bf16 %v1214_v14, %v1214_v14 }
 0x15b   :  { %v1158_v53 = vadd.f32 %v1157_v38, %v1156_v25  ;;  %v1209_v34 = vmul.f32 0.083333336, %v1193_v57  ;;  %v1281_v50 = vrot.slane %v1262_v42, 5  ;;  %v1230_v55 = vpack.c.bf16 %v1213_v36, %v1213_v36  ;;  %v1800_v38 = vld [vmem:[%s2601_s7 + $0x24] ss:$8 sps:$4 sm:$0xff]  }
 0x15c   :  { %v1215_v40 = vmul.f32 0.083333336, %v1199_v52  ;;  %v1225_v35 = vpack.c.bf16 %v1208_v9, %v1208_v9  ;;  %v1278_v1 = vrot.slane %v1261_v15, 6  ;;  %v1263_v0 = vunpack.c.l.b16 %v1223_v45  ;;  %v1795_v45 = vld [vmem:[%s2601_s7 + $0x30] ss:$8 sps:$4 sm:$0xff]  }
 0x15d   :  { %v1296_v41 = vrot.slane %v1268_v56, 7  ;;  %v1159_v29 = vrot.slane %v1158_v53, 1  ;;  %v1267_v46 = vunpack.c.l.b16 %v1227_v24  ;;  %v1217_v3 = vmul.f32 0.083333336, %v1201_v30  ;;  %v1797_v56 = vld [vmem:[%s2601_s7 + $0x34] ss:$8 sps:$4 sm:$0xff]  }
 0x15e   :  { %v1224_v63 = vpack.c.bf16 %v1207_v51, %v1207_v51  ;;  %v1298_v16 = vrot.slane %v1269_v13, 6  ;;  %v1271_v4 = vunpack.c.l.b16 %v1231_v23  ;;  %v1226_v62 = vpack.c.bf16 %v1209_v34, %v1209_v34  ;;  %1503 = vmatprep.subr.bf16.mxu1 %v1797_v56  ;;  %v2562_v51 = vld [vmem:[%s2600_s6] sm:$0x7] }
 0x15f   :  { %v1160_v2 = vadd.f32 %v1159_v29, %v1158_v53  ;;  %v1270_v11 = vunpack.c.l.b16 %v1230_v55  ;;  %v1232_v10 = vpack.c.bf16 %v1215_v40, %v1215_v40  ;;  %v1265_v6 = vunpack.c.l.b16 %v1225_v35  ;;  %1504 = vmatpush1.bf16.msra.mxu1 %v1795_v45 }
 0x160   :  { %v1277_v43 = vsel %vm1276_vm4, %v1275_v8, %v1259_v17  ;;  %v1284_v31 = vrot.slane %v1263_v0, 4  ;;  %v1234_v18 = vpack.c.bf16 %v1217_v3, %v1217_v3  ;;  %v1264_v5 = vunpack.c.l.b16 %v1224_v63  ;;  %v1798_v17 = vld [vmem:[%s2601_s7 + $0x20] ss:$8 sps:$4 sm:$0xff]   ;;  %1505 = vmatprep.subr.bf16.mxu1 %v1800_v38 }
 0x161   :  { %v1200_v47 = vsub.f32 %v1160_v2, %v2225_v26  ;;  %v1280_v44 = vsel %vm1279_vm5, %v1278_v1, %v1277_v43  ;;  %v1297_v59 = vsel %vm1276_vm4, %v1296_v41, %v1267_v46  ;;  %v1302_v49 = vrot.slane %v1271_v4, 4 }
 0x162   :  { %v1299_v28 = vsel %vm1279_vm5, %v1298_v16, %v1297_v59  ;;  %v1300_v58 = vrot.slane %v1270_v11, 5  ;;  %v1266_v27 = vunpack.c.l.b16 %v1226_v62  ;;  %v1272_v21 = vunpack.c.l.b16 %v1232_v10 }
 0x163   :  { %v1216_v20 = vmul.f32 0.083333336, %v1200_v47  ;;  %v1283_v19 = vsel %vm1282_vm6, %v1281_v50, %v1280_v44  ;;  %v1290_v48 = vrot.slane %v1265_v6, 2  ;;  %v1274_v60 = vunpack.c.l.b16 %v1234_v18  ;;  %1506 = vmatpush1.bf16.msra.mxu1 %v1798_v17 }
 0x164   :  { %v1286_v26 = vsel %vm1285_vm7, %v1284_v31, %v1283_v19  ;;  %v1287_v33 = vrot.slane %v1264_v5, 3  ;;  %v1301_v7 = vsel %vm1282_vm6, %v1300_v58, %v1299_v28  ;;  %v1304_v61 = vrot.slane %v1272_v21, 3  ;;  %v1803_v28 = vld [vmem:[%s2601_s7 + $0x14] ss:$8 sps:$4 sm:$0xff]   ;;  %v1806_v58 = vld [vmem:[%s2601_s7 + $0x4] ss:$8 sps:$4 sm:$0xff]  }
 0x165   :  { %v1233_v32 = vpack.c.bf16 %v1216_v20, %v1216_v20  ;;  %v1303_v22 = vsel %vm1285_vm7, %v1302_v49, %v1301_v7  ;;  %v1293_v25 = vrot.slane %v1266_v27, 1  ;;  %v1308_v42 = vrot.slane %v1274_v60, 1  ;;  %v1801_v20 = vld [vmem:[%s2601_s7 + $0x10] ss:$8 sps:$4 sm:$0xff]   ;;  %1507 = vmatprep.subr.bf16.mxu1 %v1803_v28  ;;  %v1804_v49 = vld [vmem:[%s2601_s7] ss:$8 sps:$4 sm:$0xff]  }
 0x166   :  { %v1289_v12 = vsel %vm1288_vm8, %v1287_v33, %v1286_v26  ;;  %v1305_v57 = vsel %vm1288_vm8, %v1304_v61, %v1303_v22  ;;  %v1242_v24 = vrot.slane %v2562_v51, %v2099_v39  ;;  %v1905_v27 = vmov 0  }
 0x167   :  { %v1273_v8 = vunpack.c.l.b16 %v1233_v32  ;;  %v1292_v54 = vsel %vm1291_vm9, %v1290_v48, %v1289_v12  ;;  %1508 = vmatpush1.bf16.msra.mxu1 %v1801_v20  ;;  %1527 = vmatprep.mubr.bf16.mxu1 %v1905_v27 }
 0x168   :  { %v1295_v52 = vsel %vm1294_vm10, %v1293_v25, %v1292_v54  ;;  %1509 = vmatprep.subr.bf16.mxu1 %v1806_v58 }
 0x169   :  { %v1306_v14 = vrot.slane %v1273_v8, 2 }
 0x16b   :  { %v1307_v36 = vsel %vm1291_vm9, %v1306_v14, %v1305_v57  ;;  %1510 = vmatpush1.bf16.msra.mxu1 %v1804_v49 }
 0x16c   :  { %v1309_v9 = vsel %vm1294_vm10, %v1308_v42, %v1307_v36  ;;  %v1421_v42 = vsub.s32 1, %v2096_v37 }
 0x16d   :  { %v1310_v15 = vpack.c.b16 %v1309_v9, %v1295_v52 }
 0x16e   :  { %v1422_v9 = vrot.slane %v2562_v51, %v1421_v42 }
 0x16f   :  { %1749 = vmatmul.mubr.msk.bf16.vlgmr.msra.gmra.mxu0 %vm489_vm2, %v1310_v15  ;;  %v1427_v15 = vsub.s32 2, %v2096_v37 }
 0x171   :  { %v1428_v17 = vrot.slane %v2562_v51, %v1427_v15 }
 0x22f   :  { %v1360_v30 = vpop.f32.mrf.mxu0 }
 0x230   :  { %v1361_v13 = vadd.f32 %v1360_v30, %v1242_v24 }
 0x231   :  { %v1750_v23 = vpop.f32.mrf.mxu0 }
 0x232   :  { %v1369_v53 = vmul.f32 0.044715, %v1361_v13  ;;  %v1367_v4 = vmul.f32 0.5, %v1361_v13 }
 0x233   :  { %v1363_v34 = vpop.f32.mrf.mxu0 }
 0x234   :  { %v1371_v50 = vmul.f32 %v1369_v53, %v1361_v13  ;;  %v1364_v55 = vadd.f32 %v1363_v34, %v1242_v24 }
 0x235   :  { %v1751_v40 = vpop.f32.mrf.mxu0 }
 0x236   :  { %v1370_v35 = vmul.f32 0.044715, %v1364_v55  ;;  %v1373_v1 = vmul.f32 %v1371_v50, %v1361_v13  ;;  %v1368_v43 = vmul.f32 0.5, %v1364_v55  ;;  %v1440_v50 = vld [vmem:[%s2602_s8] sm:$0x3] }
 0x237   :  { %v1449_v37 = vrot.slane %v1440_v50, %v1421_v42 }
 0x238   :  { %v1372_v0 = vmul.f32 %v1370_v35, %v1364_v55  ;;  %v1375_v41 = vadd.f32 %v1373_v1, %v1361_v13 }
 0x23a   :  { %v1374_v29 = vmul.f32 %v1372_v0, %v1364_v55  ;;  %v1377_v46 = vmul.f32 0.7978846, %v1375_v41 }
 0x23c   :  { %1873 = vtanh.f32 %v1377_v46  ;;  %v1376_v3 = vadd.f32 %v1374_v29, %v1364_v55  ;;  %v1445_v55 = vrot.slane %v1440_v50, %v2099_v39 }
 0x23e   :  { %v1378_v63 = vmul.f32 0.7978846, %v1376_v3 }
 0x240   :  { %1875 = vtanh.f32 %v1378_v63 }
 0x249   :  { %v1874_v16 = vpop.eup %1873 }
 0x24a   :  { %v1381_v2 = vadd.f32 1.0, %v1874_v16 }
 0x24c   :  { %v1383_v62 = vmul.f32 %v1381_v2, %v1367_v4 }
 0x24d   :  { %v1876_v11 = vpop.eup %1875 }
 0x24e   :  { %v1386_v10 = vsel %vm1385_vm11, %v1383_v62, 0.0  ;;  %v1395_v6 = vmul.f32 %v1383_v62, %v1383_v62  ;;  %v1382_v47 = vadd.f32 1.0, %v1876_v11 }
 0x24f   :  { %1387 = vadd.xlane.f32.xlu0 %v1386_v10 }
 0x250   :  { %v1397_v44 = vsel %vm1385_vm11, %v1395_v6, 0.0  ;;  %v1384_v31 = vmul.f32 %v1382_v47, %v1368_v43 }
 0x251   :  { %1398 = vadd.xlane.f32.xlu1 %v1397_v44 }
 0x252   :  { %v1389_v18 = vsel %vm1385_vm11, %v1384_v31, 0.0  ;;  %v1396_v5 = vmul.f32 %v1384_v31, %v1384_v31 }
 0x253   :  { %1390 = vadd.xlane.f32.xlu0 %v1389_v18 }
 0x254   :  { %v1400_v59 = vsel %vm1385_vm11, %v1396_v5, 0.0 }
 0x255   :  { %1401 = vadd.xlane.f32.xlu1 %v1400_v59 }
 0x2d8   :  { %v1388_v21 = vpop.xlane.xlu0 %1387 }
 0x2d9   :  { %v1393_v19 = vmul.f32 0.015625, %v1388_v21 }
 0x2da   :  { %v1399_v32 = vpop.xlane.xlu1 %1398 }
 0x2db   :  { %v1405_v26 = vmul.f32 %v1393_v19, %v1393_v19  ;;  %v1403_v48 = vmul.f32 0.015625, %v1399_v32  ;;  %v1411_v36 = vsub.f32 %v1383_v62, %v1393_v19 }
 0x2dc   :  { %v1391_v60 = vpop.xlane.xlu0 %1390 }
 0x2dd   :  { %v1407_v33 = vsub.f32 %v1403_v48, %v1405_v26  ;;  %v1394_v7 = vmul.f32 0.015625, %v1391_v60 }
 0x2de   :  { %v1402_v8 = vpop.xlane.xlu1 %1401 }
 0x2df   :  { %v1409_v22 = vmax.f32 %v1407_v33, 0.0  ;;  %v1406_v12 = vmul.f32 %v1394_v7, %v1394_v7  ;;  %v1404_v61 = vmul.f32 0.015625, %v1402_v8  ;;  %v1412_v56 = vsub.f32 %v1384_v31, %v1394_v7 }
 0x2e1   :  { %v1413_v54 = vadd.f32 1e-12, %v1409_v22  ;;  %v1408_v14 = vsub.f32 %v1404_v61, %v1406_v12 }
 0x2e3   :  { %1877 = vrsqrt.f32 %v1413_v54  ;;  %v1410_v25 = vmax.f32 %v1408_v14, 0.0 }
 0x2e5   :  { %v1414_v57 = vadd.f32 1e-12, %v1410_v25 }
 0x2e7   :  { %1879 = vrsqrt.f32 %v1414_v57 }
 0x2f0   :  { %v1878_v52 = vpop.eup %1877 }
 0x2f1   :  { %v1417_v45 = vmul.f32 %v1878_v52, %v1411_v36 }
 0x2f3   :  { %v1423_v24 = vmul.f32 %v1422_v9, %v1417_v45 }
 0x2f4   :  { %v1880_v38 = vpop.eup %1879 }
 0x2f5   :  { %v1418_v30 = vmul.f32 %v1880_v38, %v1412_v56  ;;  %v1429_v23 = vadd.f32 %v1428_v17, %v1423_v24 }
 0x2f7   :  { %v1424_v13 = vmul.f32 %v1422_v9, %v1418_v30 }
 0x2f9   :  { %v1430_v53 = vadd.f32 %v1428_v17, %v1424_v13 }
 0x2fb   :  { %v1431_v34 = vpack.c.bf16 %v1430_v53, %v1429_v23 }
 0x2fd   :  { %1635 = vmatmul.mubr.msk.bf16.vlgmr.msra.gmra.mxu1 %vm1385_vm11, %v1431_v34 }
 0x3bd   :  { %v1529_v40 = vpop.f32.mrf.mxu1 }
 0x3be   :  { %v1530_v35 = vadd.f32 %v1529_v40, %v1445_v55 }
 0x3bf   :  { %v1531_v1 = vpop.f32.mrf.mxu1 }
 0x3c0   :  { %1538 = vst [vmem:[#allocation2] sm:$0xff] %v1530_v35  ;;  %v1532_v51 = vadd.f32 %v1531_v1, %v1449_v37 }
 0x3c1   :  { %v1533_v0 = vpop.f32.mrf.mxu1 }
 0x3c2   :  { %1539 = vst [vmem:[#allocation2 + $0x8] sm:$0xff] %v1532_v51  ;;  %v1534_v41 = vadd.f32 %v1533_v0, %v1445_v55 }
 0x3c3   :  { %v1535_v29 = vpop.f32.mrf.mxu1 }
 0x3c4   :  { %1540 = vst [vmem:[#allocation2 + $0x10] sm:$0xff] %v1534_v41  ;;  %v1536_v46 = vadd.f32 %v1535_v29, %v1449_v37 }
 0x3c6   :  { %1541 = vst [vmem:[#allocation2 + $0x18] sm:$0xff] %v1536_v46 }
 0x3c7   :  { %1892 = shalt.err (!%p1889_p4)
}
 0x3c8   :  { %s1907_s8 = smov 256   ;;  %s1908_s1 = smov 16  }
 0x3c9   :  { %1553 = dma.vmem_to_hbm [thread:$0]  %s1548_s29, 512, %s2603_s9, [#allocation3], %s1907_s8, %s1907_s8, %s1908_s1  }
 0x3ca   :  { %1901 = dma.done.wait [#allocation3], 512  }
 0x3cb   :  { %1902 = vsyncadd [#allocation3], 4294966784 }
 0x3cc   :  { %1557 = vsyncpa [#allocation3], 1 }

</bundles_post_ra>
